<compile_context>
chip_gen: v7x
topology: tpu7x:2x2x1
jax: 0.10.0
libtpu: 0.0.40
codegen_flags: <defaults>
</compile_context>

<pallas_src>
import jax
import jax.numpy as jnp
import numpy as np
from jax import lax
from jax.experimental import pallas as pl
from jax.experimental.pallas import tpu as pltpu

KH = 5
KW = 5


# ----------------------------- Pallas kernels ------------------------------

def _conv_pool_kernel(x_ref, w_ref, b_ref, o_ref):
    """Fused 'VALID' 5x5 conv + bias + ReLU + 2x2/2 max-pool for one image.

    x_ref: (H, Cin, W)        image, channels on sublanes, width on lanes
    w_ref: (Cout, KH*KW*Cin)  weight matrix, feature order (dy, dx, ci)
    b_ref: (Cout, 1)
    o_ref: (H2, Cout, W2)     pooled output, H2=(H-4)//2, W2=(W-4)//2
    """
    H, Cin, W = x_ref.shape
    H2, Cout, W2 = o_ref.shape
    OW = 2 * W2                      # conv output width (= W - 4, even here)

    w = w_ref[...]                   # (Cout, K)
    b = b_ref[...]                   # (Cout, 1)

    # Constant 0/1 selection matrix: columns [0, W2) pick even conv columns,
    # columns [W2, 2*W2) pick odd conv columns -> stride-2 part of the pool is
    # a plain matmul followed by two contiguous slices.
    row_i = lax.broadcasted_iota(jnp.int32, (OW, OW), 0)
    col_i = lax.broadcasted_iota(jnp.int32, (OW, OW), 1)
    sel = jnp.where(col_i < W2,
                    (row_i == 2 * col_i).astype(jnp.float32),
                    (row_i == 2 * (col_i - W2) + 1).astype(jnp.float32))

    def body(r, carry):
        # Input rows needed for pooled output row r: 2r .. 2r+5.
        rows = []
        for d in range(KH + 1):
            v = x_ref[pl.ds(2 * r + d, 1), :, :]       # (1, Cin, W)
            rows.append(v[0])                          # (Cin, W)

        def patches(d0):
            pieces = [rows[d0 + dy][:, dx:dx + OW]
                      for dy in range(KH) for dx in range(KW)]
            return jnp.concatenate(pieces, axis=0)     # (KH*KW*Cin, OW)

        # Both conv rows (2r and 2r+1) in a single MXU call.
        p2 = jnp.concatenate([patches(0), patches(1)], axis=1)    # (K, 2*OW)
        c = jnp.dot(w, p2, preferred_element_type=jnp.float32)    # (Cout, 2*OW)
        m = jnp.maximum(c[:, :OW], c[:, OW:])           # vertical 2x max
        ms = jnp.dot(m, sel, preferred_element_type=jnp.float32)  # (Cout, 2*W2)
        m2 = jnp.maximum(ms[:, :W2], ms[:, W2:])        # horizontal 2x max
        out = jnp.maximum(m2 + b, 0.0)                  # bias + ReLU
        o_ref[pl.ds(r, 1), :, :] = out[None].astype(o_ref.dtype)
        return carry

    lax.fori_loop(0, H2, body, jnp.int32(0))


def _mlp_kernel(x_ref, w1_ref, b1_ref, w2_ref, b2_ref, w3_ref, b3_ref, o_ref):
    # fc1 runs on the bf16 MXU path (w1 is stored bf16), accumulation in f32.
    x = x_ref[...].astype(jnp.bfloat16)
    h = jnp.dot(x, w1_ref[...], preferred_element_type=jnp.float32) + b1_ref[...]
    h = jnp.maximum(h, 0.0)
    h = jnp.dot(h, w2_ref[...], preferred_element_type=jnp.float32) + b2_ref[...]
    h = jnp.maximum(h, 0.0)
    o_ref[...] = jnp.dot(h, w3_ref[...], preferred_element_type=jnp.float32) + b3_ref[...]


# ----------------------------- Pallas wrappers ------------------------------

def conv_pool(x_nhcw, w_mat, b_col):
    """Fused conv(5x5, VALID) + bias + ReLU + maxpool(2,2).

    x_nhcw: (N, H, Cin, W); w_mat: (Cout, 25*Cin); b_col: (Cout, 1).
    Returns (N, H2, Cout, W2) with H2=(H-4)//2, W2=(W-4)//2.
    """
    N, H, Cin, W = x_nhcw.shape
    Cout, K = w_mat.shape
    assert K == KH * KW * Cin
    assert (H - (KH - 1)) % 2 == 0 and (W - (KW - 1)) % 2 == 0
    H2 = (H - (KH - 1)) // 2
    W2 = (W - (KW - 1)) // 2
    return pl.pallas_call(
        _conv_pool_kernel,
        out_shape=jax.ShapeDtypeStruct((N, H2, Cout, W2), jnp.float32),
        grid=(N,),
        in_specs=[
            pl.BlockSpec((None, H, Cin, W), lambda n: (n, 0, 0, 0)),
            pl.BlockSpec((Cout, K), lambda n: (0, 0)),
            pl.BlockSpec((Cout, 1), lambda n: (0, 0)),
        ],
        out_specs=pl.BlockSpec((None, H2, Cout, W2), lambda n: (n, 0, 0, 0)),
        compiler_params=pltpu.CompilerParams(dimension_semantics=("parallel",)),
    )(x_nhcw, w_mat, b_col)


def mlp(x, w1, b1, w2, b2, w3, b3):
    """Fused fc1(+relu) -> fc2(+relu) -> fc3 in one Pallas kernel (full blocks)."""
    n = x.shape[0]
    return pl.pallas_call(
        _mlp_kernel,
        out_shape=jax.ShapeDtypeStruct((n, w3.shape[1]), jnp.float32),
    )(x, w1, b1, w2, b2, w3, b3)


# ----------------------------- Param preparation (one-time) -----------------

def prepare_params(p):
    """One-time layout prep: conv weights -> (Cout, 25*Cin) with (dy,dx,ci) order,
    fc weights pre-transposed (fc1 also permuted to our (y,c,x) flatten order and
    cast to bf16)."""
    def conv_prep(w_oihw, b):
        co, ci, kh, kw = w_oihw.shape
        w_mat = jnp.transpose(w_oihw, (2, 3, 1, 0)).reshape(kh * kw * ci, co).T
        return jnp.asarray(w_mat), b.reshape(co, 1)

    c1_w, c1_b = conv_prep(p["conv1_w"], p["conv1_b"])
    c2_w, c2_b = conv_prep(p["conv2_w"], p["conv2_b"])

    # PyTorch flattens NCHW -> (c, y, x); our activation layout flattens (y, c, x).
    w1 = p["fc1_w"].reshape(120, 16, 29, 29).transpose(0, 2, 1, 3).reshape(120, 16 * 29 * 29)
    w1 = w1.T.astype(jnp.bfloat16)                     # (13456, 120) bf16

    return {
        "c1_w": c1_w, "c1_b": c1_b,
        "c2_w": c2_w, "c2_b": c2_b,
        "w1": w1, "b1": p["fc1_b"].reshape(1, -1),
        "w2": p["fc2_w"].T, "b2": p["fc2_b"].reshape(1, -1),
        "w3": p["fc3_w"].T, "b3": p["fc3_b"].reshape(1, -1),
    }


# ----------------------------- Full forward pass ----------------------------

def net_forward(x_nchw, pp):
    # Thin XLA glue: put channels on sublanes / width on lanes -> (N, H, C, W).
    x = jnp.transpose(x_nchw, (0, 2, 1, 3))
    x = conv_pool(x, pp["c1_w"], pp["c1_b"])           # (N, 62, 6, 62)
    x = conv_pool(x, pp["c2_w"], pp["c2_b"])           # (N, 29, 16, 29)
    x = x.reshape(x.shape[0], -1)                      # (N, 13456) in (y, c, x) order
    return mlp(x, pp["w1"], pp["b1"], pp["w2"], pp["b2"], pp["w3"], pp["b3"])


# ----------------------------- Reference (pure JAX) --------------------------

def net_forward_reference(x, p):
    def conv(x, w, b):
        y = lax.conv_general_dilated(x, w, (1, 1), "VALID",
                                     dimension_numbers=("NCHW", "OIHW", "NCHW"))
        return jnp.maximum(y + b[None, :, None, None], 0.0)

    def pool(y):
        return lax.reduce_window(y, -jnp.inf, lax.max,
                                 (1, 1, 2, 2), (1, 1, 2, 2), "VALID")

    y = pool(conv(x, p["conv1_w"], p["conv1_b"]))
    y = pool(conv(y, p["conv2_w"], p["conv2_b"]))
    h = y.reshape(y.shape[0], -1)
    h = jnp.maximum(h @ p["fc1_w"].T + p["fc1_b"], 0.0)
    h = jnp.maximum(h @ p["fc2_w"].T + p["fc2_b"], 0.0)
    return h @ p["fc3_w"].T + p["fc3_b"]


# ----------------------------- Params & main ---------------------------------

def init_params(key):
    ks = jax.random.split(key, 10)
    s = 0.05
    return {
        "conv1_w": s * jax.random.normal(ks[0], (6, 3, 5, 5), jnp.float32),
        "conv1_b": s * jax.random.normal(ks[1], (6,), jnp.float32),
        "conv2_w": s * jax.random.normal(ks[2], (16, 6, 5, 5), jnp.float32),
        "conv2_b": s * jax.random.normal(ks[3], (16,), jnp.float32),
        "fc1_w": s * jax.random.normal(ks[4], (120, 16 * 29 * 29), jnp.float32),
        "fc1_b": s * jax.random.normal(ks[5], (120,), jnp.float32),
        "fc2_w": s * jax.random.normal(ks[6], (84, 120), jnp.float32),
        "fc2_b": s * jax.random.normal(ks[7], (84,), jnp.float32),
        "fc3_w": s * jax.random.normal(ks[8], (2, 84), jnp.float32),
        "fc3_b": s * jax.random.normal(ks[9], (2,), jnp.float32),
    }


if __name__ == "__main__":
    key = jax.random.PRNGKey(0)
    pkey, xkey = jax.random.split(key)
    params = init_params(pkey)
    prepped = prepare_params(params)   # one-time weight layout prep (not per-forward)

    # Input shape forced by fc1 = Linear(16*29*29, 120): (batch=2, C=3, 128, 128).
    x = jax.random.normal(xkey, (2, 3, 128, 128), jnp.float32)

    fwd = jax.jit(net_forward)
    out = jax.block_until_ready(fwd(x, prepped))
    assert out.shape == (2, 2)

    ref = net_forward_reference(x, params)
    np.testing.assert_allclose(np.asarray(out), np.asarray(ref), rtol=5e-2, atol=5e-2)

    print("KERNEL_OK")
</pallas_src>

<mosaic_0001>
module attributes {stable_mosaic.version = 11 : i64} {
  func.func @_conv_pool_kernel(%arg0: i32, %arg1: memref<1x62x6x62xf32, #tpu.memory_space<vmem>>, %arg2: memref<16x150xf32, #tpu.memory_space<vmem>>, %arg3: memref<16x1xf32, #tpu.memory_space<vmem>>, %arg4: memref<1x29x16x29xf32, #tpu.memory_space<vmem>>) attributes {dimension_semantics = [#tpu.dimension_semantics<parallel>], iteration_bounds = array<i64: 2>, scalar_prefetch = 0 : i64, scratch_operands = 0 : i64, tpu.core_type = #tpu.core_type<tc>, window_params = [{transform_indices = @transform_0, window_bounds = array<i64: 1, 62, 6, 62>}, {pipeline_mode = #tpu.pipeline_mode<synchronous>, transform_indices = @transform_1, window_bounds = array<i64: 16, 150>}, {pipeline_mode = #tpu.pipeline_mode<synchronous>, transform_indices = @transform_2, window_bounds = array<i64: 16, 1>}, {transform_indices = @transform_3, window_bounds = array<i64: 1, 29, 16, 29>}]} {
    %c0 = arith.constant 0 : index
    %c0_0 = arith.constant 0 : index
    %0 = vector.load %arg2[%c0, %c0_0] : memref<16x150xf32, #tpu.memory_space<vmem>>, vector<16x150xf32>
    %c0_1 = arith.constant 0 : index
    %c0_2 = arith.constant 0 : index
    %1 = vector.load %arg3[%c0_1, %c0_2] : memref<16x1xf32, #tpu.memory_space<vmem>>, vector<16x1xf32>
    %2 = tpu.iota {dimensions = array<i32: 0>} : vector<58x58xi32>
    %3 = tpu.iota {dimensions = array<i32: 1>} : vector<58x58xi32>
    %c29_i32 = arith.constant 29 : i32
    %4 = vector.broadcast %c29_i32 : i32 to vector<58x58xi32>
    %5 = arith.cmpi slt, %3, %4 : vector<58x58xi32>
    %c2_i32 = arith.constant 2 : i32
    %6 = vector.broadcast %c2_i32 : i32 to vector<58x58xi32>
    %7 = arith.muli %6, %3 : vector<58x58xi32>
    %8 = arith.cmpi eq, %2, %7 : vector<58x58xi32>
    %9 = arith.extui %8 : vector<58x58xi1> to vector<58x58xi32>
    %10 = arith.sitofp %9 : vector<58x58xi32> to vector<58x58xf32>
    %c29_i32_3 = arith.constant 29 : i32
    %11 = vector.broadcast %c29_i32_3 : i32 to vector<58x58xi32>
    %12 = arith.subi %3, %11 : vector<58x58xi32>
    %c2_i32_4 = arith.constant 2 : i32
    %13 = vector.broadcast %c2_i32_4 : i32 to vector<58x58xi32>
    %14 = arith.muli %13, %12 : vector<58x58xi32>
    %c1_i32 = arith.constant 1 : i32
    %15 = vector.broadcast %c1_i32 : i32 to vector<58x58xi32>
    %16 = arith.addi %14, %15 : vector<58x58xi32>
    %17 = arith.cmpi eq, %2, %16 : vector<58x58xi32>
    %18 = arith.extui %17 : vector<58x58xi1> to vector<58x58xi32>
    %19 = arith.sitofp %18 : vector<58x58xi32> to vector<58x58xf32>
    %20 = arith.select %5, %10, %19 : vector<58x58xi1>, vector<58x58xf32>
    %c0_i32 = arith.constant 0 : i32
    %c29_i32_5 = arith.constant 29 : i32
    %21 = arith.addi %c0_i32, %c29_i32_5 : i32
    %c1_i32_6 = arith.constant 1 : i32
    scf.for %arg5 = %c0_i32 to %21 step %c1_i32_6  : i32 {
      %c2_i32_8 = arith.constant 2 : i32
      %22 = arith.muli %c2_i32_8, %arg5 : i32
      %c0_i32_9 = arith.constant 0 : i32
      %23 = arith.addi %22, %c0_i32_9 : i32
      %c0_10 = arith.constant 0 : index
      %24 = arith.index_cast %23 : i32 to index
      %c0_11 = arith.constant 0 : index
      %c0_12 = arith.constant 0 : index
      %25 = vector.load %arg1[%c0_10, %24, %c0_11, %c0_12] : memref<1x62x6x62xf32, #tpu.memory_space<vmem>>, vector<1x1x6x62xf32>
      %26 = vector.shape_cast %25 : vector<1x1x6x62xf32> to vector<1x6x62xf32>
      %27 = vector.shape_cast %26 : vector<1x6x62xf32> to vector<6x62xf32>
      %c2_i32_13 = arith.constant 2 : i32
      %28 = arith.muli %c2_i32_13, %arg5 : i32
      %c1_i32_14 = arith.constant 1 : i32
      %29 = arith.addi %28, %c1_i32_14 : i32
      %c0_15 = arith.constant 0 : index
      %30 = arith.index_cast %29 : i32 to index
      %c0_16 = arith.constant 0 : index
      %c0_17 = arith.constant 0 : index
      %31 = vector.load %arg1[%c0_15, %30, %c0_16, %c0_17] : memref<1x62x6x62xf32, #tpu.memory_space<vmem>>, vector<1x1x6x62xf32>
      %32 = vector.shape_cast %31 : vector<1x1x6x62xf32> to vector<1x6x62xf32>
      %33 = vector.shape_cast %32 : vector<1x6x62xf32> to vector<6x62xf32>
      %c2_i32_18 = arith.constant 2 : i32
      %34 = arith.muli %c2_i32_18, %arg5 : i32
      %c2_i32_19 = arith.constant 2 : i32
      %35 = arith.addi %34, %c2_i32_19 : i32
      %c0_20 = arith.constant 0 : index
      %36 = arith.index_cast %35 : i32 to index
      %c0_21 = arith.constant 0 : index
      %c0_22 = arith.constant 0 : index
      %37 = vector.load %arg1[%c0_20, %36, %c0_21, %c0_22] : memref<1x62x6x62xf32, #tpu.memory_space<vmem>>, vector<1x1x6x62xf32>
      %38 = vector.shape_cast %37 : vector<1x1x6x62xf32> to vector<1x6x62xf32>
      %39 = vector.shape_cast %38 : vector<1x6x62xf32> to vector<6x62xf32>
      %c2_i32_23 = arith.constant 2 : i32
      %40 = arith.muli %c2_i32_23, %arg5 : i32
      %c3_i32 = arith.constant 3 : i32
      %41 = arith.addi %40, %c3_i32 : i32
      %c0_24 = arith.constant 0 : index
      %42 = arith.index_cast %41 : i32 to index
      %c0_25 = arith.constant 0 : index
      %c0_26 = arith.constant 0 : index
      %43 = vector.load %arg1[%c0_24, %42, %c0_25, %c0_26] : memref<1x62x6x62xf32, #tpu.memory_space<vmem>>, vector<1x1x6x62xf32>
      %44 = vector.shape_cast %43 : vector<1x1x6x62xf32> to vector<1x6x62xf32>
      %45 = vector.shape_cast %44 : vector<1x6x62xf32> to vector<6x62xf32>
      %c2_i32_27 = arith.constant 2 : i32
      %46 = arith.muli %c2_i32_27, %arg5 : i32
      %c4_i32 = arith.constant 4 : i32
      %47 = arith.addi %46, %c4_i32 : i32
      %c0_28 = arith.constant 0 : index
      %48 = arith.index_cast %47 : i32 to index
      %c0_29 = arith.constant 0 : index
      %c0_30 = arith.constant 0 : index
      %49 = vector.load %arg1[%c0_28, %48, %c0_29, %c0_30] : memref<1x62x6x62xf32, #tpu.memory_space<vmem>>, vector<1x1x6x62xf32>
      %50 = vector.shape_cast %49 : vector<1x1x6x62xf32> to vector<1x6x62xf32>
      %51 = vector.shape_cast %50 : vector<1x6x62xf32> to vector<6x62xf32>
      %c2_i32_31 = arith.constant 2 : i32
      %52 = arith.muli %c2_i32_31, %arg5 : i32
      %c5_i32 = arith.constant 5 : i32
      %53 = arith.addi %52, %c5_i32 : i32
      %c0_32 = arith.constant 0 : index
      %54 = arith.index_cast %53 : i32 to index
      %c0_33 = arith.constant 0 : index
      %c0_34 = arith.constant 0 : index
      %55 = vector.load %arg1[%c0_32, %54, %c0_33, %c0_34] : memref<1x62x6x62xf32, #tpu.memory_space<vmem>>, vector<1x1x6x62xf32>
      %56 = vector.shape_cast %55 : vector<1x1x6x62xf32> to vector<1x6x62xf32>
      %57 = vector.shape_cast %56 : vector<1x6x62xf32> to vector<6x62xf32>
      %58 = vector.extract_strided_slice %27 {offsets = [0, 0], sizes = [6, 58], strides = [1, 1]} : vector<6x62xf32> to vector<6x58xf32>
      %59 = vector.extract_strided_slice %27 {offsets = [0, 1], sizes = [6, 58], strides = [1, 1]} : vector<6x62xf32> to vector<6x58xf32>
      %60 = vector.extract_strided_slice %27 {offsets = [0, 2], sizes = [6, 58], strides = [1, 1]} : vector<6x62xf32> to vector<6x58xf32>
      %61 = vector.extract_strided_slice %27 {offsets = [0, 3], sizes = [6, 58], strides = [1, 1]} : vector<6x62xf32> to vector<6x58xf32>
      %62 = vector.extract_strided_slice %27 {offsets = [0, 4], sizes = [6, 58], strides = [1, 1]} : vector<6x62xf32> to vector<6x58xf32>
      %63 = vector.extract_strided_slice %33 {offsets = [0, 0], sizes = [6, 58], strides = [1, 1]} : vector<6x62xf32> to vector<6x58xf32>
      %64 = vector.extract_strided_slice %33 {offsets = [0, 1], sizes = [6, 58], strides = [1, 1]} : vector<6x62xf32> to vector<6x58xf32>
      %65 = vector.extract_strided_slice %33 {offsets = [0, 2], sizes = [6, 58], strides = [1, 1]} : vector<6x62xf32> to vector<6x58xf32>
      %66 = vector.extract_strided_slice %33 {offsets = [0, 3], sizes = [6, 58], strides = [1, 1]} : vector<6x62xf32> to vector<6x58xf32>
      %67 = vector.extract_strided_slice %33 {offsets = [0, 4], sizes = [6, 58], strides = [1, 1]} : vector<6x62xf32> to vector<6x58xf32>
      %68 = vector.extract_strided_slice %39 {offsets = [0, 0], sizes = [6, 58], strides = [1, 1]} : vector<6x62xf32> to vector<6x58xf32>
      %69 = vector.extract_strided_slice %39 {offsets = [0, 1], sizes = [6, 58], strides = [1, 1]} : vector<6x62xf32> to vector<6x58xf32>
      %70 = vector.extract_strided_slice %39 {offsets = [0, 2], sizes = [6, 58], strides = [1, 1]} : vector<6x62xf32> to vector<6x58xf32>
      %71 = vector.extract_strided_slice %39 {offsets = [0, 3], sizes = [6, 58], strides = [1, 1]} : vector<6x62xf32> to vector<6x58xf32>
      %72 = vector.extract_strided_slice %39 {offsets = [0, 4], sizes = [6, 58], strides = [1, 1]} : vector<6x62xf32> to vector<6x58xf32>
      %73 = vector.extract_strided_slice %45 {offsets = [0, 0], sizes = [6, 58], strides = [1, 1]} : vector<6x62xf32> to vector<6x58xf32>
      %74 = vector.extract_strided_slice %45 {offsets = [0, 1], sizes = [6, 58], strides = [1, 1]} : vector<6x62xf32> to vector<6x58xf32>
      %75 = vector.extract_strided_slice %45 {offsets = [0, 2], sizes = [6, 58], strides = [1, 1]} : vector<6x62xf32> to vector<6x58xf32>
      %76 = vector.extract_strided_slice %45 {offsets = [0, 3], sizes = [6, 58], strides = [1, 1]} : vector<6x62xf32> to vector<6x58xf32>
      %77 = vector.extract_strided_slice %45 {offsets = [0, 4], sizes = [6, 58], strides = [1, 1]} : vector<6x62xf32> to vector<6x58xf32>
      %78 = vector.extract_strided_slice %51 {offsets = [0, 0], sizes = [6, 58], strides = [1, 1]} : vector<6x62xf32> to vector<6x58xf32>
      %79 = vector.extract_strided_slice %51 {offsets = [0, 1], sizes = [6, 58], strides = [1, 1]} : vector<6x62xf32> to vector<6x58xf32>
      %80 = vector.extract_strided_slice %51 {offsets = [0, 2], sizes = [6, 58], strides = [1, 1]} : vector<6x62xf32> to vector<6x58xf32>
      %81 = vector.extract_strided_slice %51 {offsets = [0, 3], sizes = [6, 58], strides = [1, 1]} : vector<6x62xf32> to vector<6x58xf32>
      %82 = vector.extract_strided_slice %51 {offsets = [0, 4], sizes = [6, 58], strides = [1, 1]} : vector<6x62xf32> to vector<6x58xf32>
      %83 = tpu.concatenate %58, %59, %60, %61, %62, %63, %64, %65, %66, %67, %68, %69, %70, %71, %72, %73 in 0 : vector<6x58xf32>, vector<6x58xf32>, vector<6x58xf32>, vector<6x58xf32>, vector<6x58xf32>, vector<6x58xf32>, vector<6x58xf32>, vector<6x58xf32>, vector<6x58xf32>, vector<6x58xf32>, vector<6x58xf32>, vector<6x58xf32>, vector<6x58xf32>, vector<6x58xf32>, vector<6x58xf32>, vector<6x58xf32> -> vector<96x58xf32>
      %84 = tpu.concatenate %74, %75, %76, %77, %78, %79, %80, %81, %82 in 0 : vector<6x58xf32>, vector<6x58xf32>, vector<6x58xf32>, vector<6x58xf32>, vector<6x58xf32>, vector<6x58xf32>, vector<6x58xf32>, vector<6x58xf32>, vector<6x58xf32> -> vector<54x58xf32>
      %85 = tpu.concatenate %83, %84 in 0 : vector<96x58xf32>, vector<54x58xf32> -> vector<150x58xf32>
      %86 = vector.extract_strided_slice %33 {offsets = [0, 0], sizes = [6, 58], strides = [1, 1]} : vector<6x62xf32> to vector<6x58xf32>
      %87 = vector.extract_strided_slice %33 {offsets = [0, 1], sizes = [6, 58], strides = [1, 1]} : vector<6x62xf32> to vector<6x58xf32>
      %88 = vector.extract_strided_slice %33 {offsets = [0, 2], sizes = [6, 58], strides = [1, 1]} : vector<6x62xf32> to vector<6x58xf32>
      %89 = vector.extract_strided_slice %33 {offsets = [0, 3], sizes = [6, 58], strides = [1, 1]} : vector<6x62xf32> to vector<6x58xf32>
      %90 = vector.extract_strided_slice %33 {offsets = [0, 4], sizes = [6, 58], strides = [1, 1]} : vector<6x62xf32> to vector<6x58xf32>
      %91 = vector.extract_strided_slice %39 {offsets = [0, 0], sizes = [6, 58], strides = [1, 1]} : vector<6x62xf32> to vector<6x58xf32>
      %92 = vector.extract_strided_slice %39 {offsets = [0, 1], sizes = [6, 58], strides = [1, 1]} : vector<6x62xf32> to vector<6x58xf32>
      %93 = vector.extract_strided_slice %39 {offsets = [0, 2], sizes = [6, 58], strides = [1, 1]} : vector<6x62xf32> to vector<6x58xf32>
      %94 = vector.extract_strided_slice %39 {offsets = [0, 3], sizes = [6, 58], strides = [1, 1]} : vector<6x62xf32> to vector<6x58xf32>
      %95 = vector.extract_strided_slice %39 {offsets = [0, 4], sizes = [6, 58], strides = [1, 1]} : vector<6x62xf32> to vector<6x58xf32>
      %96 = vector.extract_strided_slice %45 {offsets = [0, 0], sizes = [6, 58], strides = [1, 1]} : vector<6x62xf32> to vector<6x58xf32>
      %97 = vector.extract_strided_slice %45 {offsets = [0, 1], sizes = [6, 58], strides = [1, 1]} : vector<6x62xf32> to vector<6x58xf32>
      %98 = vector.extract_strided_slice %45 {offsets = [0, 2], sizes = [6, 58], strides = [1, 1]} : vector<6x62xf32> to vector<6x58xf32>
      %99 = vector.extract_strided_slice %45 {offsets = [0, 3], sizes = [6, 58], strides = [1, 1]} : vector<6x62xf32> to vector<6x58xf32>
      %100 = vector.extract_strided_slice %45 {offsets = [0, 4], sizes = [6, 58], strides = [1, 1]} : vector<6x62xf32> to vector<6x58xf32>
      %101 = vector.extract_strided_slice %51 {offsets = [0, 0], sizes = [6, 58], strides = [1, 1]} : vector<6x62xf32> to vector<6x58xf32>
      %102 = vector.extract_strided_slice %51 {offsets = [0, 1], sizes = [6, 58], strides = [1, 1]} : vector<6x62xf32> to vector<6x58xf32>
      %103 = vector.extract_strided_slice %51 {offsets = [0, 2], sizes = [6, 58], strides = [1, 1]} : vector<6x62xf32> to vector<6x58xf32>
      %104 = vector.extract_strided_slice %51 {offsets = [0, 3], sizes = [6, 58], strides = [1, 1]} : vector<6x62xf32> to vector<6x58xf32>
      %105 = vector.extract_strided_slice %51 {offsets = [0, 4], sizes = [6, 58], strides = [1, 1]} : vector<6x62xf32> to vector<6x58xf32>
      %106 = vector.extract_strided_slice %57 {offsets = [0, 0], sizes = [6, 58], strides = [1, 1]} : vector<6x62xf32> to vector<6x58xf32>
      %107 = vector.extract_strided_slice %57 {offsets = [0, 1], sizes = [6, 58], strides = [1, 1]} : vector<6x62xf32> to vector<6x58xf32>
      %108 = vector.extract_strided_slice %57 {offsets = [0, 2], sizes = [6, 58], strides = [1, 1]} : vector<6x62xf32> to vector<6x58xf32>
      %109 = vector.extract_strided_slice %57 {offsets = [0, 3], sizes = [6, 58], strides = [1, 1]} : vector<6x62xf32> to vector<6x58xf32>
      %110 = vector.extract_strided_slice %57 {offsets = [0, 4], sizes = [6, 58], strides = [1, 1]} : vector<6x62xf32> to vector<6x58xf32>
      %111 = tpu.concatenate %86, %87, %88, %89, %90, %91, %92, %93, %94, %95, %96, %97, %98, %99, %100, %101 in 0 : vector<6x58xf32>, vector<6x58xf32>, vector<6x58xf32>, vector<6x58xf32>, vector<6x58xf32>, vector<6x58xf32>, vector<6x58xf32>, vector<6x58xf32>, vector<6x58xf32>, vector<6x58xf32>, vector<6x58xf32>, vector<6x58xf32>, vector<6x58xf32>, vector<6x58xf32>, vector<6x58xf32>, vector<6x58xf32> -> vector<96x58xf32>
      %112 = tpu.concatenate %102, %103, %104, %105, %106, %107, %108, %109, %110 in 0 : vector<6x58xf32>, vector<6x58xf32>, vector<6x58xf32>, vector<6x58xf32>, vector<6x58xf32>, vector<6x58xf32>, vector<6x58xf32>, vector<6x58xf32>, vector<6x58xf32> -> vector<54x58xf32>
      %113 = tpu.concatenate %111, %112 in 0 : vector<96x58xf32>, vector<54x58xf32> -> vector<150x58xf32>
      %114 = tpu.concatenate %85, %113 in 1 : vector<150x58xf32>, vector<150x58xf32> -> vector<150x116xf32>
      %cst = arith.constant dense<0.000000e+00> : vector<16x116xf32>
      %115 = tpu.matmul %0, %114, %cst {dimension_numbers = #tpu.dot_dimension_numbers<[1], [0], [0], [1], [0, 0, 1, 1], [], []>} : vector<16x150xf32>, vector<150x116xf32>, vector<16x116xf32> -> vector<16x116xf32>
      %116 = vector.extract_strided_slice %115 {offsets = [0, 0], sizes = [16, 58], strides = [1, 1]} : vector<16x116xf32> to vector<16x58xf32>
      %117 = vector.extract_strided_slice %115 {offsets = [0, 58], sizes = [16, 58], strides = [1, 1]} : vector<16x116xf32> to vector<16x58xf32>
      %118 = arith.maximumf %116, %117 : vector<16x58xf32>
      %cst_35 = arith.constant dense<0.000000e+00> : vector<16x58xf32>
      %119 = tpu.matmul %118, %20, %cst_35 {dimension_numbers = #tpu.dot_dimension_numbers<[1], [0], [0], [1], [0, 0, 1, 1], [], []>} : vector<16x58xf32>, vector<58x58xf32>, vector<16x58xf32> -> vector<16x58xf32>
      %120 = vector.extract_strided_slice %119 {offsets = [0, 0], sizes = [16, 29], strides = [1, 1]} : vector<16x58xf32> to vector<16x29xf32>
      %121 = vector.extract_strided_slice %119 {offsets = [0, 29], sizes = [16, 29], strides = [1, 1]} : vector<16x58xf32> to vector<16x29xf32>
      %122 = arith.maximumf %120, %121 : vector<16x29xf32>
      %123 = vector.broadcast %1 : vector<16x1xf32> to vector<16x29xf32>
      %124 = arith.addf %122, %123 : vector<16x29xf32>
      %cst_36 = arith.constant 0.000000e+00 : f32
      %125 = vector.broadcast %cst_36 : f32 to vector<16x29xf32>
      %126 = arith.maximumf %124, %125 : vector<16x29xf32>
      %127 = vector.shape_cast %126 : vector<16x29xf32> to vector<1x16x29xf32>
      %c0_37 = arith.constant 0 : index
      %128 = arith.index_cast %arg5 : i32 to index
      %c0_38 = arith.constant 0 : index
      %c0_39 = arith.constant 0 : index
      %129 = vector.load %arg4[%c0_37, %128, %c0_38, %c0_39] : memref<1x29x16x29xf32, #tpu.memory_space<vmem>>, vector<1x1x16x29xf32>
      %130 = vector.shape_cast %129 : vector<1x1x16x29xf32> to vector<1x16x29xf32>
      %131 = vector.shape_cast %127 : vector<1x16x29xf32> to vector<1x1x16x29xf32>
      tpu.vector_store %arg4[%c0_37, %128, %c0_38, %c0_39], %131 {strides = array<i32>} : memref<1x29x16x29xf32, #tpu.memory_space<vmem>>, vector<1x1x16x29xf32>,
    }
    %c29_i32_7 = arith.constant 29 : i32
    return
  }
  func.func @transform_0(%arg0: i32) -> (i32, i32, i32, i32) {
    %c0_i32 = arith.constant 0 : i32
    %c0_i32_0 = arith.constant 0 : i32
    %c0_i32_1 = arith.constant 0 : i32
    %c0_i32_2 = arith.constant 0 : i32
    return %arg0, %c0_i32, %c0_i32_0, %c0_i32_1 : i32, i32, i32, i32
  }
  func.func @transform_1(%arg0: i32) -> (i32, i32) {
    %c0_i32 = arith.constant 0 : i32
    %c0_i32_0 = arith.constant 0 : i32
    %c0_i32_1 = arith.constant 0 : i32
    return %c0_i32, %c0_i32_0 : i32, i32
  }
  func.func @transform_2(%arg0: i32) -> (i32, i32) {
    %c0_i32 = arith.constant 0 : i32
    %c0_i32_0 = arith.constant 0 : i32
    %c0_i32_1 = arith.constant 0 : i32
    return %c0_i32, %c0_i32_0 : i32, i32
  }
  func.func @transform_3(%arg0: i32) -> (i32, i32, i32, i32) {
    %c0_i32 = arith.constant 0 : i32
    %c0_i32_0 = arith.constant 0 : i32
    %c0_i32_1 = arith.constant 0 : i32
    %c0_i32_2 = arith.constant 0 : i32
    return %arg0, %c0_i32, %c0_i32_0, %c0_i32_1 : i32, i32, i32, i32
  }
}

module attributes {stable_mosaic.version = 11 : i64} {
  func.func @_conv_pool_kernel(%arg0: i32, %arg1: memref<1x128x3x128xf32, #tpu.memory_space<vmem>>, %arg2: memref<6x75xf32, #tpu.memory_space<vmem>>, %arg3: memref<6x1xf32, #tpu.memory_space<vmem>>, %arg4: memref<1x62x6x62xf32, #tpu.memory_space<vmem>>) attributes {dimension_semantics = [#tpu.dimension_semantics<parallel>], iteration_bounds = array<i64: 2>, scalar_prefetch = 0 : i64, scratch_operands = 0 : i64, tpu.core_type = #tpu.core_type<tc>, window_params = [{transform_indices = @transform_0, window_bounds = array<i64: 1, 128, 3, 128>}, {pipeline_mode = #tpu.pipeline_mode<synchronous>, transform_indices = @transform_1, window_bounds = array<i64: 6, 75>}, {pipeline_mode = #tpu.pipeline_mode<synchronous>, transform_indices = @transform_2, window_bounds = array<i64: 6, 1>}, {transform_indices = @transform_3, window_bounds = array<i64: 1, 62, 6, 62>}]} {
    %c0 = arith.constant 0 : index
    %c0_0 = arith.constant 0 : index
    %0 = vector.load %arg2[%c0, %c0_0] : memref<6x75xf32, #tpu.memory_space<vmem>>, vector<6x75xf32>
    %c0_1 = arith.constant 0 : index
    %c0_2 = arith.constant 0 : index
    %1 = vector.load %arg3[%c0_1, %c0_2] : memref<6x1xf32, #tpu.memory_space<vmem>>, vector<6x1xf32>
    %2 = tpu.iota {dimensions = array<i32: 0>} : vector<124x124xi32>
    %3 = tpu.iota {dimensions = array<i32: 1>} : vector<124x124xi32>
    %c62_i32 = arith.constant 62 : i32
    %4 = vector.broadcast %c62_i32 : i32 to vector<124x124xi32>
    %5 = arith.cmpi slt, %3, %4 : vector<124x124xi32>
    %c2_i32 = arith.constant 2 : i32
    %6 = vector.broadcast %c2_i32 : i32 to vector<124x124xi32>
    %7 = arith.muli %6, %3 : vector<124x124xi32>
    %8 = arith.cmpi eq, %2, %7 : vector<124x124xi32>
    %9 = arith.extui %8 : vector<124x124xi1> to vector<124x124xi32>
    %10 = arith.sitofp %9 : vector<124x124xi32> to vector<124x124xf32>
    %c62_i32_3 = arith.constant 62 : i32
    %11 = vector.broadcast %c62_i32_3 : i32 to vector<124x124xi32>
    %12 = arith.subi %3, %11 : vector<124x124xi32>
    %c2_i32_4 = arith.constant 2 : i32
    %13 = vector.broadcast %c2_i32_4 : i32 to vector<124x124xi32>
    %14 = arith.muli %13, %12 : vector<124x124xi32>
    %c1_i32 = arith.constant 1 : i32
    %15 = vector.broadcast %c1_i32 : i32 to vector<124x124xi32>
    %16 = arith.addi %14, %15 : vector<124x124xi32>
    %17 = arith.cmpi eq, %2, %16 : vector<124x124xi32>
    %18 = arith.extui %17 : vector<124x124xi1> to vector<124x124xi32>
    %19 = arith.sitofp %18 : vector<124x124xi32> to vector<124x124xf32>
    %20 = arith.select %5, %10, %19 : vector<124x124xi1>, vector<124x124xf32>
    %c0_i32 = arith.constant 0 : i32
    %c62_i32_5 = arith.constant 62 : i32
    %21 = arith.addi %c0_i32, %c62_i32_5 : i32
    %c1_i32_6 = arith.constant 1 : i32
    scf.for %arg5 = %c0_i32 to %21 step %c1_i32_6  : i32 {
      %c2_i32_8 = arith.constant 2 : i32
      %22 = arith.muli %c2_i32_8, %arg5 : i32
      %c0_i32_9 = arith.constant 0 : i32
      %23 = arith.addi %22, %c0_i32_9 : i32
      %c0_10 = arith.constant 0 : index
      %24 = arith.index_cast %23 : i32 to index
      %c0_11 = arith.constant 0 : index
      %c0_12 = arith.constant 0 : index
      %25 = vector.load %arg1[%c0_10, %24, %c0_11, %c0_12] : memref<1x128x3x128xf32, #tpu.memory_space<vmem>>, vector<1x1x3x128xf32>
      %26 = vector.shape_cast %25 : vector<1x1x3x128xf32> to vector<1x3x128xf32>
      %27 = vector.shape_cast %26 : vector<1x3x128xf32> to vector<3x128xf32>
      %c2_i32_13 = arith.constant 2 : i32
      %28 = arith.muli %c2_i32_13, %arg5 : i32
      %c1_i32_14 = arith.constant 1 : i32
      %29 = arith.addi %28, %c1_i32_14 : i32
      %c0_15 = arith.constant 0 : index
      %30 = arith.index_cast %29 : i32 to index
      %c0_16 = arith.constant 0 : index
      %c0_17 = arith.constant 0 : index
      %31 = vector.load %arg1[%c0_15, %30, %c0_16, %c0_17] : memref<1x128x3x128xf32, #tpu.memory_space<vmem>>, vector<1x1x3x128xf32>
      %32 = vector.shape_cast %31 : vector<1x1x3x128xf32> to vector<1x3x128xf32>
      %33 = vector.shape_cast %32 : vector<1x3x128xf32> to vector<3x128xf32>
      %c2_i32_18 = arith.constant 2 : i32
      %34 = arith.muli %c2_i32_18, %arg5 : i32
      %c2_i32_19 = arith.constant 2 : i32
      %35 = arith.addi %34, %c2_i32_19 : i32
      %c0_20 = arith.constant 0 : index
      %36 = arith.index_cast %35 : i32 to index
      %c0_21 = arith.constant 0 : index
      %c0_22 = arith.constant 0 : index
      %37 = vector.load %arg1[%c0_20, %36, %c0_21, %c0_22] : memref<1x128x3x128xf32, #tpu.memory_space<vmem>>, vector<1x1x3x128xf32>
      %38 = vector.shape_cast %37 : vector<1x1x3x128xf32> to vector<1x3x128xf32>
      %39 = vector.shape_cast %38 : vector<1x3x128xf32> to vector<3x128xf32>
      %c2_i32_23 = arith.constant 2 : i32
      %40 = arith.muli %c2_i32_23, %arg5 : i32
      %c3_i32 = arith.constant 3 : i32
      %41 = arith.addi %40, %c3_i32 : i32
      %c0_24 = arith.constant 0 : index
      %42 = arith.index_cast %41 : i32 to index
      %c0_25 = arith.constant 0 : index
      %c0_26 = arith.constant 0 : index
      %43 = vector.load %arg1[%c0_24, %42, %c0_25, %c0_26] : memref<1x128x3x128xf32, #tpu.memory_space<vmem>>, vector<1x1x3x128xf32>
      %44 = vector.shape_cast %43 : vector<1x1x3x128xf32> to vector<1x3x128xf32>
      %45 = vector.shape_cast %44 : vector<1x3x128xf32> to vector<3x128xf32>
      %c2_i32_27 = arith.constant 2 : i32
      %46 = arith.muli %c2_i32_27, %arg5 : i32
      %c4_i32 = arith.constant 4 : i32
      %47 = arith.addi %46, %c4_i32 : i32
      %c0_28 = arith.constant 0 : index
      %48 = arith.index_cast %47 : i32 to index
      %c0_29 = arith.constant 0 : index
      %c0_30 = arith.constant 0 : index
      %49 = vector.load %arg1[%c0_28, %48, %c0_29, %c0_30] : memref<1x128x3x128xf32, #tpu.memory_space<vmem>>, vector<1x1x3x128xf32>
      %50 = vector.shape_cast %49 : vector<1x1x3x128xf32> to vector<1x3x128xf32>
      %51 = vector.shape_cast %50 : vector<1x3x128xf32> to vector<3x128xf32>
      %c2_i32_31 = arith.constant 2 : i32
      %52 = arith.muli %c2_i32_31, %arg5 : i32
      %c5_i32 = arith.constant 5 : i32
      %53 = arith.addi %52, %c5_i32 : i32
      %c0_32 = arith.constant 0 : index
      %54 = arith.index_cast %53 : i32 to index
      %c0_33 = arith.constant 0 : index
      %c0_34 = arith.constant 0 : index
      %55 = vector.load %arg1[%c0_32, %54, %c0_33, %c0_34] : memref<1x128x3x128xf32, #tpu.memory_space<vmem>>, vector<1x1x3x128xf32>
      %56 = vector.shape_cast %55 : vector<1x1x3x128xf32> to vector<1x3x128xf32>
      %57 = vector.shape_cast %56 : vector<1x3x128xf32> to vector<3x128xf32>
      %58 = vector.extract_strided_slice %27 {offsets = [0, 0], sizes = [3, 124], strides = [1, 1]} : vector<3x128xf32> to vector<3x124xf32>
      %59 = vector.extract_strided_slice %27 {offsets = [0, 1], sizes = [3, 124], strides = [1, 1]} : vector<3x128xf32> to vector<3x124xf32>
      %60 = vector.extract_strided_slice %27 {offsets = [0, 2], sizes = [3, 124], strides = [1, 1]} : vector<3x128xf32> to vector<3x124xf32>
      %61 = vector.extract_strided_slice %27 {offsets = [0, 3], sizes = [3, 124], strides = [1, 1]} : vector<3x128xf32> to vector<3x124xf32>
      %62 = vector.extract_strided_slice %27 {offsets = [0, 4], sizes = [3, 124], strides = [1, 1]} : vector<3x128xf32> to vector<3x124xf32>
      %63 = vector.extract_strided_slice %33 {offsets = [0, 0], sizes = [3, 124], strides = [1, 1]} : vector<3x128xf32> to vector<3x124xf32>
      %64 = vector.extract_strided_slice %33 {offsets = [0, 1], sizes = [3, 124], strides = [1, 1]} : vector<3x128xf32> to vector<3x124xf32>
      %65 = vector.extract_strided_slice %33 {offsets = [0, 2], sizes = [3, 124], strides = [1, 1]} : vector<3x128xf32> to vector<3x124xf32>
      %66 = vector.extract_strided_slice %33 {offsets = [0, 3], sizes = [3, 124], strides = [1, 1]} : vector<3x128xf32> to vector<3x124xf32>
      %67 = vector.extract_strided_slice %33 {offsets = [0, 4], sizes = [3, 124], strides = [1, 1]} : vector<3x128xf32> to vector<3x124xf32>
      %68 = vector.extract_strided_slice %39 {offsets = [0, 0], sizes = [3, 124], strides = [1, 1]} : vector<3x128xf32> to vector<3x124xf32>
      %69 = vector.extract_strided_slice %39 {offsets = [0, 1], sizes = [3, 124], strides = [1, 1]} : vector<3x128xf32> to vector<3x124xf32>
      %70 = vector.extract_strided_slice %39 {offsets = [0, 2], sizes = [3, 124], strides = [1, 1]} : vector<3x128xf32> to vector<3x124xf32>
      %71 = vector.extract_strided_slice %39 {offsets = [0, 3], sizes = [3, 124], strides = [1, 1]} : vector<3x128xf32> to vector<3x124xf32>
      %72 = vector.extract_strided_slice %39 {offsets = [0, 4], sizes = [3, 124], strides = [1, 1]} : vector<3x128xf32> to vector<3x124xf32>
      %73 = vector.extract_strided_slice %45 {offsets = [0, 0], sizes = [3, 124], strides = [1, 1]} : vector<3x128xf32> to vector<3x124xf32>
      %74 = vector.extract_strided_slice %45 {offsets = [0, 1], sizes = [3, 124], strides = [1, 1]} : vector<3x128xf32> to vector<3x124xf32>
      %75 = vector.extract_strided_slice %45 {offsets = [0, 2], sizes = [3, 124], strides = [1, 1]} : vector<3x128xf32> to vector<3x124xf32>
      %76 = vector.extract_strided_slice %45 {offsets = [0, 3], sizes = [3, 124], strides = [1, 1]} : vector<3x128xf32> to vector<3x124xf32>
      %77 = vector.extract_strided_slice %45 {offsets = [0, 4], sizes = [3, 124], strides = [1, 1]} : vector<3x128xf32> to vector<3x124xf32>
      %78 = vector.extract_strided_slice %51 {offsets = [0, 0], sizes = [3, 124], strides = [1, 1]} : vector<3x128xf32> to vector<3x124xf32>
      %79 = vector.extract_strided_slice %51 {offsets = [0, 1], sizes = [3, 124], strides = [1, 1]} : vector<3x128xf32> to vector<3x124xf32>
      %80 = vector.extract_strided_slice %51 {offsets = [0, 2], sizes = [3, 124], strides = [1, 1]} : vector<3x128xf32> to vector<3x124xf32>
      %81 = vector.extract_strided_slice %51 {offsets = [0, 3], sizes = [3, 124], strides = [1, 1]} : vector<3x128xf32> to vector<3x124xf32>
      %82 = vector.extract_strided_slice %51 {offsets = [0, 4], sizes = [3, 124], strides = [1, 1]} : vector<3x128xf32> to vector<3x124xf32>
      %83 = tpu.concatenate %58, %59, %60, %61, %62, %63, %64, %65, %66, %67, %68, %69, %70, %71, %72, %73 in 0 : vector<3x124xf32>, vector<3x124xf32>, vector<3x124xf32>, vector<3x124xf32>, vector<3x124xf32>, vector<3x124xf32>, vector<3x124xf32>, vector<3x124xf32>, vector<3x124xf32>, vector<3x124xf32>, vector<3x124xf32>, vector<3x124xf32>, vector<3x124xf32>, vector<3x124xf32>, vector<3x124xf32>, vector<3x124xf32> -> vector<48x124xf32>
      %84 = tpu.concatenate %74, %75, %76, %77, %78, %79, %80, %81, %82 in 0 : vector<3x124xf32>, vector<3x124xf32>, vector<3x124xf32>, vector<3x124xf32>, vector<3x124xf32>, vector<3x124xf32>, vector<3x124xf32>, vector<3x124xf32>, vector<3x124xf32> -> vector<27x124xf32>
      %85 = tpu.concatenate %83, %84 in 0 : vector<48x124xf32>, vector<27x124xf32> -> vector<75x124xf32>
      %86 = vector.extract_strided_slice %33 {offsets = [0, 0], sizes = [3, 124], strides = [1, 1]} : vector<3x128xf32> to vector<3x124xf32>
      %87 = vector.extract_strided_slice %33 {offsets = [0, 1], sizes = [3, 124], strides = [1, 1]} : vector<3x128xf32> to vector<3x124xf32>
      %88 = vector.extract_strided_slice %33 {offsets = [0, 2], sizes = [3, 124], strides = [1, 1]} : vector<3x128xf32> to vector<3x124xf32>
      %89 = vector.extract_strided_slice %33 {offsets = [0, 3], sizes = [3, 124], strides = [1, 1]} : vector<3x128xf32> to vector<3x124xf32>
      %90 = vector.extract_strided_slice %33 {offsets = [0, 4], sizes = [3, 124], strides = [1, 1]} : vector<3x128xf32> to vector<3x124xf32>
      %91 = vector.extract_strided_slice %39 {offsets = [0, 0], sizes = [3, 124], strides = [1, 1]} : vector<3x128xf32> to vector<3x124xf32>
      %92 = vector.extract_strided_slice %39 {offsets = [0, 1], sizes = [3, 124], strides = [1, 1]} : vector<3x128xf32> to vector<3x124xf32>
      %93 = vector.extract_strided_slice %39 {offsets = [0, 2], sizes = [3, 124], strides = [1, 1]} : vector<3x128xf32> to vector<3x124xf32>
      %94 = vector.extract_strided_slice %39 {offsets = [0, 3], sizes = [3, 124], strides = [1, 1]} : vector<3x128xf32> to vector<3x124xf32>
      %95 = vector.extract_strided_slice %39 {offsets = [0, 4], sizes = [3, 124], strides = [1, 1]} : vector<3x128xf32> to vector<3x124xf32>
      %96 = vector.extract_strided_slice %45 {offsets = [0, 0], sizes = [3, 124], strides = [1, 1]} : vector<3x128xf32> to vector<3x124xf32>
      %97 = vector.extract_strided_slice %45 {offsets = [0, 1], sizes = [3, 124], strides = [1, 1]} : vector<3x128xf32> to vector<3x124xf32>
      %98 = vector.extract_strided_slice %45 {offsets = [0, 2], sizes = [3, 124], strides = [1, 1]} : vector<3x128xf32> to vector<3x124xf32>
      %99 = vector.extract_strided_slice %45 {offsets = [0, 3], sizes = [3, 124], strides = [1, 1]} : vector<3x128xf32> to vector<3x124xf32>
      %100 = vector.extract_strided_slice %45 {offsets = [0, 4], sizes = [3, 124], strides = [1, 1]} : vector<3x128xf32> to vector<3x124xf32>
      %101 = vector.extract_strided_slice %51 {offsets = [0, 0], sizes = [3, 124], strides = [1, 1]} : vector<3x128xf32> to vector<3x124xf32>
      %102 = vector.extract_strided_slice %51 {offsets = [0, 1], sizes = [3, 124], strides = [1, 1]} : vector<3x128xf32> to vector<3x124xf32>
      %103 = vector.extract_strided_slice %51 {offsets = [0, 2], sizes = [3, 124], strides = [1, 1]} : vector<3x128xf32> to vector<3x124xf32>
      %104 = vector.extract_strided_slice %51 {offsets = [0, 3], sizes = [3, 124], strides = [1, 1]} : vector<3x128xf32> to vector<3x124xf32>
      %105 = vector.extract_strided_slice %51 {offsets = [0, 4], sizes = [3, 124], strides = [1, 1]} : vector<3x128xf32> to vector<3x124xf32>
      %106 = vector.extract_strided_slice %57 {offsets = [0, 0], sizes = [3, 124], strides = [1, 1]} : vector<3x128xf32> to vector<3x124xf32>
      %107 = vector.extract_strided_slice %57 {offsets = [0, 1], sizes = [3, 124], strides = [1, 1]} : vector<3x128xf32> to vector<3x124xf32>
      %108 = vector.extract_strided_slice %57 {offsets = [0, 2], sizes = [3, 124], strides = [1, 1]} : vector<3x128xf32> to vector<3x124xf32>
      %109 = vector.extract_strided_slice %57 {offsets = [0, 3], sizes = [3, 124], strides = [1, 1]} : vector<3x128xf32> to vector<3x124xf32>
      %110 = vector.extract_strided_slice %57 {offsets = [0, 4], sizes = [3, 124], strides = [1, 1]} : vector<3x128xf32> to vector<3x124xf32>
      %111 = tpu.concatenate %86, %87, %88, %89, %90, %91, %92, %93, %94, %95, %96, %97, %98, %99, %100, %101 in 0 : vector<3x124xf32>, vector<3x124xf32>, vector<3x124xf32>, vector<3x124xf32>, vector<3x124xf32>, vector<3x124xf32>, vector<3x124xf32>, vector<3x124xf32>, vector<3x124xf32>, vector<3x124xf32>, vector<3x124xf32>, vector<3x124xf32>, vector<3x124xf32>, vector<3x124xf32>, vector<3x124xf32>, vector<3x124xf32> -> vector<48x124xf32>
      %112 = tpu.concatenate %102, %103, %104, %105, %106, %107, %108, %109, %110 in 0 : vector<3x124xf32>, vector<3x124xf32>, vector<3x124xf32>, vector<3x124xf32>, vector<3x124xf32>, vector<3x124xf32>, vector<3x124xf32>, vector<3x124xf32>, vector<3x124xf32> -> vector<27x124xf32>
      %113 = tpu.concatenate %111, %112 in 0 : vector<48x124xf32>, vector<27x124xf32> -> vector<75x124xf32>
      %114 = tpu.concatenate %85, %113 in 1 : vector<75x124xf32>, vector<75x124xf32> -> vector<75x248xf32>
      %cst = arith.constant dense<0.000000e+00> : vector<6x248xf32>
      %115 = tpu.matmul %0, %114, %cst {dimension_numbers = #tpu.dot_dimension_numbers<[1], [0], [0], [1], [0, 0, 1, 1], [], []>} : vector<6x75xf32>, vector<75x248xf32>, vector<6x248xf32> -> vector<6x248xf32>
      %116 = vector.extract_strided_slice %115 {offsets = [0, 0], sizes = [6, 124], strides = [1, 1]} : vector<6x248xf32> to vector<6x124xf32>
      %117 = vector.extract_strided_slice %115 {offsets = [0, 124], sizes = [6, 124], strides = [1, 1]} : vector<6x248xf32> to vector<6x124xf32>
      %118 = arith.maximumf %116, %117 : vector<6x124xf32>
      %cst_35 = arith.constant dense<0.000000e+00> : vector<6x124xf32>
      %119 = tpu.matmul %118, %20, %cst_35 {dimension_numbers = #tpu.dot_dimension_numbers<[1], [0], [0], [1], [0, 0, 1, 1], [], []>} : vector<6x124xf32>, vector<124x124xf32>, vector<6x124xf32> -> vector<6x124xf32>
      %120 = vector.extract_strided_slice %119 {offsets = [0, 0], sizes = [6, 62], strides = [1, 1]} : vector<6x124xf32> to vector<6x62xf32>
      %121 = vector.extract_strided_slice %119 {offsets = [0, 62], sizes = [6, 62], strides = [1, 1]} : vector<6x124xf32> to vector<6x62xf32>
      %122 = arith.maximumf %120, %121 : vector<6x62xf32>
      %123 = vector.broadcast %1 : vector<6x1xf32> to vector<6x62xf32>
      %124 = arith.addf %122, %123 : vector<6x62xf32>
      %cst_36 = arith.constant 0.000000e+00 : f32
      %125 = vector.broadcast %cst_36 : f32 to vector<6x62xf32>
      %126 = arith.maximumf %124, %125 : vector<6x62xf32>
      %127 = vector.shape_cast %126 : vector<6x62xf32> to vector<1x6x62xf32>
      %c0_37 = arith.constant 0 : index
      %128 = arith.index_cast %arg5 : i32 to index
      %c0_38 = arith.constant 0 : index
      %c0_39 = arith.constant 0 : index
      %129 = vector.load %arg4[%c0_37, %128, %c0_38, %c0_39] : memref<1x62x6x62xf32, #tpu.memory_space<vmem>>, vector<1x1x6x62xf32>
      %130 = vector.shape_cast %129 : vector<1x1x6x62xf32> to vector<1x6x62xf32>
      %131 = vector.shape_cast %127 : vector<1x6x62xf32> to vector<1x1x6x62xf32>
      tpu.vector_store %arg4[%c0_37, %128, %c0_38, %c0_39], %131 {strides = array<i32>} : memref<1x62x6x62xf32, #tpu.memory_space<vmem>>, vector<1x1x6x62xf32>,
    }
    %c62_i32_7 = arith.constant 62 : i32
    return
  }
  func.func @transform_0(%arg0: i32) -> (i32, i32, i32, i32) {
    %c0_i32 = arith.constant 0 : i32
    %c0_i32_0 = arith.constant 0 : i32
    %c0_i32_1 = arith.constant 0 : i32
    %c0_i32_2 = arith.constant 0 : i32
    return %arg0, %c0_i32, %c0_i32_0, %c0_i32_1 : i32, i32, i32, i32
  }
  func.func @transform_1(%arg0: i32) -> (i32, i32) {
    %c0_i32 = arith.constant 0 : i32
    %c0_i32_0 = arith.constant 0 : i32
    %c0_i32_1 = arith.constant 0 : i32
    return %c0_i32, %c0_i32_0 : i32, i32
  }
  func.func @transform_2(%arg0: i32) -> (i32, i32) {
    %c0_i32 = arith.constant 0 : i32
    %c0_i32_0 = arith.constant 0 : i32
    %c0_i32_1 = arith.constant 0 : i32
    return %c0_i32, %c0_i32_0 : i32, i32
  }
  func.func @transform_3(%arg0: i32) -> (i32, i32, i32, i32) {
    %c0_i32 = arith.constant 0 : i32
    %c0_i32_0 = arith.constant 0 : i32
    %c0_i32_1 = arith.constant 0 : i32
    %c0_i32_2 = arith.constant 0 : i32
    return %arg0, %c0_i32, %c0_i32_0, %c0_i32_1 : i32, i32, i32, i32
  }
}

module attributes {stable_mosaic.version = 11 : i64} {
  func.func @_mlp_kernel(%arg0: memref<2x13456xf32, #tpu.memory_space<vmem>>, %arg1: memref<13456x120xbf16, #tpu.memory_space<vmem>>, %arg2: memref<1x120xf32, #tpu.memory_space<vmem>>, %arg3: memref<120x84xf32, #tpu.memory_space<vmem>>, %arg4: memref<1x84xf32, #tpu.memory_space<vmem>>, %arg5: memref<84x2xf32, #tpu.memory_space<vmem>>, %arg6: memref<1x2xf32, #tpu.memory_space<vmem>>, %arg7: memref<2x2xf32, #tpu.memory_space<vmem>>) attributes {dimension_semantics = [], scalar_prefetch = 0 : i64, scratch_operands = 0 : i64, tpu.core_type = #tpu.core_type<tc>} {
    %c0 = arith.constant 0 : index
    %c0_0 = arith.constant 0 : index
    %0 = vector.load %arg0[%c0, %c0_0] : memref<2x13456xf32, #tpu.memory_space<vmem>>, vector<2x13456xf32>
    %1 = arith.truncf %0 : vector<2x13456xf32> to vector<2x13456xbf16>
    %c0_1 = arith.constant 0 : index
    %c0_2 = arith.constant 0 : index
    %2 = vector.load %arg1[%c0_1, %c0_2] : memref<13456x120xbf16, #tpu.memory_space<vmem>>, vector<13456x120xbf16>
    %cst = arith.constant dense<0.000000e+00> : vector<2x120xf32>
    %3 = tpu.matmul %1, %2, %cst {dimension_numbers = #tpu.dot_dimension_numbers<[1], [0], [0], [1], [0, 0, 1, 1], [], []>} : vector<2x13456xbf16>, vector<13456x120xbf16>, vector<2x120xf32> -> vector<2x120xf32>
    %c0_3 = arith.constant 0 : index
    %c0_4 = arith.constant 0 : index
    %4 = vector.load %arg2[%c0_3, %c0_4] : memref<1x120xf32, #tpu.memory_space<vmem>>, vector<1x120xf32>
    %5 = vector.broadcast %4 : vector<1x120xf32> to vector<2x120xf32>
    %6 = arith.addf %3, %5 : vector<2x120xf32>
    %cst_5 = arith.constant 0.000000e+00 : f32
    %7 = vector.broadcast %cst_5 : f32 to vector<2x120xf32>
    %8 = arith.maximumf %6, %7 : vector<2x120xf32>
    %c0_6 = arith.constant 0 : index
    %c0_7 = arith.constant 0 : index
    %9 = vector.load %arg3[%c0_6, %c0_7] : memref<120x84xf32, #tpu.memory_space<vmem>>, vector<120x84xf32>
    %cst_8 = arith.constant dense<0.000000e+00> : vector<2x84xf32>
    %10 = tpu.matmul %8, %9, %cst_8 {dimension_numbers = #tpu.dot_dimension_numbers<[1], [0], [0], [1], [0, 0, 1, 1], [], []>} : vector<2x120xf32>, vector<120x84xf32>, vector<2x84xf32> -> vector<2x84xf32>
    %c0_9 = arith.constant 0 : index
    %c0_10 = arith.constant 0 : index
    %11 = vector.load %arg4[%c0_9, %c0_10] : memref<1x84xf32, #tpu.memory_space<vmem>>, vector<1x84xf32>
    %12 = vector.broadcast %11 : vector<1x84xf32> to vector<2x84xf32>
    %13 = arith.addf %10, %12 : vector<2x84xf32>
    %cst_11 = arith.constant 0.000000e+00 : f32
    %14 = vector.broadcast %cst_11 : f32 to vector<2x84xf32>
    %15 = arith.maximumf %13, %14 : vector<2x84xf32>
    %c0_12 = arith.constant 0 : index
    %c0_13 = arith.constant 0 : index
    %16 = vector.load %arg5[%c0_12, %c0_13] : memref<84x2xf32, #tpu.memory_space<vmem>>, vector<84x2xf32>
    %cst_14 = arith.constant dense<0.000000e+00> : vector<2x2xf32>
    %17 = tpu.matmul %15, %16, %cst_14 {dimension_numbers = #tpu.dot_dimension_numbers<[1], [0], [0], [1], [0, 0, 1, 1], [], []>} : vector<2x84xf32>, vector<84x2xf32>, vector<2x2xf32> -> vector<2x2xf32>
    %c0_15 = arith.constant 0 : index
    %c0_16 = arith.constant 0 : index
    %18 = vector.load %arg6[%c0_15, %c0_16] : memref<1x2xf32, #tpu.memory_space<vmem>>, vector<1x2xf32>
    %19 = vector.broadcast %18 : vector<1x2xf32> to vector<2x2xf32>
    %20 = arith.addf %17, %19 : vector<2x2xf32>
    %c0_17 = arith.constant 0 : index
    %c0_18 = arith.constant 0 : index
    %21 = vector.load %arg7[%c0_17, %c0_18] : memref<2x2xf32, #tpu.memory_space<vmem>>, vector<2x2xf32>
    tpu.vector_store %arg7[%c0_17, %c0_18], %20 {strides = array<i32>} : memref<2x2xf32, #tpu.memory_space<vmem>>, vector<2x2xf32>,
    return
  }
}

</mosaic_0001>

<bundles_post_ra>
// kernel: net_forward.3
= control target key start
LH: loop header
LB: loop body
LE: loop exit
PB: predicated region body
PF: predicated region fallthrough
CT: control target
= control target key end

     0   :  { %8 = vsyncpa [#allocation3], 0  ;;  %s1312_s12 = smov 0   ;;  %s1800_s0 = inlined_call_operand.vmem [shape: f32[2,128,3,128], index: 0, kind: input, shape index: {}]   ;;  %s1801_s1 = inlined_call_operand.hbm [shape: f32[6,75], index: 1, kind: input, shape index: {}]   ;;  %s1802_s2 = inlined_call_operand.vmem [shape: f32[6,1], index: 2, kind: input, shape index: {}]   ;;  %s1803_s3 = inlined_call_operand.vmem [shape: f32[2,62,6,62], index: 3, kind: output, shape index: {}]  }
   0x1 LB: > { %s1318_s13 = sadd.s32 4294967295, %s1272_s12   ;;  %p916_p0 = scmp.ge.s32.totalorder %s1272_s12, 1  ;;  %s1272_s12 = sphi %s1312_s12, %s14_s12  }
   0x2   : > { %p113_p1 = scmp.lt.s32.totalorder %s1272_s12, 3  ;;  %p1804_p3 = scmp.eq.s32.totalorder %s1318_s13, 0 }
   0x3   : > { %s1278_s15 = smov [#allocation2]   ;;  %s1230_s20 = scalar_lea.hbm %s1801_s1, 128 }
   0x4   : > { %p1322_p2 = pnand %p916_p0, %p113_p1  ;;  %s126_s16 = sshll.u32 %s1278_s15, 4  ;;  %s127_s16 = int_to_ptr.vmem [resolvable:$true] %s126_s16 }
   0x5   : > { %p1231_p6 = scmp.ne.s32.totalorder %s1801_s1, %s1230_s20  ;;  %p1237_p10 = scmp.lt.u32.totalorder %s1230_s20, %s1801_s1 }
   0x6   : > { %s1806_s14 = scalar_select %p1322_p2, 1, 0 }
   0x7   : > { %p1093_p4 = pneg %p1322_p2 }
   0x9   : > { %p1331_p5 = pnand %p1804_p3, %p1093_p4 }
   0xb   : > { %p1232_p7 = pneg %p1331_p5 }
   0xd   : > { %p1233_p8 = pnand %p1232_p7, %p1231_p6 }
   0xf   : > { %p1234_p9 = pneg %p1233_p8 }
  0x11   : > { %p1239_p11 = pnand %p1237_p10, %p1234_p9 }
  0x13   : > { %1242 = shalt.err (!%p1239_p11)
}
  0x14   : > { %s1243_s25 = scalar_lea.vmem %s127_s16, 128  ;;  %p1251_p1 = scmp.lt.s32.totalorder %s127_s16, %s127_s16 }
  0x15   : > { %p1244_p12 = scmp.ne.s32.totalorder %s127_s16, %s1243_s25  ;;  %p1252_p4 = scmp.lt.s32.totalorder %s1243_s25, %s1243_s25 }
  0x17   : > { %p1246_p13 = pnand %p1244_p12, %p1232_p7  ;;  %p1253_p3 = por %p1252_p4, %p1251_p1 }
  0x19   : > { %p1247_p0 = pneg %p1246_p13 }
  0x1b   : > { %p1254_p2 = pnand %p1253_p3, %p1247_p0 }
  0x1d   : > { %1257 = shalt.err (!%p1254_p2)
}
  0x1e   : > { %1096 = dma.hbm_to_vmem [thread:$0]  (!%p1331_p5), %s1801_s1, 128, %s127_s16, [#allocation3]  }
  0x1f   : > { %p1808_p6 = scmp.ne.s32.totalorder %s1806_s14, 0 }
  0x20   : > { %p1809_p8 = scmp.eq.s32.totalorder (!%p1808_p6), %s1318_s13, 0 }
  0x21   : > { %150 = sbr.rel (%p1808_p6) target bundleno = 1128 (0x468), region = 32 }
  0x28   : > { %1267 = dma.done.wait (%p1809_p8), [#allocation3], 128   ;;  %p1810_p7 = pmov %p1809_p8 }
  0x29   : > { %p174_p9 = scmp.lt.s32.totalorder %s1318_s13, 1  ;;  %v186_v0 = vlaneseq  ;;  %v1371_v2 = vld [vmem:[#allocation2] sm:$0x3f]  ;;  %v1279_v22 = vmov 0.0   ;;  %s1588_s11 = smov 0  }
  0x2a   : > { %1269 = vsyncadd (%p1810_p7), [#allocation3], 4294967168  ;;  %v1376_v3 = vld [vmem:[%s1802_s2] sm:$0x3f] }
  0x2b   : > { %s1829_s13 = smov (!%p174_p9, %s1318_s13), 1  ;;  %v1364_v1 = vshrl.u32 %v186_v0, 7  ;;  %v1378_v4 = vand.u32 127, %v186_v0 }
  0x2c   : > { %s982_s28 = sshll.u32 %s1829_s13, 9  ;;  %s1088_s29 = smul.u32 496, %s1829_s13 }
  0x2d   : > { %s1362_s5 = scalar_lea.vmem %s1800_s0, %s982_s28  ;;  %v1381_v5 = vadd.s32 8, %v1364_v1  ;;  %v1384_v6 = vadd.s32 16, %v1364_v1  ;;  %v206_v7 = vmul.u32 2, %v1378_v4  ;;  %v1388_v8 = vadd.s32 24, %v1364_v1 }
  0x2e   : > { %s1369_s8 = scalar_lea.vmem %s1803_s3, %s1088_s29  ;;  %v1391_v9 = vadd.s32 32, %v1364_v1  ;;  %v1394_v10 = vadd.s32 40, %v1364_v1  ;;  %v1397_v11 = vadd.s32 48, %v1364_v1  ;;  %v1400_v12 = vadd.s32 56, %v1364_v1 }
  0x2f   : > { %v1403_v13 = vadd.s32 64, %v1364_v1  ;;  %v1406_v14 = vadd.s32 72, %v1364_v1  ;;  %v1409_v15 = vadd.s32 80, %v1364_v1  ;;  %v1412_v16 = vadd.s32 88, %v1364_v1 }
  0x30   : > { %v1415_v17 = vadd.s32 96, %v1364_v1  ;;  %v1418_v18 = vadd.s32 104, %v1364_v1  ;;  %v1421_v19 = vadd.s32 112, %v1364_v1  ;;  %v1424_v20 = vadd.s32 120, %v1364_v1 }
  0x31   : > { %vm207_vm0 = vcmp.eq.s32.totalorder %v1364_v1, %v206_v7  ;;  %vm208_vm1 = vcmp.eq.s32.totalorder %v1381_v5, %v206_v7  ;;  %v940_v21 = vadd.s32 4294967234, %v1378_v4  ;;  %vm209_vm2 = vcmp.eq.s32.totalorder %v1384_v6, %v206_v7 }
  0x32   : > { %vm210_vm3 = vcmp.eq.s32.totalorder %v1388_v8, %v206_v7  ;;  %vm211_vm4 = vcmp.eq.s32.totalorder %v1391_v9, %v206_v7  ;;  %vm212_vm5 = vcmp.eq.s32.totalorder %v1394_v10, %v206_v7  ;;  %vm213_vm6 = vcmp.eq.s32.totalorder %v1397_v11, %v206_v7 }
  0x33   : > { %vm214_vm7 = vcmp.eq.s32.totalorder %v1400_v12, %v206_v7  ;;  %vm215_vm8 = vcmp.eq.s32.totalorder %v1403_v13, %v206_v7  ;;  %vm216_vm9 = vcmp.eq.s32.totalorder %v1406_v14, %v206_v7  ;;  %vm217_vm10 = vcmp.eq.s32.totalorder %v1409_v15, %v206_v7 }
  0x34   : > { %vm218_vm11 = vcmp.eq.s32.totalorder %v1412_v16, %v206_v7  ;;  %vm219_vm12 = vcmp.eq.s32.totalorder %v1415_v17, %v206_v7  ;;  %vm220_vm13 = vcmp.eq.s32.totalorder %v1418_v18, %v206_v7  ;;  %vm222_vm15 = vcmp.eq.s32.totalorder %v1424_v20, %v206_v7 }
  0x35   : > { %v924_v23 = vsel %vm207_vm0, 1.0, %v1279_v22  ;;  %v925_v24 = vsel %vm208_vm1, 1.0, %v1279_v22  ;;  %v926_v25 = vsel %vm209_vm2, 1.0, %v1279_v22  ;;  %v927_v26 = vsel %vm210_vm3, 1.0, %v1279_v22 }
  0x36   : > { %v928_v27 = vsel %vm211_vm4, 1.0, %v1279_v22  ;;  %v256_v28 = vmul.u32 2, %v940_v21  ;;  %v929_v29 = vsel %vm212_vm5, 1.0, %v1279_v22  ;;  %v930_v30 = vsel %vm213_vm6, 1.0, %v1279_v22 }
  0x37   : > { %v931_v31 = vsel %vm214_vm7, 1.0, %v1279_v22  ;;  %v932_v32 = vsel %vm215_vm8, 1.0, %v1279_v22  ;;  %v933_v33 = vsel %vm216_vm9, 1.0, %v1279_v22  ;;  %v934_v34 = vsel %vm217_vm10, 1.0, %v1279_v22 }
  0x38   : > { %v935_v35 = vsel %vm218_vm11, 1.0, %v1279_v22  ;;  %v257_v36 = vadd.s32 1, %v256_v28  ;;  %v936_v37 = vsel %vm219_vm12, 1.0, %v1279_v22  ;;  %v937_v38 = vsel %vm220_vm13, 1.0, %v1279_v22 }
  0x39   : > { %vm1811_vm0 = vcmp.eq.s32.totalorder %v1421_v19, %v206_v7  ;;  %v939_v40 = vsel %vm222_vm15, 1.0, %v1279_v22 }
  0x3a   : > { %v938_v39 = vsel %vm1811_vm0, 1.0, %v1279_v22  ;;  %vm258_vm1 = vcmp.eq.s32.totalorder %v1364_v1, %v257_v36  ;;  %vm259_vm2 = vcmp.eq.s32.totalorder %v1381_v5, %v257_v36  ;;  %vm260_vm3 = vcmp.eq.s32.totalorder %v1384_v6, %v257_v36 }
  0x3b   : > { %vm261_vm4 = vcmp.eq.s32.totalorder %v1388_v8, %v257_v36  ;;  %vm262_vm5 = vcmp.eq.s32.totalorder %v1391_v9, %v257_v36  ;;  %vm263_vm6 = vcmp.eq.s32.totalorder %v1394_v10, %v257_v36  ;;  %vm264_vm7 = vcmp.eq.s32.totalorder %v1397_v11, %v257_v36 }
  0x3c   : > { %vm265_vm8 = vcmp.eq.s32.totalorder %v1400_v12, %v257_v36  ;;  %vm266_vm9 = vcmp.eq.s32.totalorder %v1403_v13, %v257_v36  ;;  %vm267_vm10 = vcmp.eq.s32.totalorder %v1406_v14, %v257_v36  ;;  %vm268_vm11 = vcmp.eq.s32.totalorder %v1409_v15, %v257_v36 }
  0x3d   : > { %vm269_vm12 = vcmp.eq.s32.totalorder %v1412_v16, %v257_v36  ;;  %vm270_vm13 = vcmp.eq.s32.totalorder %v1415_v17, %v257_v36  ;;  %vm271_vm15 = vcmp.eq.s32.totalorder %v1418_v18, %v257_v36  ;;  %vm272_vm0 = vcmp.eq.s32.totalorder %v1421_v19, %v257_v36 }
  0x3e   : > { %vm273_vm14 = vcmp.eq.s32.totalorder %v1424_v20, %v257_v36  ;;  %v941_v41 = vsel %vm258_vm1, 1.0, %v1279_v22  ;;  %v942_v42 = vsel %vm259_vm2, 1.0, %v1279_v22  ;;  %v943_v43 = vsel %vm260_vm3, 1.0, %v1279_v22 }
  0x3f   : > { %v944_v44 = vsel %vm261_vm4, 1.0, %v1279_v22  ;;  %v945_v45 = vsel %vm262_vm5, 1.0, %v1279_v22  ;;  %v946_v46 = vsel %vm263_vm6, 1.0, %v1279_v22  ;;  %v947_v47 = vsel %vm264_vm7, 1.0, %v1279_v22 }
  0x40   : > { %v948_v48 = vsel %vm265_vm8, 1.0, %v1279_v22  ;;  %v949_v49 = vsel %vm266_vm9, 1.0, %v1279_v22  ;;  %v950_v50 = vsel %vm267_vm10, 1.0, %v1279_v22  ;;  %v951_v51 = vsel %vm268_vm11, 1.0, %v1279_v22 }
  0x41   : > { %v952_v52 = vsel %vm269_vm12, 1.0, %v1279_v22  ;;  %v953_v53 = vsel %vm270_vm13, 1.0, %v1279_v22  ;;  %v954_v54 = vsel %vm271_vm15, 1.0, %v1279_v22  ;;  %v955_v55 = vsel %vm272_vm0, 1.0, %v1279_v22 }
  0x42   : > { %v956_v56 = vsel %vm273_vm14, 1.0, %v1279_v22  ;;  %vm1812_vm1 = vcmp.lt.s32.totalorder %v1378_v4, 62 }
  0x43   : > { %v1526_v57 = vsel %vm1812_vm1, %v924_v23, %v941_v41  ;;  %vm1813_vm2 = vmmov %vm1812_vm1 }
  0x44   : > { %v1530_v58 = vsel %vm1813_vm2, %v925_v24, %v942_v42  ;;  %vm1814_vm3 = vmmov %vm1812_vm1 }
  0x45   : > { %v1534_v59 = vsel %vm1814_vm3, %v926_v25, %v943_v43  ;;  %vm1815_vm4 = vmmov %vm1812_vm1 }
  0x46   : > { %v1538_v60 = vsel %vm1815_vm4, %v927_v26, %v944_v44  ;;  %vm1816_vm5 = vmmov %vm1812_vm1 }
  0x47   : > { %v1542_v61 = vsel %vm1816_vm5, %v928_v27, %v945_v45  ;;  %vm1817_vm14 = vmmov %vm1812_vm1 }
  0x48   : > { %v1546_v62 = vsel %vm1817_vm14, %v929_v29, %v946_v46  ;;  %vm1818_vm6 = vmmov %vm1812_vm1 }
  0x49   : > { %v1550_v63 = vsel %vm1818_vm6, %v930_v30, %v947_v47  ;;  %vm1819_vm7 = vmmov %vm1812_vm1 }
  0x4a   : > { %v1554_v0 = vsel %vm1819_vm7, %v931_v31, %v948_v48  ;;  %vm1820_vm8 = vmmov %vm1812_vm1 }
  0x4b   : > { %v1558_v1 = vsel %vm1820_vm8, %v932_v32, %v949_v49  ;;  %vm1821_vm9 = vmmov %vm1812_vm1 }
  0x4c   : > { %v1562_v5 = vsel %vm1821_vm9, %v933_v33, %v950_v50  ;;  %vm1822_vm10 = vmmov %vm1812_vm1 }
  0x4d   : > { %v1566_v6 = vsel %vm1822_vm10, %v934_v34, %v951_v51  ;;  %vm1823_vm11 = vmmov %vm1812_vm1 }
  0x4e   : > { %v1570_v7 = vsel %vm1823_vm11, %v935_v35, %v952_v52  ;;  %vm1824_vm12 = vmmov %vm1812_vm1 }
  0x4f   : > { %v1574_v8 = vsel %vm1824_vm12, %v936_v37, %v953_v53  ;;  %vm1825_vm13 = vmmov %vm1812_vm1 }
  0x50   : > { %v1578_v9 = vsel %vm1825_vm13, %v937_v38, %v954_v54  ;;  %vm1826_vm15 = vmmov %vm1812_vm1 }
  0x51   : > { %v1582_v10 = vsel %vm1826_vm15, %v938_v39, %v955_v55  ;;  %vm1827_vm0 = vmmov %vm1812_vm1 }
  0x52   : > { %v1586_v11 = vsel %vm1827_vm0, %v939_v40, %v956_v56 }
  0x53 LB: >> { %s983_s13 = sshll.u32 %s1276_s11, 3  ;;  %s1280_s15 = smov 126   ;;  %vm409_vm1 = vcmask 1042432   ;;  %vm413_vm2 = vcmask 1040384   ;;  %vm415_vm3 = vcmask 1043456   ;;  %vm411_vm4 = vcmask 1045504   ;;  %s1276_s11 = sphi %s1588_s11, %s327_s11  }
  0x54   : >> { %s1597_s14 = scalar_lea.vmem %s1362_s5, %s983_s13  ;;  %s1281_s16 = smov 127   ;;  %vm417_vm5 = vcmask 1046528   ;;  %vm419_vm14 = vcmask 1041408   ;;  %vm421_vm6 = vcmask 1044480   ;;  %vm625_vm7 = vcmask 1014784  }
  0x55   : >> { %v1600_v4 = vld [vmem:[%s1597_s14 + $0x10] sm:$0x7]  ;;  %v1603_v12 = vld [vmem:[%s1597_s14 + $0x14] sm:$0x7]  ;;  %v1612_v17 = vld [vmem:[%s1597_s14 + $0x4] sm:$0x7]  ;;  %s815_s22 = scalar_lea.vmem %s1369_s8, %s983_s13 }
  0x56   : >> { %v546_v13 = vrot.slane %v1600_v4, 2  ;;  %v542_v14 = vrot.slane %v1600_v4, 5  ;;  %v550_v15 = vrot.slane %v1600_v4, 7  ;;  %v555_v16 = vrot.slane %v1603_v12, 4  ;;  %v1615_v18 = vld [vmem:[%s1597_s14 + $0x8] sm:$0x7] }
  0x57   : >> { %s1282_s17 = smov 125   ;;  %s1283_s18 = smov 1   ;;  %v561_v19 = vrot.slane %v1603_v12, 6  ;;  %v565_v20 = vrot.slane %v1603_v12, 3  ;;  %v484_v21 = vrot.slane %v1612_v17, 2  ;;  %v500_v22 = vrot.slane %v1615_v18, 3 }
  0x58   : >> { %547 = vrot.lane.b32.xlu0 %v546_v13, %s1280_s15  ;;  %543 = vrot.lane.b32.xlu1 %v542_v14, %s1281_s16  ;;  %v488_v24 = vrot.slane %v1612_v17, 7  ;;  %v383_v25 = vrot.slane %v1612_v17, 5  ;;  %v402_v26 = vrot.slane %v1615_v18, 6  ;;  %v1629_v27 = vld [vmem:[%s1597_s14 + $0xc] sm:$0x7]  ;;  %v492_v28 = vrot.slane %v1612_v17, 4 }
  0x59   : >> { %v1129_v23 = vpack.i.bf16 %v500_v22, %v484_v21  ;;  %v507_v29 = vrot.slane %v1615_v18, 5  ;;  %v430_v32 = vrot.slane %v1629_v27, 5  ;;  %v438_v33 = vrot.slane %v1629_v27, 7  ;;  %s1284_s19 = smov 124   ;;  %v1673_v14 = vld [vmem:[%s1597_s14] sm:$0x7] }
  0x5a   : >> { %v1134_v30 = vpack.i.bf16 %v1615_v18, %v488_v24  ;;  %v1139_v31 = vpack.i.bf16 %v402_v26, %v383_v25  ;;  %v1644_v34 = vrot.slane %v1629_v27, 2  ;;  %v515_v37 = vrot.slane %v1629_v27, 4  ;;  %s1290_s20 = smov 4   ;;  %s1291_s21 = smov 66  }
  0x5b   : >> { %v1144_v35 = vpack.i.bf16 %v507_v29, %v492_v28  ;;  %v1149_v36 = vpack.i.bf16 %v430_v32, %v438_v33  ;;  %v519_v38 = vrot.slane %v1629_v27, 1  ;;  %v443_v41 = vrot.slane %v1600_v4, 4  ;;  %s327_s11 = sadd.s32 1, %s1276_s11  }
  0x5c   : >> { %551 = vrot.lane.b32.xlu0 %v550_v15, %s1282_s17  ;;  %556 = vrot.lane.b32.xlu1 %v555_v16, %s1283_s18  ;;  %v1154_v39 = vpack.i.bf16 %v1644_v34, %v515_v37  ;;  %v523_v42 = vrot.slane %v1629_v27, 6  ;;  %v453_v43 = vrot.slane %v1600_v4, 3  ;;  %v559_v46 = vrot.slane %v1603_v12, 1  ;;  %p324_p2 = scmp.ge.s32.totalorder %s327_s11, 62  }
  0x5d   : >> { %v1159_v40 = vpack.i.bf16 %v438_v33, %v519_v38  ;;  %v449_v54 = vrot.slane %v1600_v4, 6  ;;  %v361_v16 = vrot.slane %v1673_v14, 7  ;;  %v357_v22 = vrot.slane %v1673_v14, 2 }
  0x5e   : >> { %v353_v32 = vrot.slane %v1673_v14, 5  ;;  %v372_v33 = vrot.slane %v1612_v17, 6  ;;  %vm1286_vm8 = vmmov 1   ;;  %vm636_vm10 = vcmask 613376  }
  0x5f   : >> { %v1179_v24 = vpack.i.bf16 %v1612_v17, %v361_v16  ;;  %vm1058_vm9 = vmpackc.low %vm409_vm1, %vm1286_vm8  ;;  %vm1288_vm12 = vmmov 0   ;;  %vm722_vm13 = vcmask 31744   ;;  %vm816_vm15 = vcmask 504832  }
  0x60   : >> { %562 = vrot.lane.b32.xlu0 %v561_v19, %s1281_s16  ;;  %566 = vrot.lane.b32.xlu1 %v565_v20, %s1280_s15  ;;  %vm1086_vm11 = vmpackc.low %vm415_vm3, %vm1286_vm8 }
  0x64   : >> { %569 = vrot.lane.b32.xlu0 %v1603_v12, %s1282_s17  ;;  %1130 = vrot.lane.b32.xlu1 %v1129_v23, %s1280_s15  ;;  %v376_v23 = vrot.slane %v1612_v17, 3 }
  0x66   : >> { %v1174_v38 = vpack.i.bf16 %v376_v23, %v357_v22 }
  0x68   : >> { %1135 = vrot.lane.b32.xlu0 %v1134_v30, %s1282_s17  ;;  %1140 = vrot.lane.b32.xlu1 %v1139_v31, %s1281_s16  ;;  %v398_v30 = vrot.slane %v1615_v18, 1 }
  0x6c   : >> { %1145 = vrot.lane.b32.xlu0 %v1144_v35, %s1284_s19  ;;  %1150 = vrot.lane.b32.xlu1 %v1149_v36, %s1281_s16 }
  0x70   : >> { %1155 = vrot.lane.b32.xlu0 %v1154_v39, %s1280_s15  ;;  %1160 = vrot.lane.b32.xlu1 %v1159_v40, %s1282_s17  ;;  %v365_v40 = vrot.slane %v1673_v14, 4 }
  0x74   : >> { %444 = vrot.lane.b32.xlu1 %v443_v41, %s1283_s18  ;;  %524 = vrot.lane.b32.xlu0 %v523_v42, %s1284_s19 }
  0x78   : >> { %454 = vrot.lane.b32.xlu0 %v453_v43, %s1280_s15 }
  0xca   : >> { %v548_v44 = vpop.permute.xlu0 %547  ;;  %v544_v45 = vpop.permute.xlu1 %543 }
  0xcb   : >> { %v571_v47 = vsel %vm409_vm1, %v1600_v4, %v544_v45 }
  0xcc   : >> { %v572_v52 = vsel %vm411_vm4, %v571_v47, %v548_v44 }
  0xce   : >> { %v552_v48 = vpop.permute.xlu0 %551  ;;  %v557_v49 = vpop.permute.xlu1 %556 }
  0xcf   : >> { %v573_v50 = vsel %vm413_vm2, %v548_v44, %v552_v48  ;;  %v1184_v48 = vpack.i.bf16 %v372_v33, %v353_v32 }
  0xd0   : >> { %v574_v51 = vsel %vm415_vm3, %v573_v50, %v557_v49 }
  0xd1   : >> { %v575_v53 = vsel %vm417_vm5, %v574_v51, %v559_v46 }
  0xd2   : >> { %v563_v55 = vpop.permute.xlu0 %562  ;;  %v567_v56 = vpop.permute.xlu1 %566  ;;  %v1169_v12 = vpack.i.bf16 %v575_v53, %v572_v52 }
  0xd3   : >> { %v576_v13 = vsel %vm419_vm14, %v559_v46, %v563_v55 }
  0xd4   : >> { %v577_v15 = vsel %vm421_vm6, %v576_v13, %v567_v56  ;;  %1170 = vrot.lane.b32.xlu0 %v1169_v12, %s1281_s16  ;;  %v390_v12 = vrot.slane %v1615_v18, 7 }
  0xd5   : >> { %v1164_v19 = vpack.i.bf16 %v577_v15, %v449_v54 }
  0xd6   : >> { %v570_v20 = vpop.permute.xlu0 %569  ;;  %v1131_v21 = vpop.permute.xlu1 %1130 }
  0xd7   : >> { %1165 = vrot.lane.b32.xlu1 %v1164_v19, %s1281_s16  ;;  %v1132_v28 = vunpack.i.l.bf16 %v1131_v21  ;;  %v1133_v39 = vunpack.i.h.bf16 %v1131_v21 }
  0xd8   : >> { %587 = vrot.lane.b32.xlu0 %v570_v20, %s1281_s16 }
  0xda   : >> { %v1136_v29 = vpop.permute.xlu0 %1135  ;;  %v1141_v31 = vpop.permute.xlu1 %1140 }
  0xdb   : >> { %457 = vrot.lane.b32.xlu1 %v1600_v4, %s1282_s17  ;;  %v1137_v35 = vunpack.i.l.bf16 %v1136_v29  ;;  %v1143_v36 = vunpack.i.h.bf16 %v1141_v31  ;;  %v1142_v37 = vunpack.i.l.bf16 %v1141_v31  ;;  %v1138_v41 = vunpack.i.h.bf16 %v1136_v29 }
  0xdc   : >> { %1180 = vrot.lane.b32.xlu0 %v1179_v24, %s1282_s17 }
  0xdd   : >> { %v533_v42 = vsel %vm419_vm14, %v398_v30, %v1143_v36  ;;  %v528_v44 = vsel %vm409_vm1, %v1612_v17, %v1142_v37  ;;  %v530_v45 = vsel %vm413_vm2, %v1132_v28, %v1137_v35 }
  0xde   : >> { %v1146_v46 = vpop.permute.xlu0 %1145  ;;  %v1151_v47 = vpop.permute.xlu1 %1150  ;;  %v529_v49 = vsel %vm411_vm4, %v528_v44, %v1132_v28  ;;  %v534_v55 = vsel %vm421_vm6, %v533_v42, %v1133_v39 }
  0xdf   : >> { %v1148_v50 = vunpack.i.h.bf16 %v1146_v46  ;;  %v1147_v51 = vunpack.i.l.bf16 %v1146_v46  ;;  %1175 = vrot.lane.b32.xlu1 %v1174_v38, %s1280_s15  ;;  %v1153_v52 = vunpack.i.h.bf16 %v1151_v47  ;;  %v1152_v53 = vunpack.i.l.bf16 %v1151_v47 }
  0xe0   : >> { %v1189_v54 = vpack.i.bf16 %v529_v49, %v365_v40  ;;  %v447_v47 = vrot.slane %v1600_v4, 1 }
  0xe1   : >> { %v535_v56 = vsel %vm409_vm1, %v1138_v41, %v1148_v50  ;;  %v531_v13 = vsel %vm415_vm3, %v530_v45, %v1147_v51  ;;  %v459_v15 = vsel %vm409_vm1, %v1629_v27, %v1153_v52  ;;  %v537_v16 = vsel %vm413_vm2, %v1644_v34, %v1152_v53 }
  0xe2   : >> { %v1156_v19 = vpop.permute.xlu0 %1155  ;;  %1190 = vrot.lane.b32.xlu0 %v1189_v54, %s1284_s19  ;;  %v536_v20 = vsel %vm411_vm4, %v535_v56, %v1644_v34  ;;  %v1161_v21 = vpop.permute.xlu1 %1160  ;;  %v532_v33 = vsel %vm417_vm5, %v531_v13, %v398_v30  ;;  %v394_v34 = vrot.slane %v1615_v18, 4 }
  0xe3   : >> { %v1158_v22 = vunpack.i.h.bf16 %v1156_v19  ;;  %v1157_v23 = vunpack.i.l.bf16 %v1156_v19  ;;  %1185 = vrot.lane.b32.xlu1 %v1184_v48, %s1281_s16  ;;  %v1194_v24 = vpack.i.bf16 %v536_v20, %v534_v55  ;;  %v1163_v28 = vunpack.i.h.bf16 %v1161_v21 }
  0xe4   : >> { %v1162_v29 = vunpack.i.l.bf16 %v1161_v21  ;;  %v1204_v38 = vpack.i.bf16 %v383_v25, %v532_v33 }
  0xe5   : >> { %v538_v31 = vsel %vm415_vm3, %v537_v16, %v1157_v23  ;;  %v460_v32 = vsel %vm411_vm4, %v459_v15, %v1158_v22  ;;  %v461_v36 = vsel %vm413_vm2, %v1158_v22, %v1163_v28 }
  0xe6   : >> { %v1199_v35 = vpack.i.bf16 %v460_v32, %v390_v12  ;;  %1195 = vrot.lane.b32.xlu0 %v1194_v24, %s1284_s19  ;;  %v539_v37 = vsel %vm417_vm5, %v538_v31, %v1162_v29  ;;  %v525_v40 = vpop.permute.xlu0 %524  ;;  %v445_v42 = vpop.permute.xlu1 %444 }
  0xe7   : >> { %v1209_v39 = vpack.i.bf16 %v539_v37, %v402_v26  ;;  %v540_v44 = vsel %vm419_vm14, %v1162_v29, %v525_v40  ;;  %v462_v49 = vsel %vm415_vm3, %v461_v36, %v445_v42  ;;  %v370_v29 = vrot.slane %v1612_v17, 1 }
  0xe8   : >> { %1200 = vrot.lane.b32.xlu1 %v1199_v35, %s1281_s16  ;;  %v541_v25 = vsel %vm421_vm6, %v540_v44, %v453_v43  ;;  %v463_v52 = vsel %vm417_vm5, %v462_v49, %v447_v47  ;;  %v1285_v43 = vmov 0.0   ;;  %v388_v36 = vrot.slane %v1615_v18, 2 }
  0xe9   : >> { %709 = vmatprep.mubr.f32.mxu0 %v1285_v43  ;;  %1038 = vmatprep.mubr.msk.f32.mxu1 %vm1288_vm12, %v1285_v43 }
  0xea   : >> { %395 = vrot.lane.b32.xlu0 %v394_v34, %s1280_s15  ;;  %v455_v41 = vpop.permute.xlu0 %454 }
  0xec   : >> { %1205 = vrot.lane.b32.xlu1 %v1204_v38, %s1284_s19 }
  0xee   : >> { %1210 = vrot.lane.b32.xlu0 %v1209_v39, %s1284_s19 }
  0xf0   : >> { %399 = vrot.lane.b32.xlu1 %v398_v30, %s1282_s17 }
 0x146   : >> { %v1171_v45 = vpop.permute.xlu0 %1170 }
 0x147   : >> { %v1172_v46 = vunpack.i.l.bf16 %v1171_v45  ;;  %v1173_v53 = vunpack.i.h.bf16 %v1171_v45 }
 0x149   : >> { %v1219_v26 = vpack.i.bf16 %v1172_v46, %v541_v25  ;;  %v1166_v48 = vpop.permute.xlu1 %1165 }
 0x14a   : >> { %v1167_v50 = vunpack.i.l.bf16 %v1166_v48  ;;  %v588_v51 = vpop.permute.xlu0 %587  ;;  %v1168_v54 = vunpack.i.h.bf16 %v1166_v48 }
 0x14b   : >> { %1220 = vrot.lane.b32.xlu1 %v1219_v26, %s1284_s19 }
 0x14c   : >> { %v464_v30 = vsel %vm419_vm14, %v447_v47, %v1167_v50  ;;  %v1224_v13 = vpack.i.bf16 %v588_v51, %v1168_v54 }
 0x14d   : >> { %v465_v55 = vsel %vm421_vm6, %v464_v30, %v455_v41  ;;  %v458_v56 = vpop.permute.xlu1 %457 }
 0x14e   : >> { %v1214_v4 = vpack.i.bf16 %v465_v55, %v463_v52  ;;  %v1181_v12 = vpop.permute.xlu0 %1180 }
 0x14f   : >> { %609 = vrot.lane.b32.xlu1 %v1173_v53, %s1284_s19  ;;  %v1182_v19 = vunpack.i.l.bf16 %v1181_v12  ;;  %v1183_v17 = vunpack.i.h.bf16 %v1181_v12 }
 0x150   : >> { %1215 = vrot.lane.b32.xlu0 %v1214_v4, %s1281_s16 }
 0x151   : >> { %v1176_v15 = vpop.permute.xlu1 %1175 }
 0x152   : >> { %v1177_v16 = vunpack.i.l.bf16 %v1176_v15  ;;  %v1178_v33 = vunpack.i.h.bf16 %v1176_v15  ;;  %v407_v15 = vrot.slane %v1629_v27, 3 }
 0x153   : >> { %1225 = vrot.lane.b32.xlu1 %v1224_v13, %s1284_s19 }
 0x154   : >> { %475 = vrot.lane.b32.xlu0 %v458_v56, %s1281_s16  ;;  %v1191_v20 = vpop.permute.xlu0 %1190  ;;  %v414_v28 = vsel %vm413_vm2, %v1177_v16, %v1182_v19 }
 0x155   : >> { %v1186_v21 = vpop.permute.xlu1 %1185  ;;  %v1192_v24 = vunpack.i.l.bf16 %v1191_v20  ;;  %v1193_v38 = vunpack.i.h.bf16 %v1191_v20 }
 0x156   : >> { %v1187_v22 = vunpack.i.l.bf16 %v1186_v21  ;;  %v1188_v23 = vunpack.i.h.bf16 %v1186_v21 }
 0x157   : >> { %v416_v39 = vsel %vm415_vm3, %v414_v28, %v1192_v24 }
 0x158   : >> { %v410_v31 = vsel %vm409_vm1, %v1673_v14, %v1187_v22  ;;  %v1196_v32 = vpop.permute.xlu0 %1195  ;;  %v420_v34 = vsel %vm419_vm14, %v370_v29, %v1188_v23  ;;  %v418_v45 = vsel %vm417_vm5, %v416_v39, %v370_v29 }
 0x159   : >> { %v1198_v40 = vunpack.i.h.bf16 %v1196_v32  ;;  %v1197_v41 = vunpack.i.l.bf16 %v1196_v32  ;;  %v412_v42 = vsel %vm411_vm4, %v410_v31, %v1177_v16  ;;  %v422_v46 = vsel %vm421_vm6, %v420_v34, %v1178_v33 }
 0x15a   : >> { %v1201_v35 = vpop.permute.xlu1 %1200  ;;  %v626_v47 = vsel %vm625_vm7, %v412_v42, %v1193_v38 }
 0x15b   : >> { %v1202_v37 = vunpack.i.l.bf16 %v1201_v35  ;;  %v1045_v26 = vpack.c.bf16 %v1198_v40, %v1197_v41  ;;  %v628_v51 = vsel %vm625_vm7, %v422_v46, %v1197_v41  ;;  %v1203_v27 = vunpack.i.h.bf16 %v1201_v35 }
 0x15c   : >> { %v396_v55 = vpop.permute.xlu0 %395 }
 0x15d   : >> { %v425_v44 = vsel %vm413_vm2, %v388_v36, %v1202_v37 }
 0x15e   : >> { %v1206_v14 = vpop.permute.xlu1 %1205  ;;  %v426_v13 = vsel %vm415_vm3, %v425_v44, %v396_v55 }
 0x15f   : >> { %v1208_v18 = vunpack.i.h.bf16 %v1206_v14  ;;  %v1207_v25 = vunpack.i.l.bf16 %v1206_v14 }
 0x160   : >> { %v1211_v56 = vpop.permute.xlu0 %1210 }
 0x161   : >> { %v423_v48 = vsel %vm409_vm1, %v1183_v17, %v1208_v18  ;;  %v1041_v49 = vpack.c.bf16 %v1207_v25, %v1193_v38  ;;  %v627_v50 = vsel %vm625_vm7, %v418_v45, %v1207_v25  ;;  %v1212_v4 = vunpack.i.l.bf16 %v1211_v56 }
 0x162   : >> { %v1043_v30 = vpack.c.bf16 %v627_v50, %v626_v47  ;;  %v424_v52 = vsel %vm411_vm4, %v423_v48, %v388_v36  ;;  %v400_v12 = vpop.permute.xlu1 %399  ;;  %v1213_v16 = vunpack.i.h.bf16 %v1211_v56  ;;  %v1064_v25 = vpack.c.bf16 %v1530_v58, %v1526_v57 }
 0x163   : >> { %1042 = vmatprep.subr.bf16.mxu0 %v1041_v49  ;;  %v629_v53 = vsel %vm625_vm7, %v424_v52, %v1198_v40  ;;  %v428_v19 = vsel %vm419_vm14, %v400_v12, %v1212_v4  ;;  %v427_v20 = vsel %vm417_vm5, %v426_v13, %v400_v12  ;;  %v1287_v47 = vmov 0.0|0.0  }
 0x164   : >> { %1044 = vmatpush1.bf16.msra.mxu0 %v1043_v30  ;;  %v1047_v54 = vpack.c.bf16 %v629_v53, %v628_v51  ;;  %v429_v23 = vsel %vm421_vm6, %v428_v19, %v407_v15  ;;  %v630_v24 = vsel %vm625_vm7, %v427_v20, %v1213_v16  ;;  %1063 = vmatprep.subr.bf16.mxu1 %v1287_v47  ;;  %v1289_v53 = vmov 0  }
 0x165   : >> { %1046 = vmatprep.subr.bf16.mxu0 %v1045_v26  ;;  %1065 = vmatpush3.bf16.msra.mxu1 %v1064_v25  ;;  %v1067_v26 = vpack.c.bf16 %v1538_v60, %v1534_v59  ;;  %v1070_v48 = vpack.c.bf16 %v1546_v62, %v1542_v61  ;;  %v1073_v49 = vpack.c.bf16 %v1554_v0, %v1550_v63 }
 0x166   : >> { %1066 = vmatprep.subr.bf16.mxu1 %v1287_v47  ;;  %v1076_v50 = vpack.c.bf16 %v1562_v5, %v1558_v1  ;;  %v1079_v51 = vpack.c.bf16 %v1570_v7, %v1566_v6  ;;  %v1082_v30 = vpack.c.bf16 %v1578_v9, %v1574_v8  ;;  %v1085_v52 = vpack.c.bf16 %v1586_v11, %v1582_v10 }
 0x167   : >> { %1229 = vset.pattern.permute.xlu0 %v1289_v53 }
 0x168   : >> { %1048 = vmatpush1.bf16.msra.mxu0 %v1047_v54 }
 0x169   : >> { %1068 = vmatpush3.bf16.msra.mxu1 %v1067_v26 }
 0x16a   : >> { %1069 = vmatprep.subr.bf16.mxu1 %v1287_v47 }
 0x16d   : >> { %1071 = vmatpush3.bf16.msra.mxu1 %v1070_v48 }
 0x16e   : >> { %1072 = vmatprep.subr.bf16.mxu1 %v1287_v47 }
 0x171   : >> { %1074 = vmatpush3.bf16.msra.mxu1 %v1073_v49 }
 0x172   : >> { %1075 = vmatprep.subr.bf16.mxu1 %v1287_v47 }
 0x175   : >> { %1077 = vmatpush3.bf16.msra.mxu1 %v1076_v50 }
 0x176   : >> { %1078 = vmatprep.subr.bf16.mxu1 %v1287_v47 }
 0x179   : >> { %1080 = vmatpush3.bf16.msra.mxu1 %v1079_v51 }
 0x17a   : >> { %1081 = vmatprep.subr.bf16.mxu1 %v1287_v47 }
 0x17d   : >> { %1083 = vmatpush3.bf16.msra.mxu1 %v1082_v30 }
 0x17e   : >> { %1084 = vmatprep.subr.bf16.mxu1 %v1287_v47 }
 0x181   : >> { %1087 = vmatpush3.bf16.msk.msra.mxu1 %vm1086_vm11, %v1085_v52 }
 0x1bd   : >> { %v1221_v21 = vpop.permute.xlu1 %1220 }
 0x1be   : >> { %v1222_v22 = vunpack.i.l.bf16 %v1221_v21  ;;  %v1223_v28 = vunpack.i.h.bf16 %v1221_v21 }
 0x1c0   : >> { %v1049_v29 = vpack.c.bf16 %v1222_v22, %v1213_v16  ;;  %v631_v31 = vsel %vm625_vm7, %v429_v23, %v1222_v22  ;;  %v632_v39 = vsel %vm625_vm7, %v1203_v27, %v1223_v28 }
 0x1c1   : >> { %v610_v32 = vpop.permute.xlu1 %609  ;;  %v1051_v33 = vpack.c.bf16 %v631_v31, %v630_v24 }
 0x1c2   : >> { %v1053_v36 = vpack.c.bf16 %v610_v32, %v1223_v28  ;;  %v1216_v34 = vpop.permute.xlu0 %1215  ;;  %1050 = vmatprep.subr.bf16.mxu0 %v1049_v29 }
 0x1c3   : >> { %v1217_v37 = vunpack.i.l.bf16 %v1216_v34  ;;  %1052 = vmatpush1.bf16.msra.mxu0 %v1051_v33  ;;  %v1218_v41 = vunpack.i.h.bf16 %v1216_v34 }
 0x1c4   : >> { %1054 = vmatprep.subr.bf16.mxu0 %v1053_v36 }
 0x1c5   : >> { %v1226_v38 = vpop.permute.xlu1 %1225  ;;  %v633_v40 = vsel %vm625_vm7, %v1217_v37, %v610_v32 }
 0x1c6   : >> { %v1228_v42 = vunpack.i.h.bf16 %v1226_v38  ;;  %v1227_v17 = vunpack.i.l.bf16 %v1226_v38  ;;  %v476_v44 = vpop.permute.xlu0 %475  ;;  %v1055_v14 = vpack.c.bf16 %v633_v40, %v632_v39 }
 0x1c8   : >> { %v1057_v45 = vpack.c.bf16 %v1228_v42, %v1227_v17  ;;  %v634_v35 = vsel %vm625_vm7, %v1218_v41, %v1227_v17  ;;  %v635_v46 = vsel %vm625_vm7, %v476_v44, %v1228_v42  ;;  %1056 = vmatpush1.bf16.msra.mxu0 %v1055_v14 }
 0x1c9   : >> { %v1060_v18 = vpack.c.bf16 %v635_v46, %v634_v35 }
 0x1ca   : >> { %1059 = vmatprep.subr.msk.bf16.mxu0 %vm1058_vm9, %v1057_v45 }
 0x1cc   : >> { %1062 = vmatpush1.bf16.msk.msra.mxu0 %vm1058_vm9, %v1060_v18 }
 0x1cf   : >> { %976 = vmatmul.mubr.msk.f32.vlgmr.msra.gmra.mrb[0].mxu0 %vm636_vm10, %v1371_v2 }
 0x2a2   : >> { %v711_v54 = vpop.f32.mrb[0].mxu0 }
 0x2a3   : >> { %718 = vrot.lane.b32.xlu0 %v711_v54, %s1290_s20  ;;  %v713_v55 = vpop.f32.mrb[1].mxu0 }
 0x2a4   : >> { %720 = vrot.lane.b32.xlu1 %v713_v55, %s1290_s20 }
 0x2a7   : >> { %809 = vperm.xlu0 %1229, %v1376_v3  }
 0x315   : >> { %v719_v56 = vpop.permute.xlu0 %718 }
 0x316   : >> { %v721_v4 = vpop.permute.xlu1 %720 }
 0x317   : >> { %v723_v12 = vsel %vm722_vm13, %v719_v56, %v721_v4 }
 0x318   : >> { %v725_v13 = vmax.f32 %v711_v54, %v723_v12 }
 0x31a   : >> { %1039 = vmatmul.mubr.msk.f32.vlgmr.msra.gmra.mrb[0].mxu1 %vm625_vm7, %v725_v13 }
 0x326   : >> { %v810_v19 = vpop.permute.xlu0 %809 }
 0x3ed   : >> { %v798_v15 = vpop.f32.mrb[0].mxu1 }
 0x3ee   : >> { %803 = vrot.lane.b32.xlu1 %v798_v15, %s1291_s21  ;;  %v1040_v43 = vpop.f32.mrb[1].mxu1 }
 0x460   : >> { %v804_v16 = vpop.permute.xlu1 %803 }
 0x461   : >> { %v806_v20 = vmax.f32 %v798_v15, %v804_v16  ;;  %326 = sbr.rel (!%p324_p2) target bundleno = 83 (0x53), region = 81 }
 0x463   : >> { %v812_v21 = vadd.f32 %v810_v19, %v806_v20 }
 0x465   : >> { %v813_v22 = vmax.f32 %v812_v21, 0.0 }
 0x467   : >> { %817 = vst.msk [vmem:[%s815_s22] sm:$0x3f] %vm816_vm15, %v813_v22 }
 0x468 PF: > { %s14_s12 = sadd.s32 1, %s1272_s12  }
 0x469   : > { %p11_p3 = scmp.ge.s32.totalorder %s14_s12, 4  }
 0x46b   :  { %13 = sbr.rel (!%p11_p3) target bundleno = 1 (0x1), region = 92 }
 0x472   :  { %839 = vsyncpa [#allocation3], 1 }
 0x473   :  { %841 = vsyncpa [#allocation3 + $0x1], 1 }

// kernel: net_forward.4
= control target key start
LH: loop header
LB: loop body
LE: loop exit
PB: predicated region body
PF: predicated region fallthrough
CT: control target
= control target key end

     0   :  { %8 = vsyncpa [#allocation3], 0  ;;  %s1329_s12 = smov 0   ;;  %s1678_s0 = inlined_call_operand.vmem [shape: f32[2,62,6,62], index: 0, kind: input, shape index: {}]   ;;  %s1679_s1 = inlined_call_operand.hbm [shape: f32[16,150], index: 1, kind: input, shape index: {}]   ;;  %s1680_s2 = inlined_call_operand.vmem [shape: f32[16,1], index: 2, kind: input, shape index: {}]   ;;  %s1681_s3 = inlined_call_operand.vmem [shape: f32[2,29,16,29], index: 3, kind: output, shape index: {}]  }
   0x1 LB: > { %s1335_s13 = sadd.s32 4294967295, %s1287_s12   ;;  %p919_p0 = scmp.ge.s32.totalorder %s1287_s12, 1  ;;  %s1287_s12 = sphi %s1329_s12, %s14_s12  }
   0x2   : > { %p113_p1 = scmp.lt.s32.totalorder %s1287_s12, 3  ;;  %s1293_s14 = smov [#allocation2]  }
   0x3   : > { %s125_s15 = sshll.u32 %s1293_s14, 4  ;;  %p1682_p3 = scmp.eq.s32.totalorder %s1335_s13, 0  ;;  %s126_s15 = int_to_ptr.vmem [resolvable:$true] %s125_s15 }
   0x4   : > { %p1339_p2 = pnand %p919_p0, %p113_p1  ;;  %s1245_s20 = scalar_lea.hbm %s1679_s1, 512 }
   0x5   : > { %p1246_p6 = scmp.ne.s32.totalorder %s1679_s1, %s1245_s20  ;;  %p1252_p10 = scmp.lt.u32.totalorder %s1245_s20, %s1679_s1 }
   0x6   : > { %s1684_s16 = scalar_select %p1339_p2, 1, 0 }
   0x7   : > { %p1055_p4 = pneg %p1339_p2 }
   0x9   : > { %p1348_p5 = pnand %p1682_p3, %p1055_p4 }
   0xb   : > { %p1247_p7 = pneg %p1348_p5 }
   0xd   : > { %p1248_p8 = pnand %p1247_p7, %p1246_p6 }
   0xf   : > { %p1249_p9 = pneg %p1248_p8 }
  0x11   : > { %p1254_p11 = pnand %p1252_p10, %p1249_p9 }
  0x13   : > { %1257 = shalt.err (!%p1254_p11)
}
  0x14   : > { %s1258_s25 = scalar_lea.vmem %s126_s15, 512  ;;  %p1266_p1 = scmp.lt.s32.totalorder %s126_s15, %s126_s15 }
  0x15   : > { %p1259_p12 = scmp.ne.s32.totalorder %s126_s15, %s1258_s25  ;;  %p1267_p4 = scmp.lt.s32.totalorder %s1258_s25, %s1258_s25 }
  0x17   : > { %p1261_p13 = pnand %p1259_p12, %p1247_p7  ;;  %p1268_p3 = por %p1267_p4, %p1266_p1 }
  0x19   : > { %p1262_p0 = pneg %p1261_p13 }
  0x1b   : > { %p1269_p2 = pnand %p1268_p3, %p1262_p0 }
  0x1d   : > { %1272 = shalt.err (!%p1269_p2)
}
  0x1e   : > { %s1294_s26 = smov 256   ;;  %s1295_s27 = smov 16  }
  0x1f   : > { %1058 = dma.hbm_to_vmem [thread:$0]  (!%p1348_p5), %s1679_s1, 512, %s126_s15, [#allocation3], %s1294_s26, %s1294_s26, %s1295_s27  }
  0x20   : > { %p1686_p6 = scmp.ne.s32.totalorder %s1684_s16, 0 }
  0x21   : > { %p1687_p8 = scmp.eq.s32.totalorder (!%p1686_p6), %s1335_s13, 0 }
  0x22   : > { %152 = sbr.rel (%p1686_p6) target bundleno = 1117 (0x45d), region = 32 }
  0x29   : > { %1282 = dma.done.wait (%p1687_p8), [#allocation3], 512   ;;  %p1688_p7 = pmov %p1687_p8 }
  0x2a   : > { %p176_p2 = scmp.lt.s32.totalorder %s1335_s13, 1  ;;  %v192_v0 = vlaneseq  ;;  %v1389_v6 = vld [vmem:[#allocation2] sm:$0xff]  ;;  %v1391_v7 = vld [vmem:[#allocation2 + $0x8] sm:$0xff]  ;;  %v1393_v8 = vld [vmem:[#allocation2 + $0x10] sm:$0xff]  ;;  %v1296_v19 = vmov 0.0   ;;  %s1441_s16 = smov 0  }
  0x2b   : > { %1284 = vsyncadd (%p1688_p7), [#allocation3], 4294966784  ;;  %v1395_v12 = vld [vmem:[#allocation2 + $0x18] sm:$0xff]  ;;  %v1400_v13 = vld [vmem:[%s1680_s2] sm:$0xff] }
  0x2c   : > { %s1698_s13 = smov (!%p176_p2, %s1335_s13), 1  ;;  %v193_v1 = vshrl.u32 %v192_v0, 7  ;;  %v1376_v2 = vand.u32 127, %v192_v0  ;;  %v1405_v14 = vld [vmem:[%s1680_s2 + $0x8] sm:$0xff] }
  0x2d   : > { %s1049_s30 = smul.u32 496, %s1698_s13 }
  0x2e   : > { %s1050_s4 = smul.u32 464, %s1698_s13  ;;  %v194_v3 = vadd.s32 8, %v193_v1  ;;  %v195_v4 = vadd.s32 16, %v193_v1  ;;  %v204_v5 = vmul.u32 2, %v1376_v2  ;;  %v196_v9 = vadd.s32 24, %v193_v1 }
  0x2f   : > { %s1381_s7 = scalar_lea.vmem %s1678_s0, %s1049_s30  ;;  %v197_v10 = vadd.s32 32, %v193_v1  ;;  %v198_v11 = vadd.s32 40, %v193_v1  ;;  %v199_v15 = vadd.s32 48, %v193_v1  ;;  %v200_v16 = vadd.s32 56, %v193_v1 }
  0x30   : > { %s1387_s10 = scalar_lea.vmem %s1681_s3, %s1050_s4  ;;  %v934_v17 = vadd.s32 4294967267, %v1376_v2  ;;  %vm205_vm0 = vcmp.eq.s32.totalorder %v193_v1, %v204_v5  ;;  %vm206_vm1 = vcmp.eq.s32.totalorder %v194_v3, %v204_v5  ;;  %vm207_vm2 = vcmp.eq.s32.totalorder %v195_v4, %v204_v5 }
  0x31   : > { %vm208_vm3 = vcmp.eq.s32.totalorder %v196_v9, %v204_v5  ;;  %vm209_vm4 = vcmp.eq.s32.totalorder %v197_v10, %v204_v5  ;;  %vm210_vm5 = vcmp.eq.s32.totalorder %v198_v11, %v204_v5  ;;  %vm211_vm6 = vcmp.eq.s32.totalorder %v199_v15, %v204_v5 }
  0x32   : > { %vm212_vm7 = vcmp.eq.s32.totalorder %v200_v16, %v204_v5  ;;  %v230_v18 = vmul.u32 2, %v934_v17  ;;  %v926_v20 = vsel %vm205_vm0, 1.0, %v1296_v19  ;;  %v927_v21 = vsel %vm206_vm1, 1.0, %v1296_v19 }
  0x33   : > { %v928_v22 = vsel %vm207_vm2, 1.0, %v1296_v19  ;;  %v929_v23 = vsel %vm208_vm3, 1.0, %v1296_v19  ;;  %v930_v25 = vsel %vm209_vm4, 1.0, %v1296_v19  ;;  %v931_v26 = vsel %vm210_vm5, 1.0, %v1296_v19 }
  0x34   : > { %v231_v24 = vadd.s32 1, %v230_v18  ;;  %v932_v27 = vsel %vm211_vm6, 1.0, %v1296_v19  ;;  %v933_v28 = vsel %vm212_vm7, 1.0, %v1296_v19  ;;  %vm1689_vm0 = vcmp.lt.s32.totalorder %v1376_v2, 29 }
  0x35   : > { %vm1690_vm1 = vmmov %vm1689_vm0 }
  0x36   : > { %vm232_vm9 = vcmp.eq.s32.totalorder %v193_v1, %v231_v24  ;;  %vm233_vm10 = vcmp.eq.s32.totalorder %v194_v3, %v231_v24  ;;  %vm234_vm11 = vcmp.eq.s32.totalorder %v195_v4, %v231_v24  ;;  %vm235_vm12 = vcmp.eq.s32.totalorder %v196_v9, %v231_v24  ;;  %vm1691_vm2 = vmmov %vm1689_vm0 }
  0x37   : > { %vm236_vm13 = vcmp.eq.s32.totalorder %v197_v10, %v231_v24  ;;  %vm237_vm14 = vcmp.eq.s32.totalorder %v198_v11, %v231_v24  ;;  %vm238_vm15 = vcmp.eq.s32.totalorder %v199_v15, %v231_v24  ;;  %vm239_vm8 = vcmp.eq.s32.totalorder %v200_v16, %v231_v24  ;;  %vm1692_vm3 = vmmov %vm1689_vm0 }
  0x38   : > { %v935_v29 = vsel %vm232_vm9, 1.0, %v1296_v19  ;;  %v936_v30 = vsel %vm233_vm10, 1.0, %v1296_v19  ;;  %v937_v31 = vsel %vm234_vm11, 1.0, %v1296_v19  ;;  %v938_v32 = vsel %vm235_vm12, 1.0, %v1296_v19  ;;  %vm1693_vm4 = vmmov %vm1689_vm0 }
  0x39   : > { %v939_v33 = vsel %vm236_vm13, 1.0, %v1296_v19  ;;  %v940_v34 = vsel %vm237_vm14, 1.0, %v1296_v19  ;;  %v941_v35 = vsel %vm238_vm15, 1.0, %v1296_v19  ;;  %v942_v36 = vsel %vm239_vm8, 1.0, %v1296_v19  ;;  %vm1694_vm5 = vmmov %vm1689_vm0 }
  0x3a   : > { %v1411_v37 = vsel %vm1689_vm0, %v926_v20, %v935_v29  ;;  %v1415_v38 = vsel %vm1690_vm1, %v927_v21, %v936_v30  ;;  %v1419_v39 = vsel %vm1691_vm2, %v928_v22, %v937_v31  ;;  %v1423_v40 = vsel %vm1692_vm3, %v929_v23, %v938_v32  ;;  %vm1695_vm6 = vmmov %vm1689_vm0 }
  0x3b   : > { %v1427_v41 = vsel %vm1693_vm4, %v930_v25, %v939_v33  ;;  %v1431_v42 = vsel %vm1694_vm5, %v931_v26, %v940_v34  ;;  %v1435_v43 = vsel %vm1695_vm6, %v932_v27, %v941_v35  ;;  %vm1696_vm7 = vmmov %vm1689_vm0 }
  0x3c   : > { %v1439_v44 = vsel %vm1696_vm7, %v933_v28, %v942_v36 }
  0x3d LB: >> { %s969_s17 = sshll.u32 %s1291_s16, 4  ;;  %s1297_s19 = smov 125   ;;  %vm349_vm8 = vcmask 1043456   ;;  %vm347_vm9 = vcmask 1045504   ;;  %vm351_vm10 = vcmask 1041408   ;;  %vm613_vm11 = vcmask 179200   ;;  %s1291_s16 = sphi %s1441_s16, %s269_s16  }
  0x3e   : >> { %s1450_s18 = scalar_lea.vmem %s1381_s7, %s969_s17  ;;  %s1298_s20 = smov 127   ;;  %961 = vmatprep.mubr.msk.f32.mxu0 %vm613_vm11, %v1391_v7  ;;  %vm593_vm12 = vcmask 474112   ;;  %vm1305_vm13 = vmmov 1   ;;  %vm818_vm15 = vcmask 236544  }
  0x3f   : >> { %v1453_v45 = vld [vmem:[%s1450_s18 + $0x20] sm:$0x3f]  ;;  %v1456_v46 = vld [vmem:[%s1450_s18 + $0x28] sm:$0x3f]  ;;  %v950_v52 = vld [vmem:[%s1450_s18 + $0x10] sm:$0x3f]  ;;  %s817_s27 = scalar_lea.vmem %s1387_s10, %s969_s17 }
  0x40   : >> { %v1459_v47 = vld [vmem:[%s1450_s18 + $0x8] sm:$0x3f]  ;;  %v1462_v48 = vrot.slane %v1453_v45, 2  ;;  %v488_v49 = vrot.slane %v1456_v46, 4  ;;  %v1466_v50 = vrot.slane %v1453_v45, 6  ;;  %v379_v51 = vrot.slane %v1453_v45, 4  ;;  %vm1044_vm14 = vmpackc.low %vm351_vm10, %vm1305_vm13 }
  0x41   : >> { %v492_v53 = vrot.slane %v1456_v46, 6  ;;  %v1475_v55 = vrot.slane %v1459_v47, 2  ;;  %v1477_v56 = vrot.slane %v950_v52, 4  ;;  %s1299_s21 = smov 1   ;;  %v317_v59 = vrot.slane %v1459_v47, 6  ;;  %s1300_s22 = smov 126  }
  0x42   : >> { %v1093_v54 = vpack.i.bf16 %v488_v49, %v1462_v48  ;;  %479 = vrot.lane.b32.xlu1 %v1466_v50, %s1297_s19  ;;  %v1485_v60 = vld [vmem:[%s1450_s18 + $0x18] sm:$0x3f]  ;;  %v313_v61 = vrot.slane %v1459_v47, 4  ;;  %v330_v62 = vrot.slane %v950_v52, 6  ;;  %v1500_v3 = vrot.slane %v950_v52, 2  ;;  %s1301_s23 = smov 124  }
  0x43   : >> { %v1098_v57 = vpack.i.bf16 %v492_v53, %v379_v51  ;;  %v1103_v58 = vpack.i.bf16 %v1477_v56, %v1475_v55  ;;  %v1490_v63 = vpack.i.bf16 %v950_v52, %v317_v59  ;;  %v1493_v0 = vrot.slane %v1485_v60, 6  ;;  %v1524_v19 = vld [vmem:[%s1450_s18] sm:$0x3f]  ;;  %s1303_s24 = smov 58   ;;  %s1307_s25 = smov 70  }
  0x44   : >> { %1094 = vrot.lane.b32.xlu0 %v1093_v54, %s1298_s20  ;;  %v362_v1 = vrot.slane %v1485_v60, 2  ;;  %v1498_v2 = vpack.i.bf16 %v330_v62, %v313_v61  ;;  %v1118_v5 = vpack.i.bf16 %v1500_v3, %v1459_v47  ;;  %v1510_v9 = vrot.slane %v1485_v60, 4  ;;  %s1308_s26 = smov 99   ;;  %s269_s16 = sadd.s32 1, %s1291_s16  }
  0x45   : >> { %v486_v16 = vrot.slane %v1456_v46, 2  ;;  %v295_v25 = vrot.slane %v1524_v19, 2  ;;  %v299_v49 = vrot.slane %v1524_v19, 4  ;;  %p266_p3 = scmp.ge.s32.totalorder %s269_s16, 29  }
  0x46   : >> { %483 = vrot.lane.b32.xlu1 %v1456_v46, %s1299_s21  ;;  %v1123_v4 = vpack.i.bf16 %v362_v1, %v1493_v0  ;;  %v1133_v10 = vpack.i.bf16 %v1493_v0, %v362_v1  ;;  %v1128_v11 = vpack.i.bf16 %v1510_v9, %v1485_v60 }
  0x48   : >> { %1099 = vrot.lane.b32.xlu0 %v1098_v57, %s1300_s22 }
  0x4a   : >> { %1104 = vrot.lane.b32.xlu1 %v1103_v58, %s1298_s20  ;;  %v1148_v58 = vpack.i.bf16 %v299_v49, %v1466_v50 }
  0x4c   : >> { %496 = vrot.lane.b32.xlu0 %v1456_v46, %s1297_s19 }
  0x4e   : >> { %1114 = vrot.lane.b32.xlu1 %v1490_v63, %s1297_s19 }
  0x50   : >> { %1109 = vrot.lane.b32.xlu0 %v1498_v2, %s1300_s22 }
  0x52   : >> { %1124 = vrot.lane.b32.xlu1 %v1123_v4, %s1298_s20 }
  0x54   : >> { %1119 = vrot.lane.b32.xlu0 %v1118_v5, %s1301_s23 }
  0x56   : >> { %1134 = vrot.lane.b32.xlu1 %v1133_v10, %s1297_s19 }
  0x58   : >> { %1129 = vrot.lane.b32.xlu0 %v1128_v11, %s1300_s22 }
  0x5c   : >> { %457 = vrot.lane.b32.xlu0 %v1510_v9, %s1301_s23 }
  0x60   : >> { %374 = vrot.lane.b32.xlu0 %v1453_v45, %s1299_s21 }
  0xb4   : >> { %v480_v15 = vpop.permute.xlu1 %479 }
  0xb6   : >> { %v1095_v17 = vpop.permute.xlu0 %1094 }
  0xb7   : >> { %v1097_v18 = vunpack.i.h.bf16 %v1095_v17  ;;  %v1096_v21 = vunpack.i.l.bf16 %v1095_v17 }
  0xb8   : >> { %v484_v20 = vpop.permute.xlu1 %483 }
  0xb9   : >> { %v502_v22 = vsel %vm349_vm8, %v486_v16, %v1097_v18  ;;  %v498_v29 = vsel %vm347_vm9, %v1453_v45, %v1096_v21  ;;  %v501_v36 = vsel %vm347_vm9, %v484_v20, %v486_v16  ;;  %v1302_v16 = vmov 0.0|0.0  }
  0xba   : >> { %v1100_v23 = vpop.permute.xlu0 %1099  ;;  %v1153_v24 = vpack.i.bf16 %v502_v22, %v379_v51  ;;  %v303_v51 = vrot.slane %v1524_v19, 6  ;;  %1004 = vmatprep.subr.bf16.mxu0 %v1302_v16 }
  0xbb   : >> { %v1102_v26 = vunpack.i.h.bf16 %v1100_v23  ;;  %v1101_v27 = vunpack.i.l.bf16 %v1100_v23 }
  0xbc   : >> { %1154 = vrot.lane.b32.xlu0 %v1153_v24, %s1298_s20  ;;  %v1529_v28 = vpop.permute.xlu1 %1104  ;;  %v1163_v59 = vpack.i.bf16 %v1459_v47, %v303_v51 }
  0xbd   : >> { %v499_v30 = vsel %vm349_vm8, %v1096_v21, %v1101_v27  ;;  %v503_v31 = vsel %vm351_vm10, %v1097_v18, %v1102_v26  ;;  %v500_v35 = vsel %vm351_vm10, %v1101_v27, %v480_v15  ;;  %v1106_v5 = vunpack.i.l.bf16 %v1529_v28 }
  0xbe   : >> { %v497_v32 = vpop.permute.xlu0 %496  ;;  %v1138_v33 = vpack.i.bf16 %v499_v30, %v498_v29  ;;  %v1158_v34 = vpack.i.bf16 %v295_v25, %v503_v31  ;;  %v1143_v52 = vpack.i.bf16 %v501_v36, %v500_v35  ;;  %v1168_v21 = vpack.i.bf16 %v1475_v55, %v1524_v19 }
  0xbf   : >> { %v461_v22 = vsel %vm347_vm9, %v1459_v47, %v1106_v5  ;;  %v1107_v47 = vunpack.i.h.bf16 %v1529_v28 }
  0xc0   : >> { %1139 = vrot.lane.b32.xlu1 %v1138_v33, %s1298_s20  ;;  %1159 = vrot.lane.b32.xlu0 %v1158_v34, %s1298_s20  ;;  %v1115_v46 = vpop.permute.xlu1 %1114 }
  0xc1   : >> { %v1116_v57 = vunpack.i.l.bf16 %v1115_v46  ;;  %v1117_v11 = vunpack.i.h.bf16 %v1115_v46  ;;  %v465_v36 = vsel %vm349_vm8, %v1500_v3, %v1107_v47 }
  0xc2   : >> { %v1110_v53 = vpop.permute.xlu0 %1109 }
  0xc3   : >> { %v1111_v54 = vunpack.i.l.bf16 %v1110_v53  ;;  %v1112_v31 = vunpack.i.h.bf16 %v1110_v53 }
  0xc4   : >> { %1144 = vrot.lane.b32.xlu1 %v1143_v52, %s1298_s20  ;;  %522 = vrot.lane.b32.xlu0 %v497_v32, %s1298_s20  ;;  %v1125_v61 = vpop.permute.xlu1 %1124 }
  0xc5   : >> { %v463_v4 = vsel %vm351_vm10, %v1111_v54, %v1116_v57  ;;  %v462_v23 = vsel %vm349_vm8, %v1106_v5, %v1111_v54  ;;  %v1126_v24 = vunpack.i.l.bf16 %v1125_v61  ;;  %v1127_v51 = vunpack.i.h.bf16 %v1125_v61 }
  0xc6   : >> { %v1120_v62 = vpop.permute.xlu0 %1119 }
  0xc7   : >> { %v1121_v1 = vunpack.i.l.bf16 %v1120_v62  ;;  %v1122_v10 = vunpack.i.h.bf16 %v1120_v62  ;;  %v469_v32 = vsel %vm351_vm10, %v1510_v9, %v1126_v24 }
  0xc8   : >> { %1149 = vrot.lane.b32.xlu1 %v1148_v58, %s1300_s22  ;;  %1164 = vrot.lane.b32.xlu0 %v1163_v59, %s1297_s19  ;;  %v1135_v20 = vpop.permute.xlu1 %1134 }
  0xc9   : >> { %v464_v15 = vsel %vm347_vm9, %v1121_v1, %v1500_v3  ;;  %v467_v25 = vsel %vm347_vm9, %v1117_v11, %v1122_v10  ;;  %v468_v26 = vsel %vm349_vm8, %v1122_v10, %v1510_v9  ;;  %v1136_v29 = vunpack.i.l.bf16 %v1135_v20 }
  0xca   : >> { %v1183_v17 = vpack.i.bf16 %v464_v15, %v463_v4  ;;  %v1130_v18 = vpop.permute.xlu0 %1129  ;;  %v1198_v30 = vpack.i.bf16 %v468_v26, %v467_v25  ;;  %v1137_v53 = vunpack.i.h.bf16 %v1135_v20 }
  0xcb   : >> { %v1131_v27 = vunpack.i.l.bf16 %v1130_v18  ;;  %v1132_v52 = vunpack.i.h.bf16 %v1130_v18 }
  0xcc   : >> { %387 = vrot.lane.b32.xlu1 %v1453_v45, %s1297_s19  ;;  %1184 = vrot.lane.b32.xlu0 %v1183_v17, %s1303_s24  ;;  %v1173_v45 = vpack.i.bf16 %v462_v23, %v461_v22 }
  0xcd   : >> { %v470_v33 = vsel %vm347_vm9, %v1131_v27, %v1136_v29  ;;  %v390_v54 = vsel %vm349_vm8, %v1127_v51, %v1132_v52  ;;  %v391_v58 = vsel %vm351_vm10, %v1132_v52, %v1137_v53 }
  0xce   : >> { %v1203_v34 = vpack.i.bf16 %v470_v33, %v469_v32  ;;  %v458_v35 = vpop.permute.xlu0 %457 }
  0xcf   : >> { %v471_v46 = vsel %vm349_vm8, %v1136_v29, %v458_v35  ;;  %v472_v28 = vsel %vm351_vm10, %v458_v35, %v1466_v50  ;;  %v389_v50 = vsel %vm347_vm9, %v1485_v60, %v1127_v51 }
  0xd0   : >> { %1169 = vrot.lane.b32.xlu1 %v1168_v21, %s1301_s23  ;;  %1189 = vrot.lane.b32.xlu0 %v1490_v63, %s1300_s22  ;;  %v466_v63 = vsel %vm351_vm10, %v1107_v47, %v1112_v31  ;;  %v1208_v49 = vpack.i.bf16 %v472_v28, %v471_v46  ;;  %v1213_v57 = vpack.i.bf16 %v390_v54, %v389_v50 }
  0xd1   : >> { %v1193_v9 = vpack.i.bf16 %v466_v63, %v465_v36 }
  0xd4   : >> { %1174 = vrot.lane.b32.xlu1 %v1173_v45, %s1303_s24  ;;  %1199 = vrot.lane.b32.xlu0 %v1198_v30, %s1303_s24 }
  0xd8   : >> { %1179 = vrot.lane.b32.xlu1 %v1498_v2, %s1298_s20  ;;  %1204 = vrot.lane.b32.xlu0 %v1203_v34, %s1303_s24  ;;  %v375_v2 = vpop.permute.xlu0 %374 }
  0xd9   : >> { %v392_v59 = vsel %vm347_vm9, %v375_v2, %v1462_v48 }
  0xda   : >> { %v1218_v61 = vpack.i.bf16 %v392_v59, %v391_v58 }
  0xdc   : >> { %1194 = vrot.lane.b32.xlu1 %v1193_v9, %s1303_s24  ;;  %1209 = vrot.lane.b32.xlu0 %v1208_v49, %s1303_s24 }
  0xe0   : >> { %338 = vrot.lane.b32.xlu1 %v1500_v3, %s1297_s19 }
  0xe4   : >> { %341 = vrot.lane.b32.xlu1 %v1477_v56, %s1301_s23 }
  0xe8   : >> { %1214 = vrot.lane.b32.xlu1 %v1213_v57, %s1298_s20 }
  0xec   : >> { %1219 = vrot.lane.b32.xlu1 %v1218_v61, %s1298_s20 }
 0x12e   : >> { %v1155_v3 = vpop.permute.xlu0 %1154 }
 0x12f   : >> { %v1156_v5 = vunpack.i.l.bf16 %v1155_v3  ;;  %v1157_v17 = vunpack.i.h.bf16 %v1155_v3 }
 0x131   : >> { %v393_v21 = vsel %vm349_vm8, %v1462_v48, %v1156_v5 }
 0x132   : >> { %v1140_v62 = vpop.permute.xlu1 %1139  ;;  %v1160_v60 = vpop.permute.xlu0 %1159 }
 0x133   : >> { %1229 = vrot.lane.b32.xlu0 %v1140_v62, %s1303_s24  ;;  %v1161_v10 = vunpack.i.l.bf16 %v1160_v60  ;;  %v1162_v27 = vunpack.i.h.bf16 %v1160_v60 }
 0x135   : >> { %v1238_v20 = vpack.i.bf16 %v1161_v10, %v1157_v17  ;;  %v348_v33 = vsel %vm347_vm9, %v1524_v19, %v1162_v27 }
 0x136   : >> { %v1145_v1 = vpop.permute.xlu1 %1144  ;;  %v523_v4 = vpop.permute.xlu0 %522 }
 0x137   : >> { %1234 = vrot.lane.b32.xlu0 %v1145_v1, %s1303_s24 }
 0x13a   : >> { %v1150_v11 = vpop.permute.xlu1 %1149  ;;  %v1165_v15 = vpop.permute.xlu0 %1164 }
 0x13b   : >> { %v1151_v18 = vunpack.i.l.bf16 %v1150_v11  ;;  %1239 = vrot.lane.b32.xlu0 %v1238_v20, %s1303_s24  ;;  %v1152_v45 = vunpack.i.h.bf16 %v1150_v11  ;;  %v1167_v34 = vunpack.i.h.bf16 %v1165_v15  ;;  %v1166_v35 = vunpack.i.l.bf16 %v1165_v15 }
 0x13d   : >> { %v394_v22 = vsel %vm351_vm10, %v1156_v5, %v1151_v18  ;;  %v350_v63 = vsel %vm349_vm8, %v1162_v27, %v1152_v45  ;;  %v352_v2 = vsel %vm351_vm10, %v1152_v45, %v1166_v35 }
 0x13e   : >> { %v388_v23 = vpop.permute.xlu1 %387  ;;  %v1223_v24 = vpack.i.bf16 %v394_v22, %v393_v21  ;;  %v1185_v25 = vpop.permute.xlu0 %1184 }
 0x13f   : >> { %572 = vrot.lane.b32.xlu0 %v523_v4, %s1303_s24  ;;  %v1187_v31 = vunpack.i.h.bf16 %v1185_v25  ;;  %v1186_v46 = vunpack.i.l.bf16 %v1185_v25 }
 0x140   : >> { %1224 = vrot.lane.b32.xlu1 %v1223_v24, %s1298_s20 }
 0x141   : >> { %v596_v3 = vsel %vm593_vm12, %v352_v2, %v1186_v46 }
 0x142   : >> { %v1170_v26 = vpop.permute.xlu1 %1169  ;;  %v1190_v29 = vpop.permute.xlu0 %1189 }
 0x143   : >> { %v1171_v30 = vunpack.i.l.bf16 %v1170_v26  ;;  %v1172_v28 = vunpack.i.h.bf16 %v1170_v26  ;;  %v1191_v50 = vunpack.i.l.bf16 %v1190_v29  ;;  %v1192_v11 = vunpack.i.h.bf16 %v1190_v29 }
 0x144   : >> { %413 = vrot.lane.b32.xlu1 %v388_v23, %s1298_s20 }
 0x145   : >> { %v353_v36 = vsel %vm347_vm9, %v1171_v30, %v1475_v55  ;;  %v357_v59 = vsel %vm349_vm8, %v1172_v28, %v1477_v56  ;;  %v356_v61 = vsel %vm347_vm9, %v1167_v34, %v1172_v28 }
 0x146   : >> { %v1175_v48 = vpop.permute.xlu1 %1174  ;;  %v1200_v51 = vpop.permute.xlu0 %1199  ;;  %v597_v54 = vsel %vm593_vm12, %v353_v36, %v1187_v31 }
 0x147   : >> { %v1177_v47 = vunpack.i.h.bf16 %v1175_v48  ;;  %v1176_v32 = vunpack.i.l.bf16 %v1175_v48  ;;  %v1202_v57 = vunpack.i.h.bf16 %v1200_v51  ;;  %v1201_v58 = vunpack.i.l.bf16 %v1200_v51 }
 0x148   : >> { %v1008_v62 = vpack.c.bf16 %v597_v54, %v596_v3 }
 0x149   : >> { %v594_v9 = vsel %vm593_vm12, %v348_v33, %v1176_v32  ;;  %v595_v49 = vsel %vm593_vm12, %v350_v63, %v1177_v47  ;;  %v600_v18 = vsel %vm593_vm12, %v356_v61, %v1201_v58  ;;  %v601_v20 = vsel %vm593_vm12, %v357_v59, %v1202_v57 }
 0x14a   : >> { %v1005_v52 = vpack.c.bf16 %v595_v49, %v594_v9  ;;  %v1180_v53 = vpop.permute.xlu1 %1179  ;;  %v1205_v10 = vpop.permute.xlu0 %1204  ;;  %v1014_v45 = vpack.c.bf16 %v601_v20, %v600_v18 }
 0x14b   : >> { %v1181_v19 = vunpack.i.l.bf16 %v1180_v53  ;;  %v1182_v60 = vunpack.i.h.bf16 %v1180_v53  ;;  %v1207_v23 = vunpack.i.h.bf16 %v1205_v10 }
 0x14c   : >> { %1006 = vmatpush1.bf16.msra.mxu0 %v1005_v52 }
 0x14d   : >> { %1007 = vmatprep.subr.bf16.mxu0 %v1302_v16  ;;  %v354_v1 = vsel %vm349_vm8, %v1475_v55, %v1181_v19  ;;  %v355_v4 = vsel %vm351_vm10, %v1181_v19, %v1191_v50  ;;  %v1206_v55 = vunpack.i.l.bf16 %v1205_v10  ;;  %v358_v24 = vsel %vm351_vm10, %v1477_v56, %v1182_v60 }
 0x14e   : >> { %v1195_v5 = vpop.permute.xlu1 %1194  ;;  %v1210_v27 = vpop.permute.xlu0 %1209 }
 0x14f   : >> { %v1197_v15 = vunpack.i.h.bf16 %v1195_v5  ;;  %v1196_v17 = vunpack.i.l.bf16 %v1195_v5  ;;  %v602_v30 = vsel %vm593_vm12, %v358_v24, %v1206_v55  ;;  %v1212_v31 = vunpack.i.h.bf16 %v1210_v27 }
 0x150   : >> { %1009 = vmatpush1.bf16.msra.mxu0 %v1008_v62  ;;  %v1211_v47 = vunpack.i.l.bf16 %v1210_v27  ;;  %v1035_v55 = vpack.c.bf16 %v1423_v40, %v1419_v39  ;;  %v1039_v24 = vpack.c.bf16 %v1431_v42, %v1427_v41 }
 0x151   : >> { %1010 = vmatprep.subr.bf16.mxu0 %v1302_v16  ;;  %v598_v21 = vsel %vm593_vm12, %v354_v1, %v1196_v17  ;;  %v599_v22 = vsel %vm593_vm12, %v355_v4, %v1197_v15 }
 0x152   : >> { %v1011_v25 = vpack.c.bf16 %v599_v22, %v598_v21  ;;  %v339_v26 = vpop.permute.xlu1 %338 }
 0x153   : >> { %v359_v29 = vsel %vm347_vm9, %v1192_v11, %v339_v26 }
 0x154   : >> { %1012 = vmatpush1.bf16.msra.mxu0 %v1011_v25  ;;  %v603_v48 = vsel %vm593_vm12, %v359_v29, %v1207_v23  ;;  %v1304_v23 = vmov 0.0   ;;  %v1043_v25 = vpack.c.bf16 %v1439_v44, %v1435_v43 }
 0x155   : >> { %1013 = vmatprep.subr.bf16.mxu0 %v1302_v16  ;;  %v1017_v34 = vpack.c.bf16 %v603_v48, %v602_v30 }
 0x156   : >> { %v342_v32 = vpop.permute.xlu1 %341 }
 0x157   : >> { %v360_v33 = vsel %vm349_vm8, %v339_v26, %v342_v32  ;;  %v361_v56 = vsel %vm351_vm10, %v342_v32, %v1493_v0  ;;  %v1306_v26 = vmov 0  }
 0x158   : >> { %1015 = vmatpush1.bf16.msra.mxu0 %v1014_v45  ;;  %v604_v35 = vsel %vm593_vm12, %v360_v33, %v1211_v47  ;;  %v605_v36 = vsel %vm593_vm12, %v361_v56, %v1212_v31  ;;  %1243 = vset.pattern.permute.xlu1 %v1306_v26 }
 0x159   : >> { %1016 = vmatprep.subr.bf16.mxu0 %v1302_v16  ;;  %v1020_v63 = vpack.c.bf16 %v605_v36, %v604_v35  ;;  %1244 = vset.pattern.permute.xlu0 %v1306_v26 }
 0x15a   : >> { %v1215_v46 = vpop.permute.xlu1 %1214 }
 0x15b   : >> { %v1217_v9 = vunpack.i.h.bf16 %v1215_v46  ;;  %v1216_v49 = vunpack.i.l.bf16 %v1215_v46 }
 0x15c   : >> { %1018 = vmatpush1.bf16.msra.mxu0 %v1017_v34 }
 0x15d   : >> { %1019 = vmatprep.subr.bf16.mxu0 %v1302_v16 }
 0x15e   : >> { %v1220_v52 = vpop.permute.xlu1 %1219 }
 0x15f   : >> { %v1222_v2 = vunpack.i.h.bf16 %v1220_v52  ;;  %v1221_v57 = vunpack.i.l.bf16 %v1220_v52 }
 0x160   : >> { %1021 = vmatpush1.bf16.msra.mxu0 %v1020_v63 }
 0x161   : >> { %1022 = vmatprep.subr.bf16.mxu0 %v1302_v16 }
 0x1a5   : >> { %v1230_v28 = vpop.permute.xlu0 %1229 }
 0x1a6   : >> { %v1232_v0 = vunpack.i.h.bf16 %v1230_v28  ;;  %v1231_v51 = vunpack.i.l.bf16 %v1230_v28 }
 0x1a8   : >> { %v606_v53 = vsel %vm593_vm12, %v1216_v49, %v1231_v51  ;;  %v607_v50 = vsel %vm593_vm12, %v1217_v9, %v1232_v0 }
 0x1a9   : >> { %v1235_v54 = vpop.permute.xlu0 %1234  ;;  %v1023_v19 = vpack.c.bf16 %v607_v50, %v606_v53 }
 0x1aa   : >> { %v1237_v58 = vunpack.i.h.bf16 %v1235_v54  ;;  %v1236_v59 = vunpack.i.l.bf16 %v1235_v54 }
 0x1ab   : >> { %1024 = vmatpush1.bf16.msra.mxu0 %v1023_v19 }
 0x1ac   : >> { %1025 = vmatprep.subr.bf16.mxu0 %v1302_v16  ;;  %v608_v61 = vsel %vm593_vm12, %v1221_v57, %v1236_v59  ;;  %v609_v3 = vsel %vm593_vm12, %v1222_v2, %v1237_v58 }
 0x1ad   : >> { %v1240_v62 = vpop.permute.xlu0 %1239  ;;  %v1026_v60 = vpack.c.bf16 %v609_v3, %v608_v61 }
 0x1ae   : >> { %v1242_v1 = vunpack.i.h.bf16 %v1240_v62  ;;  %v1241_v4 = vunpack.i.l.bf16 %v1240_v62 }
 0x1af   : >> { %1027 = vmatpush1.bf16.msra.mxu0 %v1026_v60 }
 0x1b0   : >> { %1028 = vmatprep.subr.bf16.mxu0 %v1302_v16  ;;  %v1031_v16 = vpack.c.bf16 %v1415_v38, %v1411_v37 }
 0x1b1   : >> { %v573_v21 = vpop.permute.xlu0 %572 }
 0x1b2   : >> { %v1225_v5 = vpop.permute.xlu1 %1224  ;;  %1032 = vmatprep.subr.bf16.mxu1 %v1031_v16 }
 0x1b3   : >> { %v1227_v10 = vunpack.i.h.bf16 %v1225_v5  ;;  %v1226_v11 = vunpack.i.l.bf16 %v1225_v5  ;;  %1034 = vmatpush3.bf16.msra.mxu1 %v1031_v16 }
 0x1b4   : >> { %1036 = vmatprep.subr.bf16.mxu1 %v1035_v55 }
 0x1b5   : >> { %v610_v15 = vsel %vm593_vm12, %v1226_v11, %v1241_v4  ;;  %v611_v17 = vsel %vm593_vm12, %v1227_v10, %v1242_v1 }
 0x1b6   : >> { %v1029_v18 = vpack.c.bf16 %v611_v17, %v610_v15  ;;  %v414_v20 = vpop.permute.xlu1 %413 }
 0x1b7   : >> { %v612_v22 = vsel %vm593_vm12, %v414_v20, %v573_v21  ;;  %1038 = vmatpush3.bf16.msra.mxu1 %v1035_v55 }
 0x1b8   : >> { %1030 = vmatpush1.bf16.msra.mxu0 %v1029_v18  ;;  %1040 = vmatprep.subr.bf16.mxu1 %v1039_v24 }
 0x1b9   : >> { %659 = vmatprep.subr.mxu0 %v1304_v23 }
 0x1bb   : >> { %1042 = vmatpush3.bf16.msra.mxu1 %v1039_v24 }
 0x1bc   : >> { %960 = vmatpush1.msk.msra.mxu0 %vm347_vm9, %v612_v22  ;;  %1045 = vmatprep.subr.msk.bf16.mxu1 %vm1044_vm14, %v1043_v25 }
 0x1bd   : >> { %688 = vmatmul.mubr.f32.vlgmr.msra.gmra.mrb[0].mxu0 %v1389_v6 }
 0x1be   : >> { %962 = vmatprep.mubr.msk.f32.mxu0 %vm613_vm11, %v1395_v12 }
 0x1bf   : >> { %1048 = vmatpush3.bf16.msk.msra.mxu1 %vm1044_vm14, %v1043_v25 }
 0x1c1   : >> { %693 = vmatmul.mubr.f32.gmra.mrb[2].mxu0 %v1393_v8 }
 0x290   : >> { %v689_v27 = vpop.f32.mrb[0].mxu0 }
 0x291   : >> { %700 = vrot.lane.b32.xlu1 %v689_v27, %s1307_s25  ;;  %v691_v29 = vpop.f32.mrb[1].mxu0 }
 0x294   : >> { %v694_v45 = vpop.f32.mrb[2].mxu0 }
 0x295   : >> { %702 = vrot.lane.b32.xlu0 %v694_v45, %s1307_s25  ;;  %v696_v30 = vpop.f32.mrb[3].mxu0  ;;  %804 = vperm.xlu1 %1243, %v1400_v13  }
 0x299   : >> { %809 = vperm.xlu0 %1244, %v1405_v14  }
 0x303   : >> { %v701_v48 = vpop.permute.xlu1 %700 }
 0x304   : >> { %v706_v31 = vmax.f32 %v689_v27, %v701_v48 }
 0x306   : >> { %1001 = vmatprep.mubr.msk.f32.mxu1 %vm593_vm12, %v706_v31 }
 0x307   : >> { %v703_v47 = vpop.permute.xlu0 %702 }
 0x308   : >> { %v707_v32 = vmax.f32 %v694_v45, %v703_v47 }
 0x30a   : >> { %1002 = vmatmul.mubr.msk.f32.vlgmr.msra.gmra.mrb[0].mxu1 %vm593_vm12, %v707_v32 }
 0x314   : >> { %v805_v34 = vpop.permute.xlu1 %804 }
 0x318   : >> { %v810_v28 = vpop.permute.xlu0 %809 }
 0x3dd   : >> { %v1003_v33 = vpop.f32.mrb[0].mxu1 }
 0x3de   : >> { %v783_v56 = vpop.f32.mrb[1].mxu1 }
 0x3df   : >> { %794 = vrot.lane.b32.xlu1 %v783_v56, %s1308_s26 }
 0x3e3   : >> { %796 = vrot.lane.b32.xlu1 %v1003_v33, %s1308_s26 }
 0x451   : >> { %v795_v35 = vpop.permute.xlu1 %794 }
 0x452   : >> { %v800_v36 = vmax.f32 %v783_v56, %v795_v35 }
 0x454   : >> { %v812_v63 = vadd.f32 %v805_v34, %v800_v36 }
 0x455   : >> { %v797_v46 = vpop.permute.xlu1 %796 }
 0x456   : >> { %v814_v9 = vmax.f32 %v812_v63, 0.0  ;;  %v801_v49 = vmax.f32 %v1003_v33, %v797_v46  ;;  %268 = sbr.rel (!%p266_p3) target bundleno = 61 (0x3d), region = 81 }
 0x458   : >> { %819 = vst.msk [vmem:[%s817_s27] sm:$0xff] %vm818_vm15, %v814_v9  ;;  %v813_v0 = vadd.f32 %v810_v28, %v801_v49 }
 0x45a   : >> { %v815_v51 = vmax.f32 %v813_v0, 0.0 }
 0x45c   : >> { %820 = vst.msk [vmem:[%s817_s27 + $0x8] sm:$0xff] %vm818_vm15, %v815_v51 }
 0x45d PF: > { %s14_s12 = sadd.s32 1, %s1287_s12  }
 0x45e   : > { %p11_p5 = scmp.ge.s32.totalorder %s14_s12, 4  }
 0x460   :  { %13 = sbr.rel (!%p11_p5) target bundleno = 1 (0x1), region = 92 }
 0x467   :  { %842 = vsyncpa [#allocation3], 1 }
 0x468   :  { %844 = vsyncpa [#allocation3 + $0x1], 1 }

// kernel: net_forward.5
= control target key start
LH: loop header
LB: loop body
LE: loop exit
PB: predicated region body
PF: predicated region fallthrough
CT: control target
= control target key end

     0   :  { %v86_v27 = vlaneseq  ;;  %v12825_v35 = vmov 1983009808   ;;  %s15700_s0 = inlined_call_operand.vmem [shape: f32[2,13456], index: 0, kind: input, shape index: {}]   ;;  %s15701_s1 = inlined_call_operand.vmem [shape: bf16[13456,120], index: 1, kind: input, shape index: {}]   ;;  %s15702_s2 = inlined_call_operand.vmem [shape: f32[1,120], index: 2, kind: input, shape index: {}]   ;;  %s15703_s3 = inlined_call_operand.vmem [shape: f32[120,84], index: 3, kind: input, shape index: {}]   ;;  %s15704_s4 = inlined_call_operand.vmem [shape: f32[1,84], index: 4, kind: input, shape index: {}]   ;;  %s15705_s5 = inlined_call_operand.vmem [shape: f32[84,2], index: 5, kind: input, shape index: {}]   ;;  %s15706_s6 = inlined_call_operand.vmem [shape: f32[1,2], index: 6, kind: input, shape index: {}]   ;;  %s15707_s7 = inlined_call_operand.hbm [shape: f32[2,2], index: 7, kind: output, shape index: {}]  }
   0x1   :  { %v11934_v0 = vld [vmem:[%s15701_s1 + $0x40] sm:$0xff]   ;;  %v11938_v4 = vld [vmem:[%s15701_s1 + $0x48] sm:$0xff]   ;;  %v11942_v8 = vld [vmem:[%s15701_s1 + $0x50] sm:$0xff]   ;;  %v84_v36 = vunpack.c.l.s4 %v12825_v35 }
   0x2   :  { %v11935_v1 = vld [vmem:[%s15701_s1] sm:$0xff]   ;;  %10662 = vmatprep.subr.bf16.mxu0 %v11934_v0  ;;  %v11939_v5 = vld [vmem:[%s15701_s1 + $0x8] sm:$0xff]   ;;  %v11943_v9 = vld [vmem:[%s15701_s1 + $0x10] sm:$0xff]   ;;  %v87_v32 = vshrl.u32 %v86_v27, 7 }
   0x3   :  { %v11936_v2 = vld [vmem:[%s15701_s1 + $0xc0] sm:$0xff]   ;;  %10663 = vmatpush3.bf16.msra.mxu0 %v11935_v1  ;;  %v11940_v6 = vld [vmem:[%s15701_s1 + $0xc8] sm:$0xff]   ;;  %v11944_v10 = vld [vmem:[%s15701_s1 + $0xd0] sm:$0xff]   ;;  %v85_v38 = vunpack.c.0.s8 %v84_v36 }
   0x4   :  { %v11937_v3 = vld [vmem:[%s15701_s1 + $0x80] sm:$0xff]   ;;  %10684 = vmatprep.subr.bf16.mxu1 %v11936_v2  ;;  %10664 = vmatprep.subr.bf16.mxu0 %v11938_v4  ;;  %v11941_v7 = vld [vmem:[%s15701_s1 + $0x88] sm:$0xff]   ;;  %v11945_v11 = vld [vmem:[%s15701_s1 + $0x90] sm:$0xff]  }
   0x5   :  { %10685 = vmatpush3.bf16.msra.mxu1 %v11937_v3  ;;  %v11946_v12 = vld [vmem:[%s15701_s1 + $0x58] sm:$0xff]   ;;  %v11950_v16 = vld [vmem:[%s15701_s1 + $0x60] sm:$0xff]   ;;  %v11954_v20 = vld [vmem:[%s15701_s1 + $0x68] sm:$0xff]   ;;  %v12976_v41 = vsub.s32 %v85_v38, %v87_v32 }
   0x6   :  { %10686 = vmatprep.subr.bf16.mxu1 %v11940_v6  ;;  %v11947_v13 = vld [vmem:[%s15701_s1 + $0x18] sm:$0xff]   ;;  %v11951_v17 = vld [vmem:[%s15701_s1 + $0x20] sm:$0xff]   ;;  %v11955_v21 = vld [vmem:[%s15701_s1 + $0x28] sm:$0xff]  }
   0x7   :  { %10665 = vmatpush3.bf16.msra.mxu0 %v11939_v5  ;;  %v11948_v14 = vld [vmem:[%s15701_s1 + $0xd8] sm:$0xff]   ;;  %v11952_v18 = vld [vmem:[%s15701_s1 + $0xe0] sm:$0xff]   ;;  %v11956_v22 = vld [vmem:[%s15701_s1 + $0xe8] sm:$0xff]  }
   0x8   :  { %10666 = vmatprep.subr.bf16.mxu0 %v11942_v8  ;;  %v11949_v15 = vld [vmem:[%s15701_s1 + $0x98] sm:$0xff]   ;;  %v11953_v19 = vld [vmem:[%s15701_s1 + $0xa0] sm:$0xff]   ;;  %v11957_v23 = vld [vmem:[%s15701_s1 + $0xa8] sm:$0xff]  }
   0x9   :  { %10687 = vmatpush3.bf16.msra.mxu1 %v11941_v7  ;;  %v11958_v24 = vld [vmem:[%s15701_s1 + $0x70] sm:$0xff]   ;;  %v11962_v29 = vld [vmem:[%s15701_s1 + $0x78] sm:$0xff]   ;;  %v28_v33 = vld [vmem:[%s15700_s0] sm:$0xff] }
   0xa   :  { %10688 = vmatprep.subr.bf16.mxu1 %v11944_v10  ;;  %v11959_v25 = vld [vmem:[%s15701_s1 + $0x30] sm:$0xff]   ;;  %v11963_v30 = vld [vmem:[%s15701_s1 + $0x38] sm:$0xff]   ;;  %v11966_v37 = vld [vmem:[%s15701_s1 + $0x140] sm:$0xff]   ;;  %v82_v39 = vcombine.high %v28_v33, %v28_v33  ;;  %v89_v42 = vrot.slane %v28_v33, %v12976_v41 }
   0xb   :  { %10667 = vmatpush3.bf16.msra.mxu0 %v11943_v9  ;;  %v11960_v26 = vld [vmem:[%s15701_s1 + $0xf0] sm:$0xff]   ;;  %v11964_v31 = vld [vmem:[%s15701_s1 + $0xf8] sm:$0xff]   ;;  %v11969_v40 = vld [vmem:[%s15701_s1 + $0x1c0] sm:$0xff]  }
   0xc   :  { %10668 = vmatprep.subr.bf16.mxu0 %v11946_v12  ;;  %v11961_v28 = vld [vmem:[%s15701_s1 + $0xb0] sm:$0xff]   ;;  %v11965_v34 = vld [vmem:[%s15701_s1 + $0xb8] sm:$0xff]   ;;  %v96_v43 = vrot.slane %v82_v39, %v12976_v41  ;;  %v97_v44 = vcombine.high %v89_v42, %v89_v42  ;;  %v11968_v46 = vld [vmem:[%s15701_s1 + $0x100] sm:$0xff]   ;;  %v638_v47 = vpack.c.bf16 %v89_v42, %v89_v42 }
   0xd   :  { %10689 = vmatpush3.bf16.msra.mxu1 %v11945_v11  ;;  %v11970_v49 = vld [vmem:[%s15701_s1 + $0x180] sm:$0xff]   ;;  %v11971_v52 = vld [vmem:[%s15701_s1 + $0x148] sm:$0xff]   ;;  %v11975_v56 = vld [vmem:[%s15701_s1 + $0x150] sm:$0xff]  }
   0xe   :  { %10690 = vmatprep.subr.bf16.mxu1 %v11948_v14  ;;  %v98_v45 = vcombine.high %v96_v43, %v96_v43  ;;  %v640_v48 = vpack.c.bf16 %v96_v43, %v96_v43  ;;  %v639_v50 = vpack.c.bf16 %v97_v44, %v97_v44  ;;  %v11973_v53 = vld [vmem:[%s15701_s1 + $0x1c8] sm:$0xff]   ;;  %v11977_v57 = vld [vmem:[%s15701_s1 + $0x1d0] sm:$0xff]   ;;  %v11979_v60 = vld [vmem:[%s15701_s1 + $0x158] sm:$0xff]  }
   0xf   :  { %10669 = vmatpush3.bf16.msra.mxu0 %v11947_v13  ;;  %v11972_v54 = vld [vmem:[%s15701_s1 + $0x108] sm:$0xff]   ;;  %v11976_v58 = vld [vmem:[%s15701_s1 + $0x110] sm:$0xff]   ;;  %v11981_v61 = vld [vmem:[%s15701_s1 + $0x1d8] sm:$0xff]  }
  0x10   :  { %10670 = vmatprep.subr.bf16.mxu0 %v11950_v16  ;;  %v641_v51 = vpack.c.bf16 %v98_v45, %v98_v45  ;;  %7515 = vmatprep.mubr.bf16.mxu0 %v639_v50  ;;  %v11974_v55 = vld [vmem:[%s15701_s1 + $0x188] sm:$0xff]   ;;  %v11978_v59 = vld [vmem:[%s15701_s1 + $0x190] sm:$0xff]   ;;  %v11980_v62 = vld [vmem:[%s15701_s1 + $0x118] sm:$0xff]  }
  0x11   :  { %10691 = vmatpush3.bf16.msra.mxu1 %v11949_v15  ;;  %v11982_v63 = vld [vmem:[%s15701_s1 + $0x198] sm:$0xff]   ;;  %v11983_v0 = vld [vmem:[%s15701_s1 + $0x160] sm:$0xff]   ;;  %v11987_v4 = vld [vmem:[%s15701_s1 + $0x168] sm:$0xff]  }
  0x12   :  { %10692 = vmatprep.subr.bf16.mxu1 %v11952_v18  ;;  %7555 = vmatprep.mubr.bf16.mxu1 %v641_v51  ;;  %v11985_v1 = vld [vmem:[%s15701_s1 + $0x1e0] sm:$0xff]   ;;  %v11989_v5 = vld [vmem:[%s15701_s1 + $0x1e8] sm:$0xff]   ;;  %v11991_v8 = vld [vmem:[%s15701_s1 + $0x170] sm:$0xff]  }
  0x13   :  { %10671 = vmatpush3.bf16.msra.mxu0 %v11951_v17  ;;  %v11984_v2 = vld [vmem:[%s15701_s1 + $0x120] sm:$0xff]   ;;  %v11988_v6 = vld [vmem:[%s15701_s1 + $0x128] sm:$0xff]   ;;  %v11993_v9 = vld [vmem:[%s15701_s1 + $0x1f0] sm:$0xff]  }
  0x14   :  { %10672 = vmatprep.subr.bf16.mxu0 %v11954_v20  ;;  %v11986_v3 = vld [vmem:[%s15701_s1 + $0x1a0] sm:$0xff]   ;;  %v11990_v7 = vld [vmem:[%s15701_s1 + $0x1a8] sm:$0xff]   ;;  %v11992_v11 = vld [vmem:[%s15701_s1 + $0x130] sm:$0xff]  }
  0x15   :  { %10693 = vmatpush3.bf16.msra.mxu1 %v11953_v19  ;;  %v29_v10 = vld [vmem:[%s15700_s0 + $0x8] sm:$0xff]  ;;  %v11994_v14 = vld [vmem:[%s15701_s1 + $0x1b0] sm:$0xff]   ;;  %v11995_v15 = vld [vmem:[%s15701_s1 + $0x178] sm:$0xff]  }
  0x16   :  { %10694 = vmatprep.subr.bf16.mxu1 %v11956_v22  ;;  %v106_v12 = vrot.slane %v29_v10, %v12976_v41  ;;  %v99_v13 = vcombine.high %v29_v10, %v29_v10  ;;  %v11997_v18 = vld [vmem:[%s15701_s1 + $0x1f8] sm:$0xff]   ;;  %v12005_v32 = vld [vmem:[%s15701_s1 + $0x208] sm:$0xff]   ;;  %v12010_v35 = vld [vmem:[%s15701_s1 + $0x2d0] sm:$0xff]  }
  0x17   :  { %10673 = vmatpush3.bf16.msra.mxu0 %v11955_v21  ;;  %v11996_v19 = vld [vmem:[%s15701_s1 + $0x138] sm:$0xff]   ;;  %v12007_v33 = vld [vmem:[%s15701_s1 + $0x288] sm:$0xff]   ;;  %v12009_v36 = vld [vmem:[%s15701_s1 + $0x210] sm:$0xff]  }
  0x18   :  { %10674 = vmatprep.subr.bf16.mxu0 %v11958_v24  ;;  %v114_v16 = vcombine.high %v106_v12, %v106_v12  ;;  %v113_v17 = vrot.slane %v99_v13, %v12976_v41  ;;  %v11998_v22 = vld [vmem:[%s15701_s1 + $0x1b8] sm:$0xff]   ;;  %v642_v27 = vpack.c.bf16 %v106_v12, %v106_v12  ;;  %v12016_v43 = vld [vmem:[%s15701_s1 + $0x260] sm:$0xff]   ;;  %v12023_v50 = vld [vmem:[%s15701_s1 + $0x2a8] sm:$0xff]  }
  0x19   :  { %10695 = vmatpush3.bf16.msra.mxu1 %v11957_v23  ;;  %v11999_v23 = vld [vmem:[%s15701_s1 + $0x240] sm:$0xff]   ;;  %v12012_v38 = vld [vmem:[%s15701_s1 + $0x258] sm:$0xff]   ;;  %v12024_v51 = vld [vmem:[%s15701_s1 + $0x270] sm:$0xff]  }
  0x1a   :  { %10696 = vmatprep.subr.bf16.mxu1 %v11960_v26  ;;  %v643_v20 = vpack.c.bf16 %v114_v16, %v114_v16  ;;  %v115_v21 = vcombine.high %v113_v17, %v113_v17  ;;  %v12001_v26 = vld [vmem:[%s15701_s1 + $0x200] sm:$0xff]   ;;  %v12014_v39 = vld [vmem:[%s15701_s1 + $0x2d8] sm:$0xff]   ;;  %v12039_v10 = vld [vmem:[%s15701_s1 + $0x3c8] sm:$0xff]  }
  0x1b   :  { %10675 = vmatpush3.bf16.msra.mxu0 %v11959_v25  ;;  %v12002_v25 = vld [vmem:[%s15701_s1 + $0x2c0] sm:$0xff]   ;;  %v12015_v42 = vld [vmem:[%s15701_s1 + $0x298] sm:$0xff]   ;;  %v12040_v12 = vld [vmem:[%s15701_s1 + $0x388] sm:$0xff]  }
  0x1c   :  { %10676 = vmatprep.subr.bf16.mxu0 %v11962_v29  ;;  %v645_v24 = vpack.c.bf16 %v115_v21, %v115_v21  ;;  %v12003_v29 = vld [vmem:[%s15701_s1 + $0x280] sm:$0xff]   ;;  %v12041_v13 = vld [vmem:[%s15701_s1 + $0x350] sm:$0xff]  }
  0x1d   :  { %10697 = vmatpush3.bf16.msra.mxu1 %v11961_v28  ;;  %v644_v28 = vpack.c.bf16 %v113_v17, %v113_v17  ;;  %v12018_v44 = vld [vmem:[%s15701_s1 + $0x2e0] sm:$0xff]   ;;  %v12044_v16 = vld [vmem:[%s15701_s1 + $0x390] sm:$0xff]   ;;  %v12045_v17 = vld [vmem:[%s15701_s1 + $0x358] sm:$0xff]  }
  0x1e   :  { %10698 = vmatprep.subr.bf16.mxu1 %v11964_v31  ;;  %v12006_v31 = vld [vmem:[%s15701_s1 + $0x2c8] sm:$0xff]   ;;  %v12017_v45 = vld [vmem:[%s15701_s1 + $0x220] sm:$0xff]  }
  0x1f   :  { %10677 = vmatpush3.bf16.msra.mxu0 %v11963_v30  ;;  %v12004_v30 = vld [vmem:[%s15701_s1 + $0x248] sm:$0xff]   ;;  %v12049_v21 = vld [vmem:[%s15701_s1 + $0x360] sm:$0xff]  }
  0x20   :  { %10706 = vmatprep.subr.bf16.mxu0 %v11966_v37  ;;  %v12011_v37 = vld [vmem:[%s15701_s1 + $0x290] sm:$0xff]  }
  0x21   :  { %10699 = vmatpush3.bf16.msra.mxu1 %v11965_v34  ;;  %v12008_v34 = vld [vmem:[%s15701_s1 + $0x250] sm:$0xff]  }
  0x22   :  { %10728 = vmatprep.subr.bf16.mxu1 %v11969_v40  ;;  %7516 = vmatmul.mubr.bf16.vlgmr.msra.gmra.mrb[0].mxu0 %v638_v47  ;;  %v12013_v40 = vld [vmem:[%s15701_s1 + $0x218] sm:$0xff]   ;;  %v12020_v47 = vld [vmem:[%s15701_s1 + $0x268] sm:$0xff]  }
  0x23   :  { %10707 = vmatpush3.bf16.msra.mxu0 %v11968_v46  ;;  %7595 = vmatprep.mubr.bf16.mxu0 %v643_v20  ;;  %v12019_v46 = vld [vmem:[%s15701_s1 + $0x2a0] sm:$0xff]   ;;  %v12048_v20 = vld [vmem:[%s15701_s1 + $0x398] sm:$0xff]  }
  0x24   :  { %7556 = vmatmul.mubr.bf16.vlgmr.msra.gmra.mrb[0].mxu1 %v640_v48  ;;  %10708 = vmatprep.subr.bf16.mxu0 %v11971_v52  ;;  %v12022_v48 = vld [vmem:[%s15701_s1 + $0x2e8] sm:$0xff]   ;;  %v12026_v52 = vld [vmem:[%s15701_s1 + $0x2f0] sm:$0xff]  }
  0x25   :  { %10729 = vmatpush3.bf16.msra.mxu1 %v11970_v49  ;;  %7635 = vmatprep.mubr.bf16.mxu1 %v645_v24  ;;  %v12021_v49 = vld [vmem:[%s15701_s1 + $0x228] sm:$0xff]   ;;  %v12052_v24 = vld [vmem:[%s15701_s1 + $0x3a0] sm:$0xff]  }
  0x26   :  { %10730 = vmatprep.subr.bf16.mxu1 %v11973_v53  ;;  %v30_v53 = vld [vmem:[%s15700_s0 + $0x10] sm:$0xff] }
  0x27   :  { %10709 = vmatpush3.bf16.msra.mxu0 %v11972_v54  ;;  %v12025_v54 = vld [vmem:[%s15701_s1 + $0x230] sm:$0xff]  }
  0x28   :  { %10710 = vmatprep.subr.bf16.mxu0 %v11975_v56  ;;  %v116_v56 = vcombine.high %v30_v53, %v30_v53 }
  0x29   :  { %10731 = vmatpush3.bf16.msra.mxu1 %v11974_v55  ;;  %v123_v55 = vrot.slane %v30_v53, %v12976_v41  ;;  %v12072_v53 = vld [vmem:[%s15701_s1 + $0x4c8] sm:$0xff]  }
  0x2a   :  { %10732 = vmatprep.subr.bf16.mxu1 %v11977_v57  ;;  %v12027_v57 = vld [vmem:[%s15701_s1 + $0x2b0] sm:$0xff]  }
  0x2b   :  { %10711 = vmatpush3.bf16.msra.mxu0 %v11976_v58  ;;  %v12028_v58 = vld [vmem:[%s15701_s1 + $0x278] sm:$0xff]  }
  0x2c   :  { %10712 = vmatprep.subr.bf16.mxu0 %v11979_v60  ;;  %v130_v60 = vrot.slane %v116_v56, %v12976_v41  ;;  %v12074_v56 = vld [vmem:[%s15701_s1 + $0x450] sm:$0xff]  }
  0x2d   :  { %10733 = vmatpush3.bf16.msra.mxu1 %v11978_v59  ;;  %v131_v59 = vcombine.high %v123_v55, %v123_v55 }
  0x2e   :  { %10734 = vmatprep.subr.bf16.mxu1 %v11981_v61  ;;  %v12030_v61 = vld [vmem:[%s15701_s1 + $0x2f8] sm:$0xff]  }
  0x2f   :  { %10713 = vmatpush3.bf16.msra.mxu0 %v11980_v62  ;;  %v12029_v62 = vld [vmem:[%s15701_s1 + $0x238] sm:$0xff]  }
  0x30   :  { %10714 = vmatprep.subr.bf16.mxu0 %v11983_v0  ;;  %v132_v0 = vcombine.high %v130_v60, %v130_v60 }
  0x31   :  { %10735 = vmatpush3.bf16.msra.mxu1 %v11982_v63  ;;  %v647_v63 = vpack.c.bf16 %v131_v59, %v131_v59  ;;  %v12077_v59 = vld [vmem:[%s15701_s1 + $0x490] sm:$0xff]  }
  0x32   :  { %10736 = vmatprep.subr.bf16.mxu1 %v11985_v1  ;;  %v12031_v1 = vld [vmem:[%s15701_s1 + $0x2b8] sm:$0xff]  }
  0x33   :  { %10715 = vmatpush3.bf16.msra.mxu0 %v11984_v2  ;;  %v12032_v2 = vld [vmem:[%s15701_s1 + $0x340] sm:$0xff]  }
  0x34   :  { %10716 = vmatprep.subr.bf16.mxu0 %v11987_v4  ;;  %v12035_v4 = vld [vmem:[%s15701_s1 + $0x3c0] sm:$0xff]  }
  0x35   :  { %10737 = vmatpush3.bf16.msra.mxu1 %v11986_v3  ;;  %v649_v3 = vpack.c.bf16 %v132_v0, %v132_v0  ;;  %v12082_v0 = vld [vmem:[%s15701_s1 + $0x460] sm:$0xff]  }
  0x36   :  { %10738 = vmatprep.subr.bf16.mxu1 %v11989_v5  ;;  %v12034_v5 = vld [vmem:[%s15701_s1 + $0x300] sm:$0xff]  }
  0x37   :  { %10717 = vmatpush3.bf16.msra.mxu0 %v11988_v6  ;;  %v646_v6 = vpack.c.bf16 %v123_v55, %v123_v55  ;;  %v12073_v55 = vld [vmem:[%s15701_s1 + $0x488] sm:$0xff]  }
  0x38   :  { %10718 = vmatprep.subr.bf16.mxu0 %v11991_v8  ;;  %v12036_v8 = vld [vmem:[%s15701_s1 + $0x380] sm:$0xff]  }
  0x39   :  { %10739 = vmatpush3.bf16.msra.mxu1 %v11990_v7  ;;  %v648_v7 = vpack.c.bf16 %v130_v60, %v130_v60  ;;  %v12078_v60 = vld [vmem:[%s15701_s1 + $0x458] sm:$0xff]  }
  0x3a   :  { %10740 = vmatprep.subr.bf16.mxu1 %v11993_v9  ;;  %v12037_v9 = vld [vmem:[%s15701_s1 + $0x348] sm:$0xff]  }
  0x3b   :  { %10719 = vmatpush3.bf16.msra.mxu0 %v11992_v11  ;;  %v12038_v11 = vld [vmem:[%s15701_s1 + $0x308] sm:$0xff]  }
  0x3c   :  { %10720 = vmatprep.subr.bf16.mxu0 %v11995_v15  ;;  %v12042_v15 = vld [vmem:[%s15701_s1 + $0x310] sm:$0xff]  }
  0x3d   :  { %10741 = vmatpush3.bf16.msra.mxu1 %v11994_v14  ;;  %v12043_v14 = vld [vmem:[%s15701_s1 + $0x3d0] sm:$0xff]  }
  0x3e   :  { %10742 = vmatprep.subr.bf16.mxu1 %v11997_v18  ;;  %v12047_v18 = vld [vmem:[%s15701_s1 + $0x3d8] sm:$0xff]  }
  0x3f   :  { %10721 = vmatpush3.bf16.msra.mxu0 %v11996_v19  ;;  %v12046_v19 = vld [vmem:[%s15701_s1 + $0x318] sm:$0xff]  }
  0x40   :  { %10750 = vmatprep.subr.bf16.mxu0 %v11999_v23  ;;  %v12050_v23 = vld [vmem:[%s15701_s1 + $0x320] sm:$0xff]  }
  0x41   :  { %10743 = vmatpush3.bf16.msra.mxu1 %v11998_v22  ;;  %v12051_v22 = vld [vmem:[%s15701_s1 + $0x3e0] sm:$0xff]  }
  0x42   :  { %10772 = vmatprep.subr.bf16.mxu1 %v12002_v25  ;;  %7596 = vmatmul.mubr.bf16.vlgmr.msra.gmra.mrb[4].mxu0 %v642_v27  ;;  %v12053_v25 = vld [vmem:[%s15701_s1 + $0x368] sm:$0xff]  }
  0x43   :  { %10751 = vmatpush3.bf16.msra.mxu0 %v12001_v26  ;;  %7675 = vmatprep.mubr.bf16.mxu0 %v647_v63  ;;  %v12055_v26 = vld [vmem:[%s15701_s1 + $0x3e8] sm:$0xff]   ;;  %v12081_v63 = vld [vmem:[%s15701_s1 + $0x498] sm:$0xff]  }
  0x44   :  { %7636 = vmatmul.mubr.bf16.vlgmr.msra.gmra.mrb[4].mxu1 %v644_v28  ;;  %10752 = vmatprep.subr.bf16.mxu0 %v12004_v30  ;;  %v12054_v27 = vld [vmem:[%s15701_s1 + $0x328] sm:$0xff]   ;;  %v12059_v30 = vld [vmem:[%s15701_s1 + $0x3f0] sm:$0xff]  }
  0x45   :  { %10773 = vmatpush3.bf16.msra.mxu1 %v12003_v29  ;;  %7715 = vmatprep.mubr.bf16.mxu1 %v649_v3  ;;  %v12056_v28 = vld [vmem:[%s15701_s1 + $0x3a8] sm:$0xff]   ;;  %v12057_v29 = vld [vmem:[%s15701_s1 + $0x370] sm:$0xff]   ;;  %v12085_v3 = vld [vmem:[%s15701_s1 + $0x4a0] sm:$0xff]  }
  0x46   :  { %10774 = vmatprep.subr.bf16.mxu1 %v12006_v31  ;;  %v12058_v31 = vld [vmem:[%s15701_s1 + $0x330] sm:$0xff]  }
  0x47   :  { %10753 = vmatpush3.bf16.msra.mxu0 %v12005_v32  ;;  %v31_v32 = vld [vmem:[%s15700_s0 + $0x18] sm:$0xff] }
  0x48   :  { %10754 = vmatprep.subr.bf16.mxu0 %v12008_v34  ;;  %v140_v34 = vrot.slane %v31_v32, %v12976_v41 }
  0x49   :  { %10775 = vmatpush3.bf16.msra.mxu1 %v12007_v33  ;;  %v12060_v33 = vld [vmem:[%s15701_s1 + $0x3b0] sm:$0xff]  }
  0x4a   :  { %10776 = vmatprep.subr.bf16.mxu1 %v12010_v35  ;;  %v133_v35 = vcombine.high %v31_v32, %v31_v32  ;;  %v12104_v32 = vld [vmem:[%s15701_s1 + $0x508] sm:$0xff]  }
  0x4b   :  { %10755 = vmatpush3.bf16.msra.mxu0 %v12009_v36  ;;  %v12061_v36 = vld [vmem:[%s15701_s1 + $0x378] sm:$0xff]  }
  0x4c   :  { %10756 = vmatprep.subr.bf16.mxu0 %v12012_v38  ;;  %v148_v38 = vcombine.high %v140_v34, %v140_v34 }
  0x4d   :  { %10777 = vmatpush3.bf16.msra.mxu1 %v12011_v37  ;;  %v12063_v37 = vld [vmem:[%s15701_s1 + $0x3f8] sm:$0xff]  }
  0x4e   :  { %10778 = vmatprep.subr.bf16.mxu1 %v12014_v39  ;;  %v147_v39 = vrot.slane %v133_v35, %v12976_v41  ;;  %v12109_v35 = vld [vmem:[%s15701_s1 + $0x5d0] sm:$0xff]  }
  0x4f   :  { %10757 = vmatpush3.bf16.msra.mxu0 %v12013_v40  ;;  %v12062_v40 = vld [vmem:[%s15701_s1 + $0x338] sm:$0xff]  }
  0x50   :  { %10758 = vmatprep.subr.bf16.mxu0 %v12016_v43  ;;  %v12064_v43 = vld [vmem:[%s15701_s1 + $0x3b8] sm:$0xff]  }
  0x51   :  { %10779 = vmatpush3.bf16.msra.mxu1 %v12015_v42  ;;  %v651_v42 = vpack.c.bf16 %v148_v38, %v148_v38  ;;  %v12111_v38 = vld [vmem:[%s15701_s1 + $0x558] sm:$0xff]  }
  0x52   :  { %10780 = vmatprep.subr.bf16.mxu1 %v12018_v44  ;;  %v149_v44 = vcombine.high %v147_v39, %v147_v39 }
  0x53   :  { %10759 = vmatpush3.bf16.msra.mxu0 %v12017_v45  ;;  %v12065_v45 = vld [vmem:[%s15701_s1 + $0x440] sm:$0xff]  }
  0x54   :  { %10760 = vmatprep.subr.bf16.mxu0 %v12020_v47  ;;  %v12068_v47 = vld [vmem:[%s15701_s1 + $0x4c0] sm:$0xff]  }
  0x55   :  { %10781 = vmatpush3.bf16.msra.mxu1 %v12019_v46  ;;  %v653_v46 = vpack.c.bf16 %v149_v44, %v149_v44  ;;  %v12117_v44 = vld [vmem:[%s15701_s1 + $0x5e0] sm:$0xff]  }
  0x56   :  { %10782 = vmatprep.subr.bf16.mxu1 %v12022_v48  ;;  %v12067_v48 = vld [vmem:[%s15701_s1 + $0x400] sm:$0xff]  }
  0x57   :  { %10761 = vmatpush3.bf16.msra.mxu0 %v12021_v49  ;;  %v650_v49 = vpack.c.bf16 %v140_v34, %v140_v34  ;;  %v12107_v34 = vld [vmem:[%s15701_s1 + $0x550] sm:$0xff]  }
  0x58   :  { %10762 = vmatprep.subr.bf16.mxu0 %v12024_v51  ;;  %v12069_v51 = vld [vmem:[%s15701_s1 + $0x480] sm:$0xff]  }
  0x59   :  { %10783 = vmatpush3.bf16.msra.mxu1 %v12023_v50  ;;  %v652_v50 = vpack.c.bf16 %v147_v39, %v147_v39  ;;  %v12113_v39 = vld [vmem:[%s15701_s1 + $0x5d8] sm:$0xff]  }
  0x5a   :  { %10784 = vmatprep.subr.bf16.mxu1 %v12026_v52  ;;  %v12070_v52 = vld [vmem:[%s15701_s1 + $0x448] sm:$0xff]  }
  0x5b   :  { %10763 = vmatpush3.bf16.msra.mxu0 %v12025_v54  ;;  %v12071_v54 = vld [vmem:[%s15701_s1 + $0x408] sm:$0xff]  }
  0x5c   :  { %10764 = vmatprep.subr.bf16.mxu0 %v12028_v58  ;;  %v12075_v58 = vld [vmem:[%s15701_s1 + $0x410] sm:$0xff]  }
  0x5d   :  { %10785 = vmatpush3.bf16.msra.mxu1 %v12027_v57  ;;  %v12076_v57 = vld [vmem:[%s15701_s1 + $0x4d0] sm:$0xff]  }
  0x5e   :  { %10786 = vmatprep.subr.bf16.mxu1 %v12030_v61  ;;  %v12080_v61 = vld [vmem:[%s15701_s1 + $0x4d8] sm:$0xff]  }
  0x5f   :  { %10765 = vmatpush3.bf16.msra.mxu0 %v12029_v62  ;;  %v12079_v62 = vld [vmem:[%s15701_s1 + $0x418] sm:$0xff]  }
  0x60   :  { %10794 = vmatprep.subr.bf16.mxu0 %v12032_v2  ;;  %v12083_v2 = vld [vmem:[%s15701_s1 + $0x420] sm:$0xff]  }
  0x61   :  { %10787 = vmatpush3.bf16.msra.mxu1 %v12031_v1  ;;  %v12084_v1 = vld [vmem:[%s15701_s1 + $0x4e0] sm:$0xff]  }
  0x62   :  { %10816 = vmatprep.subr.bf16.mxu1 %v12035_v4  ;;  %7676 = vmatmul.mubr.bf16.vlgmr.msra.gmra.mrb[8].mxu0 %v646_v6  ;;  %v12086_v4 = vld [vmem:[%s15701_s1 + $0x468] sm:$0xff]  }
  0x63   :  { %10795 = vmatpush3.bf16.msra.mxu0 %v12034_v5  ;;  %7755 = vmatprep.mubr.bf16.mxu0 %v651_v42  ;;  %v12088_v5 = vld [vmem:[%s15701_s1 + $0x4e8] sm:$0xff]   ;;  %v12114_v42 = vld [vmem:[%s15701_s1 + $0x598] sm:$0xff]  }
  0x64   :  { %7716 = vmatmul.mubr.bf16.vlgmr.msra.gmra.mrb[8].mxu1 %v648_v7  ;;  %10796 = vmatprep.subr.bf16.mxu0 %v12037_v9  ;;  %v12087_v6 = vld [vmem:[%s15701_s1 + $0x428] sm:$0xff]   ;;  %v12092_v9 = vld [vmem:[%s15701_s1 + $0x4f0] sm:$0xff]  }
  0x65   :  { %10817 = vmatpush3.bf16.msra.mxu1 %v12036_v8  ;;  %7795 = vmatprep.mubr.bf16.mxu1 %v653_v46  ;;  %v12089_v7 = vld [vmem:[%s15701_s1 + $0x4a8] sm:$0xff]   ;;  %v12090_v8 = vld [vmem:[%s15701_s1 + $0x470] sm:$0xff]   ;;  %v12118_v46 = vld [vmem:[%s15701_s1 + $0x5a0] sm:$0xff]  }
  0x66   :  { %10818 = vmatprep.subr.bf16.mxu1 %v12039_v10  ;;  %v12091_v10 = vld [vmem:[%s15701_s1 + $0x430] sm:$0xff]  }
  0x67   :  { %10797 = vmatpush3.bf16.msra.mxu0 %v12038_v11  ;;  %v32_v11 = vld [vmem:[%s15700_s0 + $0x20] sm:$0xff] }
  0x68   :  { %10798 = vmatprep.subr.bf16.mxu0 %v12041_v13  ;;  %v157_v13 = vrot.slane %v32_v11, %v12976_v41 }
  0x69   :  { %10819 = vmatpush3.bf16.msra.mxu1 %v12040_v12  ;;  %v12093_v12 = vld [vmem:[%s15701_s1 + $0x4b0] sm:$0xff]  }
  0x6a   :  { %10820 = vmatprep.subr.bf16.mxu1 %v12043_v14  ;;  %v150_v14 = vcombine.high %v32_v11, %v32_v11  ;;  %v12137_v11 = vld [vmem:[%s15701_s1 + $0x608] sm:$0xff]  }
  0x6b   :  { %10799 = vmatpush3.bf16.msra.mxu0 %v12042_v15  ;;  %v12094_v15 = vld [vmem:[%s15701_s1 + $0x478] sm:$0xff]  }
  0x6c   :  { %10800 = vmatprep.subr.bf16.mxu0 %v12045_v17  ;;  %v165_v17 = vcombine.high %v157_v13, %v157_v13 }
  0x6d   :  { %10821 = vmatpush3.bf16.msra.mxu1 %v12044_v16  ;;  %v12096_v16 = vld [vmem:[%s15701_s1 + $0x4f8] sm:$0xff]  }
  0x6e   :  { %10822 = vmatprep.subr.bf16.mxu1 %v12047_v18  ;;  %v164_v18 = vrot.slane %v150_v14, %v12976_v41  ;;  %v12142_v14 = vld [vmem:[%s15701_s1 + $0x6d0] sm:$0xff]  }
  0x6f   :  { %10801 = vmatpush3.bf16.msra.mxu0 %v12046_v19  ;;  %v12095_v19 = vld [vmem:[%s15701_s1 + $0x438] sm:$0xff]  }
  0x70   :  { %10802 = vmatprep.subr.bf16.mxu0 %v12049_v21  ;;  %v12097_v21 = vld [vmem:[%s15701_s1 + $0x4b8] sm:$0xff]  }
  0x71   :  { %10823 = vmatpush3.bf16.msra.mxu1 %v12048_v20  ;;  %v655_v20 = vpack.c.bf16 %v165_v17, %v165_v17  ;;  %v12144_v17 = vld [vmem:[%s15701_s1 + $0x658] sm:$0xff]  }
  0x72   :  { %10824 = vmatprep.subr.bf16.mxu1 %v12051_v22  ;;  %v166_v22 = vcombine.high %v164_v18, %v164_v18 }
  0x73   :  { %10803 = vmatpush3.bf16.msra.mxu0 %v12050_v23  ;;  %v12098_v23 = vld [vmem:[%s15701_s1 + $0x540] sm:$0xff]  }
  0x74   :  { %10804 = vmatprep.subr.bf16.mxu0 %v12053_v25  ;;  %v12101_v25 = vld [vmem:[%s15701_s1 + $0x5c0] sm:$0xff]  }
  0x75   :  { %10825 = vmatpush3.bf16.msra.mxu1 %v12052_v24  ;;  %v657_v24 = vpack.c.bf16 %v166_v22, %v166_v22  ;;  %v12150_v22 = vld [vmem:[%s15701_s1 + $0x6e0] sm:$0xff]  }
  0x76   :  { %10826 = vmatprep.subr.bf16.mxu1 %v12055_v26  ;;  %v12100_v26 = vld [vmem:[%s15701_s1 + $0x500] sm:$0xff]  }
  0x77   :  { %10805 = vmatpush3.bf16.msra.mxu0 %v12054_v27  ;;  %v654_v27 = vpack.c.bf16 %v157_v13, %v157_v13  ;;  %v12140_v13 = vld [vmem:[%s15701_s1 + $0x650] sm:$0xff]  }
  0x78   :  { %10806 = vmatprep.subr.bf16.mxu0 %v12057_v29  ;;  %v12102_v29 = vld [vmem:[%s15701_s1 + $0x580] sm:$0xff]  }
  0x79   :  { %10827 = vmatpush3.bf16.msra.mxu1 %v12056_v28  ;;  %v656_v28 = vpack.c.bf16 %v164_v18, %v164_v18  ;;  %v12146_v18 = vld [vmem:[%s15701_s1 + $0x6d8] sm:$0xff]  }
  0x7a   :  { %10828 = vmatprep.subr.bf16.mxu1 %v12059_v30  ;;  %v12103_v30 = vld [vmem:[%s15701_s1 + $0x548] sm:$0xff]  }
  0x7b   :  { %10807 = vmatpush3.bf16.msra.mxu0 %v12058_v31  ;;  %v12105_v31 = vld [vmem:[%s15701_s1 + $0x5c8] sm:$0xff]  }
  0x7c   :  { %10808 = vmatprep.subr.bf16.mxu0 %v12061_v36  ;;  %v12108_v36 = vld [vmem:[%s15701_s1 + $0x510] sm:$0xff]  }
  0x7d   :  { %10829 = vmatpush3.bf16.msra.mxu1 %v12060_v33  ;;  %v12106_v33 = vld [vmem:[%s15701_s1 + $0x588] sm:$0xff]  }
  0x7e   :  { %10830 = vmatprep.subr.bf16.mxu1 %v12063_v37  ;;  %v12110_v37 = vld [vmem:[%s15701_s1 + $0x590] sm:$0xff]  }
  0x7f   :  { %10809 = vmatpush3.bf16.msra.mxu0 %v12062_v40  ;;  %v12112_v40 = vld [vmem:[%s15701_s1 + $0x518] sm:$0xff]  }
  0x80   :  { %10838 = vmatprep.subr.bf16.mxu0 %v12065_v45  ;;  %v12116_v45 = vld [vmem:[%s15701_s1 + $0x520] sm:$0xff]  }
  0x81   :  { %10831 = vmatpush3.bf16.msra.mxu1 %v12064_v43  ;;  %v12115_v43 = vld [vmem:[%s15701_s1 + $0x560] sm:$0xff]  }
  0x82   :  { %10860 = vmatprep.subr.bf16.mxu1 %v12068_v47  ;;  %7756 = vmatmul.mubr.bf16.vlgmr.msra.gmra.mrb[12].mxu0 %v650_v49  ;;  %v12119_v47 = vld [vmem:[%s15701_s1 + $0x568] sm:$0xff]  }
  0x83   :  { %10839 = vmatpush3.bf16.msra.mxu0 %v12067_v48  ;;  %7835 = vmatprep.mubr.bf16.mxu0 %v655_v20  ;;  %v12121_v48 = vld [vmem:[%s15701_s1 + $0x5e8] sm:$0xff]   ;;  %v12147_v20 = vld [vmem:[%s15701_s1 + $0x698] sm:$0xff]  }
  0x84   :  { %7796 = vmatmul.mubr.bf16.vlgmr.msra.gmra.mrb[12].mxu1 %v652_v50  ;;  %10840 = vmatprep.subr.bf16.mxu0 %v12070_v52  ;;  %v12120_v49 = vld [vmem:[%s15701_s1 + $0x528] sm:$0xff]   ;;  %v12125_v52 = vld [vmem:[%s15701_s1 + $0x5f0] sm:$0xff]  }
  0x85   :  { %10861 = vmatpush3.bf16.msra.mxu1 %v12069_v51  ;;  %7875 = vmatprep.mubr.bf16.mxu1 %v657_v24  ;;  %v12122_v50 = vld [vmem:[%s15701_s1 + $0x5a8] sm:$0xff]   ;;  %v12123_v51 = vld [vmem:[%s15701_s1 + $0x570] sm:$0xff]   ;;  %v12151_v24 = vld [vmem:[%s15701_s1 + $0x6a0] sm:$0xff]  }
  0x86   :  { %10862 = vmatprep.subr.bf16.mxu1 %v12072_v53  ;;  %v12124_v53 = vld [vmem:[%s15701_s1 + $0x530] sm:$0xff]  }
  0x87   :  { %10841 = vmatpush3.bf16.msra.mxu0 %v12071_v54  ;;  %v33_v54 = vld [vmem:[%s15700_s0 + $0x28] sm:$0xff] }
  0x88   :  { %10842 = vmatprep.subr.bf16.mxu0 %v12074_v56  ;;  %v174_v56 = vrot.slane %v33_v54, %v12976_v41 }
  0x89   :  { %10863 = vmatpush3.bf16.msra.mxu1 %v12073_v55  ;;  %v12126_v55 = vld [vmem:[%s15701_s1 + $0x5b0] sm:$0xff]  }
  0x8a   :  { %10864 = vmatprep.subr.bf16.mxu1 %v12076_v57  ;;  %v167_v57 = vcombine.high %v33_v54, %v33_v54  ;;  %v12170_v54 = vld [vmem:[%s15701_s1 + $0x708] sm:$0xff]  }
  0x8b   :  { %10843 = vmatpush3.bf16.msra.mxu0 %v12075_v58  ;;  %v12127_v58 = vld [vmem:[%s15701_s1 + $0x578] sm:$0xff]  }
  0x8c   :  { %10844 = vmatprep.subr.bf16.mxu0 %v12078_v60  ;;  %v182_v60 = vcombine.high %v174_v56, %v174_v56 }
  0x8d   :  { %10865 = vmatpush3.bf16.msra.mxu1 %v12077_v59  ;;  %v12129_v59 = vld [vmem:[%s15701_s1 + $0x5f8] sm:$0xff]  }
  0x8e   :  { %10866 = vmatprep.subr.bf16.mxu1 %v12080_v61  ;;  %v181_v61 = vrot.slane %v167_v57, %v12976_v41  ;;  %v12175_v57 = vld [vmem:[%s15701_s1 + $0x7d0] sm:$0xff]  }
  0x8f   :  { %10845 = vmatpush3.bf16.msra.mxu0 %v12079_v62  ;;  %v12128_v62 = vld [vmem:[%s15701_s1 + $0x538] sm:$0xff]  }
  0x90   :  { %10846 = vmatprep.subr.bf16.mxu0 %v12082_v0  ;;  %v12130_v0 = vld [vmem:[%s15701_s1 + $0x5b8] sm:$0xff]  }
  0x91   :  { %10867 = vmatpush3.bf16.msra.mxu1 %v12081_v63  ;;  %v659_v63 = vpack.c.bf16 %v182_v60, %v182_v60  ;;  %v12177_v60 = vld [vmem:[%s15701_s1 + $0x758] sm:$0xff]  }
  0x92   :  { %10868 = vmatprep.subr.bf16.mxu1 %v12084_v1  ;;  %v183_v1 = vcombine.high %v181_v61, %v181_v61 }
  0x93   :  { %10847 = vmatpush3.bf16.msra.mxu0 %v12083_v2  ;;  %v12131_v2 = vld [vmem:[%s15701_s1 + $0x640] sm:$0xff]  }
  0x94   :  { %10848 = vmatprep.subr.bf16.mxu0 %v12086_v4  ;;  %v12134_v4 = vld [vmem:[%s15701_s1 + $0x6c0] sm:$0xff]  }
  0x95   :  { %10869 = vmatpush3.bf16.msra.mxu1 %v12085_v3  ;;  %v661_v3 = vpack.c.bf16 %v183_v1, %v183_v1  ;;  %v12183_v1 = vld [vmem:[%s15701_s1 + $0x7e0] sm:$0xff]  }
  0x96   :  { %10870 = vmatprep.subr.bf16.mxu1 %v12088_v5  ;;  %v12133_v5 = vld [vmem:[%s15701_s1 + $0x600] sm:$0xff]  }
  0x97   :  { %10849 = vmatpush3.bf16.msra.mxu0 %v12087_v6  ;;  %v658_v6 = vpack.c.bf16 %v174_v56, %v174_v56  ;;  %v12173_v56 = vld [vmem:[%s15701_s1 + $0x750] sm:$0xff]  }
  0x98   :  { %10850 = vmatprep.subr.bf16.mxu0 %v12090_v8  ;;  %v12135_v8 = vld [vmem:[%s15701_s1 + $0x680] sm:$0xff]  }
  0x99   :  { %10871 = vmatpush3.bf16.msra.mxu1 %v12089_v7  ;;  %v660_v7 = vpack.c.bf16 %v181_v61, %v181_v61  ;;  %v12179_v61 = vld [vmem:[%s15701_s1 + $0x7d8] sm:$0xff]  }
  0x9a   :  { %10872 = vmatprep.subr.bf16.mxu1 %v12092_v9  ;;  %v12136_v9 = vld [vmem:[%s15701_s1 + $0x648] sm:$0xff]  }
  0x9b   :  { %10851 = vmatpush3.bf16.msra.mxu0 %v12091_v10  ;;  %v12138_v10 = vld [vmem:[%s15701_s1 + $0x6c8] sm:$0xff]  }
  0x9c   :  { %10852 = vmatprep.subr.bf16.mxu0 %v12094_v15  ;;  %v12141_v15 = vld [vmem:[%s15701_s1 + $0x610] sm:$0xff]  }
  0x9d   :  { %10873 = vmatpush3.bf16.msra.mxu1 %v12093_v12  ;;  %v12139_v12 = vld [vmem:[%s15701_s1 + $0x688] sm:$0xff]  }
  0x9e   :  { %10874 = vmatprep.subr.bf16.mxu1 %v12096_v16  ;;  %v12143_v16 = vld [vmem:[%s15701_s1 + $0x690] sm:$0xff]  }
  0x9f   :  { %10853 = vmatpush3.bf16.msra.mxu0 %v12095_v19  ;;  %v12145_v19 = vld [vmem:[%s15701_s1 + $0x618] sm:$0xff]  }
  0xa0   :  { %10882 = vmatprep.subr.bf16.mxu0 %v12098_v23  ;;  %v12149_v23 = vld [vmem:[%s15701_s1 + $0x620] sm:$0xff]  }
  0xa1   :  { %10875 = vmatpush3.bf16.msra.mxu1 %v12097_v21  ;;  %v12148_v21 = vld [vmem:[%s15701_s1 + $0x660] sm:$0xff]  }
  0xa2   :  { %10904 = vmatprep.subr.bf16.mxu1 %v12101_v25  ;;  %7836 = vmatmul.mubr.bf16.vlgmr.msra.gmra.mrb[16].mxu0 %v654_v27  ;;  %v12152_v25 = vld [vmem:[%s15701_s1 + $0x668] sm:$0xff]  }
  0xa3   :  { %10883 = vmatpush3.bf16.msra.mxu0 %v12100_v26  ;;  %7915 = vmatprep.mubr.bf16.mxu0 %v659_v63  ;;  %v12154_v26 = vld [vmem:[%s15701_s1 + $0x6e8] sm:$0xff]   ;;  %v12180_v63 = vld [vmem:[%s15701_s1 + $0x798] sm:$0xff]  }
  0xa4   :  { %7876 = vmatmul.mubr.bf16.vlgmr.msra.gmra.mrb[16].mxu1 %v656_v28  ;;  %10884 = vmatprep.subr.bf16.mxu0 %v12103_v30  ;;  %v12153_v27 = vld [vmem:[%s15701_s1 + $0x628] sm:$0xff]   ;;  %v12158_v30 = vld [vmem:[%s15701_s1 + $0x6f0] sm:$0xff]  }
  0xa5   :  { %10905 = vmatpush3.bf16.msra.mxu1 %v12102_v29  ;;  %7955 = vmatprep.mubr.bf16.mxu1 %v661_v3  ;;  %v12155_v28 = vld [vmem:[%s15701_s1 + $0x6a8] sm:$0xff]   ;;  %v12156_v29 = vld [vmem:[%s15701_s1 + $0x670] sm:$0xff]   ;;  %v12184_v3 = vld [vmem:[%s15701_s1 + $0x7a0] sm:$0xff]  }
  0xa6   :  { %10906 = vmatprep.subr.bf16.mxu1 %v12105_v31  ;;  %v12157_v31 = vld [vmem:[%s15701_s1 + $0x630] sm:$0xff]  }
  0xa7   :  { %10885 = vmatpush3.bf16.msra.mxu0 %v12104_v32  ;;  %v12159_v32 = vld [vmem:[%s15701_s1 + $0x6b0] sm:$0xff]  }
  0xa8   :  { %10886 = vmatprep.subr.bf16.mxu0 %v12107_v34  ;;  %v12160_v34 = vld [vmem:[%s15701_s1 + $0x678] sm:$0xff]  }
  0xa9   :  { %10907 = vmatpush3.bf16.msra.mxu1 %v12106_v33  ;;  %v34_v33 = vld [vmem:[%s15700_s0 + $0x30] sm:$0xff] }
  0xaa   :  { %10908 = vmatprep.subr.bf16.mxu1 %v12109_v35  ;;  %v191_v35 = vrot.slane %v34_v33, %v12976_v41 }
  0xab   :  { %10887 = vmatpush3.bf16.msra.mxu0 %v12108_v36  ;;  %v184_v36 = vcombine.high %v34_v33, %v34_v33  ;;  %v12196_v33 = vld [vmem:[%s15701_s1 + $0x7b8] sm:$0xff]  }
  0xac   :  { %10888 = vmatprep.subr.bf16.mxu0 %v12111_v38  ;;  %v199_v38 = vcombine.high %v191_v35, %v191_v35 }
  0xad   :  { %10909 = vmatpush3.bf16.msra.mxu1 %v12110_v37  ;;  %v12162_v37 = vld [vmem:[%s15701_s1 + $0x6f8] sm:$0xff]  }
  0xae   :  { %10910 = vmatprep.subr.bf16.mxu1 %v12113_v39  ;;  %v198_v39 = vrot.slane %v184_v36, %v12976_v41 }
  0xaf   :  { %10889 = vmatpush3.bf16.msra.mxu0 %v12112_v40  ;;  %v12161_v40 = vld [vmem:[%s15701_s1 + $0x638] sm:$0xff]  }
  0xb0   :  { %10890 = vmatprep.subr.bf16.mxu0 %v12115_v43  ;;  %v12163_v43 = vld [vmem:[%s15701_s1 + $0x6b8] sm:$0xff]  }
  0xb1   :  { %10911 = vmatpush3.bf16.msra.mxu1 %v12114_v42  ;;  %v663_v42 = vpack.c.bf16 %v199_v38, %v199_v38  ;;  %v12200_v38 = vld [vmem:[%s15701_s1 + $0x8c0] sm:$0xff]  }
  0xb2   :  { %10912 = vmatprep.subr.bf16.mxu1 %v12117_v44  ;;  %v200_v44 = vcombine.high %v198_v39, %v198_v39 }
  0xb3   :  { %10891 = vmatpush3.bf16.msra.mxu0 %v12116_v45  ;;  %v12164_v45 = vld [vmem:[%s15701_s1 + $0x740] sm:$0xff]  }
  0xb4   :  { %10892 = vmatprep.subr.bf16.mxu0 %v12119_v47  ;;  %v12166_v47 = vld [vmem:[%s15701_s1 + $0x700] sm:$0xff]  }
  0xb5   :  { %10913 = vmatpush3.bf16.msra.mxu1 %v12118_v46  ;;  %v665_v46 = vpack.c.bf16 %v200_v44, %v200_v44  ;;  %v12202_v44 = vld [vmem:[%s15701_s1 + $0x848] sm:$0xff]  }
  0xb6   :  { %10914 = vmatprep.subr.bf16.mxu1 %v12121_v48  ;;  %v12167_v48 = vld [vmem:[%s15701_s1 + $0x7c0] sm:$0xff]  }
  0xb7   :  { %10893 = vmatpush3.bf16.msra.mxu0 %v12120_v49  ;;  %v662_v49 = vpack.c.bf16 %v191_v35, %v191_v35  ;;  %v12197_v35 = vld [vmem:[%s15701_s1 + $0x840] sm:$0xff]  }
  0xb8   :  { %10894 = vmatprep.subr.bf16.mxu0 %v12123_v51  ;;  %v12168_v51 = vld [vmem:[%s15701_s1 + $0x780] sm:$0xff]  }
  0xb9   :  { %10915 = vmatpush3.bf16.msra.mxu1 %v12122_v50  ;;  %v664_v50 = vpack.c.bf16 %v198_v39, %v198_v39 }
  0xba   :  { %10916 = vmatprep.subr.bf16.mxu1 %v12125_v52  ;;  %v12169_v52 = vld [vmem:[%s15701_s1 + $0x748] sm:$0xff]  }
  0xbb   :  { %10895 = vmatpush3.bf16.msra.mxu0 %v12124_v53  ;;  %v12171_v53 = vld [vmem:[%s15701_s1 + $0x7c8] sm:$0xff]  }
  0xbc   :  { %10896 = vmatprep.subr.bf16.mxu0 %v12127_v58  ;;  %v12174_v58 = vld [vmem:[%s15701_s1 + $0x710] sm:$0xff]  }
  0xbd   :  { %10917 = vmatpush3.bf16.msra.mxu1 %v12126_v55  ;;  %v12172_v55 = vld [vmem:[%s15701_s1 + $0x788] sm:$0xff]  }
  0xbe   :  { %10918 = vmatprep.subr.bf16.mxu1 %v12129_v59  ;;  %v12176_v59 = vld [vmem:[%s15701_s1 + $0x790] sm:$0xff]  }
  0xbf   :  { %10897 = vmatpush3.bf16.msra.mxu0 %v12128_v62  ;;  %v12178_v62 = vld [vmem:[%s15701_s1 + $0x718] sm:$0xff]  }
  0xc0   :  { %10926 = vmatprep.subr.bf16.mxu0 %v12131_v2  ;;  %v12182_v2 = vld [vmem:[%s15701_s1 + $0x720] sm:$0xff]  }
  0xc1   :  { %10919 = vmatpush3.bf16.msra.mxu1 %v12130_v0  ;;  %v12181_v0 = vld [vmem:[%s15701_s1 + $0x760] sm:$0xff]  }
  0xc2   :  { %10948 = vmatprep.subr.bf16.mxu1 %v12134_v4  ;;  %7916 = vmatmul.mubr.bf16.vlgmr.msra.gmra.mrb[20].mxu0 %v658_v6  ;;  %v12185_v4 = vld [vmem:[%s15701_s1 + $0x768] sm:$0xff]  }
  0xc3   :  { %10927 = vmatpush3.bf16.msra.mxu0 %v12133_v5  ;;  %7995 = vmatprep.mubr.bf16.mxu0 %v663_v42  ;;  %v12187_v5 = vld [vmem:[%s15701_s1 + $0x7e8] sm:$0xff]  }
  0xc4   :  { %7956 = vmatmul.mubr.bf16.vlgmr.msra.gmra.mrb[20].mxu1 %v660_v7  ;;  %10928 = vmatprep.subr.bf16.mxu0 %v12136_v9  ;;  %v12186_v6 = vld [vmem:[%s15701_s1 + $0x728] sm:$0xff]   ;;  %v9814_v9 = vld [vmem:[%s15702_s2] ss:$0 sm:$0xff] }
  0xc5   :  { %10949 = vmatpush3.bf16.msra.mxu1 %v12135_v8  ;;  %8035 = vmatprep.mubr.bf16.mxu1 %v665_v46  ;;  %v12188_v7 = vld [vmem:[%s15701_s1 + $0x7a8] sm:$0xff]   ;;  %v12189_v8 = vld [vmem:[%s15701_s1 + $0x770] sm:$0xff]  }
  0xc6   :  { %10950 = vmatprep.subr.bf16.mxu1 %v12138_v10  ;;  %v12191_v10 = vld [vmem:[%s15701_s1 + $0x7f0] sm:$0xff]   ;;  %v12203_v46 = vld [vmem:[%s15701_s1 + $0x808] sm:$0xff]  }
  0xc7   :  { %10929 = vmatpush3.bf16.msra.mxu0 %v12137_v11 }
  0xc8   :  { %10930 = vmatprep.subr.bf16.mxu0 %v12140_v13  ;;  %v12190_v13 = vld [vmem:[%s15701_s1 + $0x730] sm:$0xff]  }
  0xc9   :  { %10951 = vmatpush3.bf16.msra.mxu1 %v12139_v12 }
  0xca   :  { %10952 = vmatprep.subr.bf16.mxu1 %v12142_v14  ;;  %v12192_v14 = vld [vmem:[%s15701_s1 + $0x7b0] sm:$0xff]  }
  0xcb   :  { %10931 = vmatpush3.bf16.msra.mxu0 %v12141_v15 }
  0xcc   :  { %10932 = vmatprep.subr.bf16.mxu0 %v12144_v17  ;;  %v12193_v17 = vld [vmem:[%s15701_s1 + $0x778] sm:$0xff]  }
  0xcd   :  { %10953 = vmatpush3.bf16.msra.mxu1 %v12143_v16 }
  0xce   :  { %10954 = vmatprep.subr.bf16.mxu1 %v12146_v18 }
  0xcf   :  { %10933 = vmatpush3.bf16.msra.mxu0 %v12145_v19 }
  0xd0   :  { %10934 = vmatprep.subr.bf16.mxu0 %v12148_v21  ;;  %v35_v21 = vld [vmem:[%s15700_s0 + $0x38] sm:$0xff] }
  0xd1   :  { %10955 = vmatpush3.bf16.msra.mxu1 %v12147_v20 }
  0xd2   :  { %10956 = vmatprep.subr.bf16.mxu1 %v12150_v22 }
  0xd3   :  { %10935 = vmatpush3.bf16.msra.mxu0 %v12149_v23  ;;  %v12195_v23 = vld [vmem:[%s15701_s1 + $0x7f8] sm:$0xff]  }
  0xd4   :  { %10936 = vmatprep.subr.bf16.mxu0 %v12152_v25  ;;  %v201_v25 = vcombine.high %v35_v21, %v35_v21 }
  0xd5   :  { %10957 = vmatpush3.bf16.msra.mxu1 %v12151_v24  ;;  %v208_v24 = vrot.slane %v35_v21, %v12976_v41 }
  0xd6   :  { %10958 = vmatprep.subr.bf16.mxu1 %v12154_v26 }
  0xd7   :  { %10937 = vmatpush3.bf16.msra.mxu0 %v12153_v27  ;;  %v666_v39 = vpack.c.bf16 %v208_v24, %v208_v24 }
  0xd8   :  { %10938 = vmatprep.subr.bf16.mxu0 %v12156_v29  ;;  %v216_v29 = vcombine.high %v208_v24, %v208_v24  ;;  %v12229_v24 = vld [vmem:[%s15701_s1 + $0x8b8] sm:$0xff]  }
  0xd9   :  { %10959 = vmatpush3.bf16.msra.mxu1 %v12155_v28  ;;  %v12194_v28 = vld [vmem:[%s15701_s1 + $0x738] sm:$0xff]  }
  0xda   :  { %10960 = vmatprep.subr.bf16.mxu1 %v12158_v30  ;;  %v215_v30 = vrot.slane %v201_v25, %v12976_v41 }
  0xdb   :  { %10939 = vmatpush3.bf16.msra.mxu0 %v12157_v31 }
  0xdc   :  { %10940 = vmatprep.subr.bf16.mxu0 %v12160_v34  ;;  %v667_v34 = vpack.c.bf16 %v216_v29, %v216_v29  ;;  %v217_v36 = vcombine.high %v215_v30, %v215_v30  ;;  %v668_v42 = vpack.c.bf16 %v215_v30, %v215_v30  ;;  %v12233_v29 = vld [vmem:[%s15701_s1 + $0x9c0] sm:$0xff]  }
  0xdd   :  { %10961 = vmatpush3.bf16.msra.mxu1 %v12159_v32 }
  0xde   :  { %10962 = vmatprep.subr.bf16.mxu1 %v12162_v37  ;;  %v12199_v37 = vld [vmem:[%s15701_s1 + $0x800] sm:$0xff]  }
  0xdf   :  { %10941 = vmatpush3.bf16.msra.mxu0 %v12161_v40  ;;  %v669_v40 = vpack.c.bf16 %v217_v36, %v217_v36  ;;  %v12236_v36 = vld [vmem:[%s15701_s1 + $0x908] sm:$0xff]  }
  0xe0   :  { %10970 = vmatprep.subr.bf16.mxu0 %v12164_v45  ;;  %v12204_v45 = vld [vmem:[%s15701_s1 + $0x8c8] sm:$0xff]  }
  0xe1   :  { %10963 = vmatpush3.bf16.msra.mxu1 %v12163_v43  ;;  %v12201_v43 = vld [vmem:[%s15701_s1 + $0x880] sm:$0xff]  }
  0xe2   :  { %10992 = vmatprep.subr.bf16.mxu1 %v12167_v48  ;;  %7996 = vmatmul.mubr.bf16.vlgmr.msra.gmra.mrb[24].mxu0 %v662_v49  ;;  %v12206_v48 = vld [vmem:[%s15701_s1 + $0x850] sm:$0xff]  }
  0xe3   :  { %10971 = vmatpush3.bf16.msra.mxu0 %v12166_v47  ;;  %8075 = vmatprep.mubr.bf16.mxu0 %v667_v34  ;;  %v12205_v47 = vld [vmem:[%s15701_s1 + $0x888] sm:$0xff]   ;;  %v12208_v49 = vld [vmem:[%s15701_s1 + $0x8d0] sm:$0xff]  }
  0xe4   :  { %8036 = vmatmul.mubr.bf16.vlgmr.msra.gmra.mrb[24].mxu1 %v664_v50  ;;  %10972 = vmatprep.subr.bf16.mxu0 %v12169_v52  ;;  %v12207_v50 = vld [vmem:[%s15701_s1 + $0x810] sm:$0xff]   ;;  %v12210_v52 = vld [vmem:[%s15701_s1 + $0x858] sm:$0xff]   ;;  %v12235_v34 = vld [vmem:[%s15701_s1 + $0x948] sm:$0xff]  }
  0xe5   :  { %10993 = vmatpush3.bf16.msra.mxu1 %v12168_v51  ;;  %8115 = vmatprep.mubr.bf16.mxu1 %v669_v40  ;;  %v12209_v51 = vld [vmem:[%s15701_s1 + $0x890] sm:$0xff]  }
  0xe6   :  { %10994 = vmatprep.subr.bf16.mxu1 %v12171_v53  ;;  %v12212_v53 = vld [vmem:[%s15701_s1 + $0x8d8] sm:$0xff]   ;;  %v12240_v40 = vld [vmem:[%s15701_s1 + $0x910] sm:$0xff]  }
  0xe7   :  { %10973 = vmatpush3.bf16.msra.mxu0 %v12170_v54  ;;  %v12211_v54 = vld [vmem:[%s15701_s1 + $0x818] sm:$0xff]  }
  0xe8   :  { %10974 = vmatprep.subr.bf16.mxu0 %v12173_v56  ;;  %v12214_v56 = vld [vmem:[%s15701_s1 + $0x860] sm:$0xff]  }
  0xe9   :  { %10995 = vmatpush3.bf16.msra.mxu1 %v12172_v55  ;;  %v12213_v55 = vld [vmem:[%s15701_s1 + $0x898] sm:$0xff]  }
  0xea   :  { %10996 = vmatprep.subr.bf16.mxu1 %v12175_v57  ;;  %v12216_v57 = vld [vmem:[%s15701_s1 + $0x8e0] sm:$0xff]  }
  0xeb   :  { %10975 = vmatpush3.bf16.msra.mxu0 %v12174_v58  ;;  %v12215_v58 = vld [vmem:[%s15701_s1 + $0x820] sm:$0xff]  }
  0xec   :  { %10976 = vmatprep.subr.bf16.mxu0 %v12177_v60  ;;  %v12218_v60 = vld [vmem:[%s15701_s1 + $0x868] sm:$0xff]  }
  0xed   :  { %10997 = vmatpush3.bf16.msra.mxu1 %v12176_v59  ;;  %v12217_v59 = vld [vmem:[%s15701_s1 + $0x8a0] sm:$0xff]  }
  0xee   :  { %10998 = vmatprep.subr.bf16.mxu1 %v12179_v61  ;;  %v12220_v61 = vld [vmem:[%s15701_s1 + $0x8e8] sm:$0xff]  }
  0xef   :  { %10977 = vmatpush3.bf16.msra.mxu0 %v12178_v62  ;;  %v12219_v62 = vld [vmem:[%s15701_s1 + $0x828] sm:$0xff]  }
  0xf0   :  { %10978 = vmatprep.subr.bf16.mxu0 %v12181_v0  ;;  %v12222_v0 = vld [vmem:[%s15701_s1 + $0x870] sm:$0xff]  }
  0xf1   :  { %10999 = vmatpush3.bf16.msra.mxu1 %v12180_v63  ;;  %v12221_v63 = vld [vmem:[%s15701_s1 + $0x8a8] sm:$0xff]  }
  0xf2   :  { %11000 = vmatprep.subr.bf16.mxu1 %v12183_v1  ;;  %v12224_v1 = vld [vmem:[%s15701_s1 + $0x8f0] sm:$0xff]  }
  0xf3   :  { %10979 = vmatpush3.bf16.msra.mxu0 %v12182_v2 }
  0xf4   :  { %10980 = vmatprep.subr.bf16.mxu0 %v12185_v4  ;;  %v12223_v4 = vld [vmem:[%s15701_s1 + $0x830] sm:$0xff]  }
  0xf5   :  { %11001 = vmatpush3.bf16.msra.mxu1 %v12184_v3  ;;  %v10678_v11 = vpop.f32.mrb[0].mxu0 }
  0xf6   :  { %11002 = vmatprep.subr.bf16.mxu1 %v12187_v5  ;;  %v10679_v15 = vpop.f32.mrb[1].mxu0  ;;  %v12225_v5 = vld [vmem:[%s15701_s1 + $0x8b0] sm:$0xff]  }
  0xf7   :  { %v10700_v12 = vpop.f32.mrb[0].mxu1  ;;  %v10680_v18 = vadd.f32 %v10679_v15, %v10678_v11  ;;  %v10681_v19 = vpop.f32.mrb[2].mxu0  ;;  %10981 = vmatpush3.bf16.msra.mxu0 %v12186_v6  ;;  %v12226_v11 = vld [vmem:[%s15701_s1 + $0x878] sm:$0xff]  }
  0xf8   :  { %v10701_v16 = vpop.f32.mrb[1].mxu1  ;;  %v10682_v22 = vpop.f32.mrb[3].mxu0  ;;  %10982 = vmatprep.subr.bf16.mxu0 %v12189_v8  ;;  %v12228_v15 = vld [vmem:[%s15701_s1 + $0x8f8] sm:$0xff]  }
  0xf9   :  { %v10702_v20 = vadd.f32 %v10701_v16, %v10700_v12  ;;  %11003 = vmatpush3.bf16.msra.mxu1 %v12188_v7  ;;  %v7518_v26 = vadd.f32 %v10680_v18, %v9814_v9  ;;  %v10703_v27 = vpop.f32.mrb[2].mxu1  ;;  %v36_v12 = vld [vmem:[%s15700_s0 + $0x40] sm:$0xff] }
  0xfa   :  { %11004 = vmatprep.subr.bf16.mxu1 %v12191_v10  ;;  %v10704_v31 = vpop.f32.mrb[3].mxu1  ;;  %v225_v16 = vrot.slane %v36_v12, %v12976_v41 }
  0xfb   :  { %v13681_v32 = vadd.f32 %v10702_v20, %v7518_v26  ;;  %10983 = vmatpush3.bf16.msra.mxu0 %v12190_v13  ;;  %v12227_v20 = vld [vmem:[%s15701_s1 + $0x838] sm:$0xff]   ;;  %v12230_v26 = vld [vmem:[%s15701_s1 + $0x940] sm:$0xff]  }
  0xfc   :  { %10984 = vmatprep.subr.bf16.mxu0 %v12193_v17  ;;  %v218_v17 = vcombine.high %v36_v12, %v36_v12  ;;  %v233_v21 = vcombine.high %v225_v16, %v225_v16  ;;  %v670_v30 = vpack.c.bf16 %v225_v16, %v225_v16 }
  0xfd   :  { %11005 = vmatpush3.bf16.msra.mxu1 %v12192_v14 }
  0xfe   :  { %11006 = vmatprep.subr.bf16.mxu1 %v12195_v23  ;;  %v232_v22 = vrot.slane %v218_v17, %v12976_v41  ;;  %v671_v25 = vpack.c.bf16 %v233_v21, %v233_v21  ;;  %v12265_v21 = vld [vmem:[%s15701_s1 + $0xa00] sm:$0xff]  }
  0xff   :  { %10985 = vmatpush3.bf16.msra.mxu0 %v12194_v28  ;;  %v12232_v28 = vld [vmem:[%s15701_s1 + $0x900] sm:$0xff]  }
 0x100   :  { %11014 = vmatprep.subr.bf16.mxu0 %v12197_v35  ;;  %v234_v27 = vcombine.high %v232_v22, %v232_v22  ;;  %v12237_v35 = vld [vmem:[%s15701_s1 + $0x9c8] sm:$0xff]  }
 0x101   :  { %11007 = vmatpush3.bf16.msra.mxu1 %v12196_v33  ;;  %v12234_v33 = vld [vmem:[%s15701_s1 + $0x980] sm:$0xff]  }
 0x102   :  { %11036 = vmatprep.subr.bf16.mxu1 %v12200_v38  ;;  %8076 = vmatmul.mubr.bf16.vlgmr.msra.gmra.mrb[28].mxu0 %v666_v39  ;;  %v673_v31 = vpack.c.bf16 %v234_v27, %v234_v27  ;;  %v12239_v38 = vld [vmem:[%s15701_s1 + $0x950] sm:$0xff]   ;;  %v12269_v27 = vld [vmem:[%s15701_s1 + $0xa08] sm:$0xff]  }
 0x103   :  { %11015 = vmatpush3.bf16.msra.mxu0 %v12199_v37  ;;  %8155 = vmatprep.mubr.bf16.mxu0 %v671_v25  ;;  %v12238_v37 = vld [vmem:[%s15701_s1 + $0x988] sm:$0xff]   ;;  %v12241_v39 = vld [vmem:[%s15701_s1 + $0x9d0] sm:$0xff]  }
 0x104   :  { %8116 = vmatmul.mubr.bf16.vlgmr.msra.gmra.mrb[28].mxu1 %v668_v42  ;;  %11016 = vmatprep.subr.bf16.mxu0 %v12202_v44  ;;  %v12242_v42 = vld [vmem:[%s15701_s1 + $0x990] sm:$0xff]   ;;  %v12245_v44 = vld [vmem:[%s15701_s1 + $0x9d8] sm:$0xff]   ;;  %v12268_v25 = vld [vmem:[%s15701_s1 + $0xa48] sm:$0xff]  }
 0x105   :  { %11037 = vmatpush3.bf16.msra.mxu1 %v12201_v43  ;;  %8195 = vmatprep.mubr.bf16.mxu1 %v673_v31  ;;  %v12243_v43 = vld [vmem:[%s15701_s1 + $0x958] sm:$0xff]   ;;  %v12273_v31 = vld [vmem:[%s15701_s1 + $0xa10] sm:$0xff]  }
 0x106   :  { %11038 = vmatprep.subr.bf16.mxu1 %v12204_v45  ;;  %v12244_v45 = vld [vmem:[%s15701_s1 + $0x918] sm:$0xff]  }
 0x107   :  { %11017 = vmatpush3.bf16.msra.mxu0 %v12203_v46  ;;  %v12246_v46 = vld [vmem:[%s15701_s1 + $0x998] sm:$0xff]  }
 0x108   :  { %11018 = vmatprep.subr.bf16.mxu0 %v12206_v48  ;;  %v12249_v48 = vld [vmem:[%s15701_s1 + $0x9e0] sm:$0xff]  }
 0x109   :  { %11039 = vmatpush3.bf16.msra.mxu1 %v12205_v47  ;;  %v12247_v47 = vld [vmem:[%s15701_s1 + $0x960] sm:$0xff]  }
 0x10a   :  { %11040 = vmatprep.subr.bf16.mxu1 %v12208_v49  ;;  %v12248_v49 = vld [vmem:[%s15701_s1 + $0x920] sm:$0xff]  }
 0x10b   :  { %11019 = vmatpush3.bf16.msra.mxu0 %v12207_v50  ;;  %v12250_v50 = vld [vmem:[%s15701_s1 + $0x9a0] sm:$0xff]  }
 0x10c   :  { %11020 = vmatprep.subr.bf16.mxu0 %v12210_v52  ;;  %v12253_v52 = vld [vmem:[%s15701_s1 + $0x9e8] sm:$0xff]  }
 0x10d   :  { %11041 = vmatpush3.bf16.msra.mxu1 %v12209_v51  ;;  %v12251_v51 = vld [vmem:[%s15701_s1 + $0x968] sm:$0xff]  }
 0x10e   :  { %11042 = vmatprep.subr.bf16.mxu1 %v12212_v53  ;;  %v12252_v53 = vld [vmem:[%s15701_s1 + $0x928] sm:$0xff]  }
 0x10f   :  { %11021 = vmatpush3.bf16.msra.mxu0 %v12211_v54  ;;  %v12254_v54 = vld [vmem:[%s15701_s1 + $0x9a8] sm:$0xff]  }
 0x110   :  { %11022 = vmatprep.subr.bf16.mxu0 %v12214_v56  ;;  %v12257_v56 = vld [vmem:[%s15701_s1 + $0x9f0] sm:$0xff]  }
 0x111   :  { %11043 = vmatpush3.bf16.msra.mxu1 %v12213_v55  ;;  %v12255_v55 = vld [vmem:[%s15701_s1 + $0x970] sm:$0xff]  }
 0x112   :  { %11044 = vmatprep.subr.bf16.mxu1 %v12216_v57 }
 0x113   :  { %11023 = vmatpush3.bf16.msra.mxu0 %v12215_v58 }
 0x114   :  { %11024 = vmatprep.subr.bf16.mxu0 %v12218_v60 }
 0x115   :  { %11045 = vmatpush3.bf16.msra.mxu1 %v12217_v59  ;;  %v10722_v2 = vpop.f32.mrb[4].mxu0  ;;  %v12256_v59 = vld [vmem:[%s15701_s1 + $0x930] sm:$0xff]  }
 0x116   :  { %11046 = vmatprep.subr.bf16.mxu1 %v12220_v61  ;;  %v10723_v6 = vpop.f32.mrb[5].mxu0 }
 0x117   :  { %v10744_v3 = vpop.f32.mrb[4].mxu1  ;;  %v10724_v8 = vadd.f32 %v10723_v6, %v10722_v2  ;;  %v10725_v9 = vpop.f32.mrb[6].mxu0  ;;  %11025 = vmatpush3.bf16.msra.mxu0 %v12219_v62  ;;  %v12258_v62 = vld [vmem:[%s15701_s1 + $0x9b0] sm:$0xff]  }
 0x118   :  { %v10745_v7 = vpop.f32.mrb[5].mxu1  ;;  %v10726_v14 = vpop.f32.mrb[7].mxu0  ;;  %11026 = vmatprep.subr.bf16.mxu0 %v12222_v0 }
 0x119   :  { %v10746_v10 = vadd.f32 %v10745_v7, %v10744_v3  ;;  %11047 = vmatpush3.bf16.msra.mxu1 %v12221_v63  ;;  %v10747_v13 = vpop.f32.mrb[6].mxu1  ;;  %v7598_v18 = vadd.f32 %v10724_v8, %v13681_v32  ;;  %v672_v32 = vpack.c.bf16 %v232_v22, %v232_v22  ;;  %v12259_v63 = vld [vmem:[%s15701_s1 + $0x978] sm:$0xff]  }
 0x11a   :  { %11048 = vmatprep.subr.bf16.mxu1 %v12224_v1  ;;  %v10748_v19 = vpop.f32.mrb[7].mxu1  ;;  %v12261_v3 = vld [vmem:[%s15701_s1 + $0x9f8] sm:$0xff]  }
 0x11b   :  { %v13785_v23 = vadd.f32 %v10746_v10, %v7598_v18  ;;  %11027 = vmatpush3.bf16.msra.mxu0 %v12223_v4  ;;  %v12260_v10 = vld [vmem:[%s15701_s1 + $0x938] sm:$0xff]   ;;  %v12266_v18 = vld [vmem:[%s15701_s1 + $0xac0] sm:$0xff]  }
 0x11c   :  { %11028 = vmatprep.subr.bf16.mxu0 %v12226_v11  ;;  %v12262_v14 = vld [vmem:[%s15701_s1 + $0x9b8] sm:$0xff]  }
 0x11d   :  { %11049 = vmatpush3.bf16.msra.mxu1 %v12225_v5  ;;  %v37_v5 = vld [vmem:[%s15700_s0 + $0x48] sm:$0xff] }
 0x11e   :  { %11050 = vmatprep.subr.bf16.mxu1 %v12228_v15  ;;  %v242_v7 = vrot.slane %v37_v5, %v12976_v41  ;;  %v235_v8 = vcombine.high %v37_v5, %v37_v5  ;;  %v12263_v15 = vld [vmem:[%s15701_s1 + $0xa40] sm:$0xff]  }
 0x11f   :  { %11029 = vmatpush3.bf16.msra.mxu0 %v12227_v20 }
 0x120   :  { %11058 = vmatprep.subr.bf16.mxu0 %v12230_v26  ;;  %v250_v13 = vcombine.high %v242_v7, %v242_v7  ;;  %v249_v16 = vrot.slane %v235_v8, %v12976_v41  ;;  %v674_v19 = vpack.c.bf16 %v242_v7, %v242_v7  ;;  %v12270_v26 = vld [vmem:[%s15701_s1 + $0xac8] sm:$0xff]   ;;  %v12299_v8 = vld [vmem:[%s15701_s1 + $0xbc0] sm:$0xff]  }
 0x121   :  { %11051 = vmatpush3.bf16.msra.mxu1 %v12229_v24 }
 0x122   :  { %11080 = vmatprep.subr.bf16.mxu1 %v12233_v29  ;;  %8156 = vmatmul.mubr.bf16.vlgmr.msra.gmra.mrb[32].mxu0 %v670_v30  ;;  %v675_v17 = vpack.c.bf16 %v250_v13, %v250_v13  ;;  %v251_v20 = vcombine.high %v249_v16, %v249_v16  ;;  %v676_v22 = vpack.c.bf16 %v249_v16, %v249_v16  ;;  %v12272_v29 = vld [vmem:[%s15701_s1 + $0xa50] sm:$0xff]   ;;  %v12301_v16 = vld [vmem:[%s15701_s1 + $0xb48] sm:$0xff]  }
 0x123   :  { %11059 = vmatpush3.bf16.msra.mxu0 %v12232_v28  ;;  %v12271_v28 = vld [vmem:[%s15701_s1 + $0xa88] sm:$0xff]   ;;  %v12274_v30 = vld [vmem:[%s15701_s1 + $0xad0] sm:$0xff]  }
 0x124   :  { %8196 = vmatmul.mubr.bf16.vlgmr.msra.gmra.mrb[32].mxu1 %v672_v32  ;;  %11060 = vmatprep.subr.bf16.mxu0 %v12235_v34  ;;  %v677_v24 = vpack.c.bf16 %v251_v20, %v251_v20  ;;  %v12275_v32 = vld [vmem:[%s15701_s1 + $0xa90] sm:$0xff]   ;;  %v12278_v34 = vld [vmem:[%s15701_s1 + $0xad8] sm:$0xff]  }
 0x125   :  { %11081 = vmatpush3.bf16.msra.mxu1 %v12234_v33  ;;  %8235 = vmatprep.mubr.bf16.mxu0 %v675_v17  ;;  %v12276_v33 = vld [vmem:[%s15701_s1 + $0xa58] sm:$0xff]   ;;  %v12303_v17 = vld [vmem:[%s15701_s1 + $0xbc8] sm:$0xff]   ;;  %v12305_v20 = vld [vmem:[%s15701_s1 + $0xb50] sm:$0xff]  }
 0x126   :  { %11082 = vmatprep.subr.bf16.mxu1 %v12237_v35  ;;  %8275 = vmatprep.mubr.bf16.mxu1 %v677_v24  ;;  %v12277_v35 = vld [vmem:[%s15701_s1 + $0xa18] sm:$0xff]  }
 0x127   :  { %11061 = vmatpush3.bf16.msra.mxu0 %v12236_v36  ;;  %v12279_v36 = vld [vmem:[%s15701_s1 + $0xa98] sm:$0xff]  }
 0x128   :  { %11062 = vmatprep.subr.bf16.mxu0 %v12239_v38  ;;  %v12282_v38 = vld [vmem:[%s15701_s1 + $0xae0] sm:$0xff]   ;;  %v12309_v24 = vld [vmem:[%s15701_s1 + $0xb58] sm:$0xff]  }
 0x129   :  { %11083 = vmatpush3.bf16.msra.mxu1 %v12238_v37  ;;  %v12280_v37 = vld [vmem:[%s15701_s1 + $0xa60] sm:$0xff]  }
 0x12a   :  { %11084 = vmatprep.subr.bf16.mxu1 %v12241_v39  ;;  %v12281_v39 = vld [vmem:[%s15701_s1 + $0xa20] sm:$0xff]  }
 0x12b   :  { %11063 = vmatpush3.bf16.msra.mxu0 %v12240_v40  ;;  %v12283_v40 = vld [vmem:[%s15701_s1 + $0xaa0] sm:$0xff]  }
 0x12c   :  { %11064 = vmatprep.subr.bf16.mxu0 %v12243_v43  ;;  %v12286_v43 = vld [vmem:[%s15701_s1 + $0xae8] sm:$0xff]  }
 0x12d   :  { %11085 = vmatpush3.bf16.msra.mxu1 %v12242_v42  ;;  %v12284_v42 = vld [vmem:[%s15701_s1 + $0xa68] sm:$0xff]  }
 0x12e   :  { %11086 = vmatprep.subr.bf16.mxu1 %v12245_v44  ;;  %v12285_v44 = vld [vmem:[%s15701_s1 + $0xa28] sm:$0xff]  }
 0x12f   :  { %11065 = vmatpush3.bf16.msra.mxu0 %v12244_v45  ;;  %v12287_v45 = vld [vmem:[%s15701_s1 + $0xaa8] sm:$0xff]  }
 0x130   :  { %11066 = vmatprep.subr.bf16.mxu0 %v12247_v47 }
 0x131   :  { %11087 = vmatpush3.bf16.msra.mxu1 %v12246_v46  ;;  %v12288_v46 = vld [vmem:[%s15701_s1 + $0xa70] sm:$0xff]  }
 0x132   :  { %11088 = vmatprep.subr.bf16.mxu1 %v12249_v48 }
 0x133   :  { %11067 = vmatpush3.bf16.msra.mxu0 %v12248_v49  ;;  %v12289_v49 = vld [vmem:[%s15701_s1 + $0xa30] sm:$0xff]  }
 0x134   :  { %11068 = vmatprep.subr.bf16.mxu0 %v12251_v51 }
 0x135   :  { %11089 = vmatpush3.bf16.msra.mxu1 %v12250_v50  ;;  %v10766_v57 = vpop.f32.mrb[8].mxu0  ;;  %v12290_v50 = vld [vmem:[%s15701_s1 + $0xaf0] sm:$0xff]  }
 0x136   :  { %11090 = vmatprep.subr.bf16.mxu1 %v12253_v52  ;;  %v10767_v60 = vpop.f32.mrb[9].mxu0 }
 0x137   :  { %v10788_v58 = vpop.f32.mrb[8].mxu1  ;;  %v10768_v0 = vadd.f32 %v10767_v60, %v10766_v57  ;;  %v10769_v1 = vpop.f32.mrb[10].mxu0  ;;  %11069 = vmatpush3.bf16.msra.mxu0 %v12252_v53  ;;  %v12291_v53 = vld [vmem:[%s15701_s1 + $0xab0] sm:$0xff]   ;;  %v12292_v57 = vld [vmem:[%s15701_s1 + $0xa78] sm:$0xff]  }
 0x138   :  { %v10789_v61 = vpop.f32.mrb[9].mxu1  ;;  %v10770_v4 = vpop.f32.mrb[11].mxu0  ;;  %11070 = vmatprep.subr.bf16.mxu0 %v12255_v55 }
 0x139   :  { %v10790_v2 = vadd.f32 %v10789_v61, %v10788_v58  ;;  %11091 = vmatpush3.bf16.msra.mxu1 %v12254_v54  ;;  %v7678_v6 = vadd.f32 %v10768_v0, %v13785_v23  ;;  %v10791_v9 = vpop.f32.mrb[10].mxu1  ;;  %v12267_v23 = vld [vmem:[%s15701_s1 + $0xa80] sm:$0xff]   ;;  %v38_v61 = vld [vmem:[%s15700_s0 + $0x50] sm:$0xff]  ;;  %v12295_v4 = vld [vmem:[%s15701_s1 + $0xab8] sm:$0xff]  }
 0x13a   :  { %11092 = vmatprep.subr.bf16.mxu1 %v12257_v56  ;;  %v10792_v11 = vpop.f32.mrb[11].mxu1  ;;  %v259_v0 = vrot.slane %v38_v61, %v12976_v41  ;;  %v252_v1 = vcombine.high %v38_v61, %v38_v61  ;;  %v12329_v61 = vld [vmem:[%s15701_s1 + $0xc40] sm:$0xff]  }
 0x13b   :  { %v13888_v12 = vadd.f32 %v10790_v2, %v7678_v6  ;;  %11071 = vmatpush3.bf16.msra.mxu0 %v12256_v59  ;;  %v12294_v59 = vld [vmem:[%s15701_s1 + $0xaf8] sm:$0xff]   ;;  %v12296_v6 = vld [vmem:[%s15701_s1 + $0xb40] sm:$0xff]  }
 0x13c   :  { %11072 = vmatprep.subr.bf16.mxu0 %v12259_v63  ;;  %v12293_v63 = vld [vmem:[%s15701_s1 + $0xa38] sm:$0xff]   ;;  %v267_v5 = vcombine.high %v259_v0, %v259_v0  ;;  %v266_v7 = vrot.slane %v252_v1, %v12976_v41 }
 0x13d   :  { %11093 = vmatpush3.bf16.msra.mxu1 %v12258_v62 }
 0x13e   :  { %11094 = vmatprep.subr.bf16.mxu1 %v12261_v3  ;;  %v679_v9 = vpack.c.bf16 %v267_v5, %v267_v5  ;;  %v268_v11 = vcombine.high %v266_v7, %v266_v7  ;;  %v680_v13 = vpack.c.bf16 %v266_v7, %v266_v7  ;;  %v12333_v5 = vld [vmem:[%s15701_s1 + $0xc80] sm:$0xff]   ;;  %v12334_v7 = vld [vmem:[%s15701_s1 + $0xc48] sm:$0xff]  }
 0x13f   :  { %11073 = vmatpush3.bf16.msra.mxu0 %v12260_v10  ;;  %v678_v10 = vpack.c.bf16 %v259_v0, %v259_v0 }
 0x140   :  { %11102 = vmatprep.subr.bf16.mxu0 %v12263_v15  ;;  %v681_v15 = vpack.c.bf16 %v268_v11, %v268_v11  ;;  %v12338_v11 = vld [vmem:[%s15701_s1 + $0xc50] sm:$0xff]  }
 0x141   :  { %11095 = vmatpush3.bf16.msra.mxu1 %v12262_v14  ;;  %v12300_v14 = vld [vmem:[%s15701_s1 + $0xb80] sm:$0xff]  }
 0x142   :  { %11124 = vmatprep.subr.bf16.mxu1 %v12266_v18  ;;  %8236 = vmatmul.mubr.bf16.vlgmr.msra.gmra.mrb[36].mxu0 %v674_v19  ;;  %v12302_v18 = vld [vmem:[%s15701_s1 + $0xb08] sm:$0xff]  }
 0x143   :  { %11103 = vmatpush3.bf16.msra.mxu0 %v12265_v21  ;;  %8315 = vmatprep.mubr.bf16.mxu0 %v679_v9  ;;  %v12304_v19 = vld [vmem:[%s15701_s1 + $0xb88] sm:$0xff]   ;;  %v12307_v21 = vld [vmem:[%s15701_s1 + $0xbd0] sm:$0xff]  }
 0x144   :  { %8276 = vmatmul.mubr.bf16.vlgmr.msra.gmra.mrb[36].mxu1 %v676_v22  ;;  %11104 = vmatprep.subr.bf16.mxu0 %v12268_v25  ;;  %v12306_v22 = vld [vmem:[%s15701_s1 + $0xb10] sm:$0xff]   ;;  %v12311_v25 = vld [vmem:[%s15701_s1 + $0xbd8] sm:$0xff]   ;;  %v12335_v9 = vld [vmem:[%s15701_s1 + $0xc08] sm:$0xff]  }
 0x145   :  { %11125 = vmatpush3.bf16.msra.mxu1 %v12267_v23  ;;  %8355 = vmatprep.mubr.bf16.mxu1 %v681_v15  ;;  %v12308_v23 = vld [vmem:[%s15701_s1 + $0xb90] sm:$0xff]   ;;  %v12342_v15 = vld [vmem:[%s15701_s1 + $0xc58] sm:$0xff]  }
 0x146   :  { %11126 = vmatprep.subr.bf16.mxu1 %v12270_v26  ;;  %v12310_v26 = vld [vmem:[%s15701_s1 + $0xb18] sm:$0xff]  }
 0x147   :  { %11105 = vmatpush3.bf16.msra.mxu0 %v12269_v27  ;;  %v12312_v27 = vld [vmem:[%s15701_s1 + $0xb98] sm:$0xff]  }
 0x148   :  { %11106 = vmatprep.subr.bf16.mxu0 %v12272_v29  ;;  %v12315_v29 = vld [vmem:[%s15701_s1 + $0xbe0] sm:$0xff]  }
 0x149   :  { %11127 = vmatpush3.bf16.msra.mxu1 %v12271_v28  ;;  %v12313_v28 = vld [vmem:[%s15701_s1 + $0xb60] sm:$0xff]  }
 0x14a   :  { %11128 = vmatprep.subr.bf16.mxu1 %v12274_v30  ;;  %v12314_v30 = vld [vmem:[%s15701_s1 + $0xb20] sm:$0xff]  }
 0x14b   :  { %11107 = vmatpush3.bf16.msra.mxu0 %v12273_v31  ;;  %v12316_v31 = vld [vmem:[%s15701_s1 + $0xba0] sm:$0xff]  }
 0x14c   :  { %11108 = vmatprep.subr.bf16.mxu0 %v12276_v33  ;;  %v12319_v33 = vld [vmem:[%s15701_s1 + $0xbe8] sm:$0xff]  }
 0x14d   :  { %11129 = vmatpush3.bf16.msra.mxu1 %v12275_v32  ;;  %v12317_v32 = vld [vmem:[%s15701_s1 + $0xb68] sm:$0xff]  }
 0x14e   :  { %11130 = vmatprep.subr.bf16.mxu1 %v12278_v34  ;;  %v12318_v34 = vld [vmem:[%s15701_s1 + $0xb28] sm:$0xff]  }
 0x14f   :  { %11109 = vmatpush3.bf16.msra.mxu0 %v12277_v35  ;;  %v12320_v35 = vld [vmem:[%s15701_s1 + $0xba8] sm:$0xff]  }
 0x150   :  { %11110 = vmatprep.subr.bf16.mxu0 %v12280_v37 }
 0x151   :  { %11131 = vmatpush3.bf16.msra.mxu1 %v12279_v36  ;;  %v12321_v36 = vld [vmem:[%s15701_s1 + $0xb70] sm:$0xff]  }
 0x152   :  { %11132 = vmatprep.subr.bf16.mxu1 %v12282_v38 }
 0x153   :  { %11111 = vmatpush3.bf16.msra.mxu0 %v12281_v39  ;;  %v12322_v39 = vld [vmem:[%s15701_s1 + $0xb30] sm:$0xff]  }
 0x154   :  { %11112 = vmatprep.subr.bf16.mxu0 %v12284_v42 }
 0x155   :  { %11133 = vmatpush3.bf16.msra.mxu1 %v12283_v40  ;;  %v10810_v47 = vpop.f32.mrb[12].mxu0  ;;  %v12323_v40 = vld [vmem:[%s15701_s1 + $0xbf0] sm:$0xff]  }
 0x156   :  { %11134 = vmatprep.subr.bf16.mxu1 %v12286_v43  ;;  %v10811_v51 = vpop.f32.mrb[13].mxu0 }
 0x157   :  { %v10832_v48 = vpop.f32.mrb[12].mxu1  ;;  %v10812_v54 = vadd.f32 %v10811_v51, %v10810_v47  ;;  %v10813_v55 = vpop.f32.mrb[14].mxu0  ;;  %11113 = vmatpush3.bf16.msra.mxu0 %v12285_v44  ;;  %v12324_v47 = vld [vmem:[%s15701_s1 + $0xbb0] sm:$0xff]   ;;  %v12327_v51 = vld [vmem:[%s15701_s1 + $0xbf8] sm:$0xff]  }
 0x158   :  { %v10833_v52 = vpop.f32.mrb[13].mxu1  ;;  %v10814_v58 = vpop.f32.mrb[15].mxu0  ;;  %11114 = vmatprep.subr.bf16.mxu0 %v12288_v46 }
 0x159   :  { %v10834_v56 = vadd.f32 %v10833_v52, %v10832_v48  ;;  %11135 = vmatpush3.bf16.msra.mxu1 %v12287_v45  ;;  %v7758_v60 = vadd.f32 %v10812_v54, %v13888_v12  ;;  %v10835_v62 = vpop.f32.mrb[14].mxu1  ;;  %v12298_v12 = vld [vmem:[%s15701_s1 + $0xb00] sm:$0xff]   ;;  %v39_v52 = vld [vmem:[%s15700_s0 + $0x58] sm:$0xff] }
 0x15a   :  { %11136 = vmatprep.subr.bf16.mxu1 %v12290_v50  ;;  %v10836_v2 = vpop.f32.mrb[15].mxu1  ;;  %v12326_v54 = vld [vmem:[%s15701_s1 + $0xb38] sm:$0xff]   ;;  %v276_v55 = vrot.slane %v39_v52, %v12976_v41 }
 0x15b   :  { %v13992_v3 = vadd.f32 %v10834_v56, %v7758_v60  ;;  %11115 = vmatpush3.bf16.msra.mxu0 %v12289_v49  ;;  %v12325_v49 = vld [vmem:[%s15701_s1 + $0xb78] sm:$0xff]   ;;  %v269_v56 = vcombine.high %v39_v52, %v39_v52 }
 0x15c   :  { %11116 = vmatprep.subr.bf16.mxu0 %v12292_v57  ;;  %v284_v60 = vcombine.high %v276_v55, %v276_v55  ;;  %v682_v1 = vpack.c.bf16 %v276_v55, %v276_v55 }
 0x15d   :  { %11137 = vmatpush3.bf16.msra.mxu1 %v12291_v53  ;;  %v283_v62 = vrot.slane %v269_v56, %v12976_v41  ;;  %v12365_v56 = vld [vmem:[%s15701_s1 + $0xdc0] sm:$0xff]  }
 0x15e   :  { %11138 = vmatprep.subr.bf16.mxu1 %v12294_v59  ;;  %v12328_v59 = vld [vmem:[%s15701_s1 + $0xbb8] sm:$0xff]   ;;  %v683_v0 = vpack.c.bf16 %v284_v60, %v284_v60 }
 0x15f   :  { %11117 = vmatpush3.bf16.msra.mxu0 %v12293_v63  ;;  %v12332_v63 = vld [vmem:[%s15701_s1 + $0xcc0] sm:$0xff]   ;;  %v285_v2 = vcombine.high %v283_v62, %v283_v62 }
 0x160   :  { %11146 = vmatprep.subr.bf16.mxu0 %v12296_v6 }
 0x161   :  { %11139 = vmatpush3.bf16.msra.mxu1 %v12295_v4  ;;  %v684_v4 = vpack.c.bf16 %v283_v62, %v283_v62  ;;  %v685_v6 = vpack.c.bf16 %v285_v2, %v285_v2  ;;  %v12371_v2 = vld [vmem:[%s15701_s1 + $0xd50] sm:$0xff]  }
 0x162   :  { %11168 = vmatprep.subr.bf16.mxu1 %v12299_v8  ;;  %8316 = vmatmul.mubr.bf16.vlgmr.msra.gmra.mrb[40].mxu0 %v678_v10  ;;  %v12336_v8 = vld [vmem:[%s15701_s1 + $0xcc8] sm:$0xff]  }
 0x163   :  { %11147 = vmatpush3.bf16.msra.mxu0 %v12298_v12  ;;  %8395 = vmatprep.mubr.bf16.mxu0 %v683_v0  ;;  %v12337_v10 = vld [vmem:[%s15701_s1 + $0xc88] sm:$0xff]   ;;  %v12340_v12 = vld [vmem:[%s15701_s1 + $0xcd0] sm:$0xff]  }
 0x164   :  { %8356 = vmatmul.mubr.bf16.vlgmr.msra.gmra.mrb[40].mxu1 %v680_v13  ;;  %11148 = vmatprep.subr.bf16.mxu0 %v12301_v16  ;;  %v12339_v13 = vld [vmem:[%s15701_s1 + $0xc10] sm:$0xff]   ;;  %v12344_v16 = vld [vmem:[%s15701_s1 + $0xcd8] sm:$0xff]   ;;  %v12369_v0 = vld [vmem:[%s15701_s1 + $0xdc8] sm:$0xff]  }
 0x165   :  { %11169 = vmatpush3.bf16.msra.mxu1 %v12300_v14  ;;  %8435 = vmatprep.mubr.bf16.mxu1 %v685_v6  ;;  %v12341_v14 = vld [vmem:[%s15701_s1 + $0xc90] sm:$0xff]   ;;  %v12375_v6 = vld [vmem:[%s15701_s1 + $0xd58] sm:$0xff]  }
 0x166   :  { %11170 = vmatprep.subr.bf16.mxu1 %v12303_v17  ;;  %v12343_v17 = vld [vmem:[%s15701_s1 + $0xc18] sm:$0xff]  }
 0x167   :  { %11149 = vmatpush3.bf16.msra.mxu0 %v12302_v18  ;;  %v12345_v18 = vld [vmem:[%s15701_s1 + $0xc98] sm:$0xff]  }
 0x168   :  { %11150 = vmatprep.subr.bf16.mxu0 %v12305_v20  ;;  %v12348_v20 = vld [vmem:[%s15701_s1 + $0xce0] sm:$0xff]  }
 0x169   :  { %11171 = vmatpush3.bf16.msra.mxu1 %v12304_v19  ;;  %v12346_v19 = vld [vmem:[%s15701_s1 + $0xc60] sm:$0xff]  }
 0x16a   :  { %11172 = vmatprep.subr.bf16.mxu1 %v12307_v21  ;;  %v12347_v21 = vld [vmem:[%s15701_s1 + $0xc20] sm:$0xff]  }
 0x16b   :  { %11151 = vmatpush3.bf16.msra.mxu0 %v12306_v22  ;;  %v12349_v22 = vld [vmem:[%s15701_s1 + $0xca0] sm:$0xff]  }
 0x16c   :  { %11152 = vmatprep.subr.bf16.mxu0 %v12309_v24  ;;  %v12352_v24 = vld [vmem:[%s15701_s1 + $0xce8] sm:$0xff]  }
 0x16d   :  { %11173 = vmatpush3.bf16.msra.mxu1 %v12308_v23  ;;  %v12350_v23 = vld [vmem:[%s15701_s1 + $0xc68] sm:$0xff]  }
 0x16e   :  { %11174 = vmatprep.subr.bf16.mxu1 %v12311_v25  ;;  %v12351_v25 = vld [vmem:[%s15701_s1 + $0xc28] sm:$0xff]  }
 0x16f   :  { %11153 = vmatpush3.bf16.msra.mxu0 %v12310_v26  ;;  %v12353_v26 = vld [vmem:[%s15701_s1 + $0xca8] sm:$0xff]  }
 0x170   :  { %11154 = vmatprep.subr.bf16.mxu0 %v12313_v28 }
 0x171   :  { %11175 = vmatpush3.bf16.msra.mxu1 %v12312_v27  ;;  %v12354_v27 = vld [vmem:[%s15701_s1 + $0xc70] sm:$0xff]  }
 0x172   :  { %11176 = vmatprep.subr.bf16.mxu1 %v12315_v29 }
 0x173   :  { %11155 = vmatpush3.bf16.msra.mxu0 %v12314_v30 }
 0x174   :  { %11156 = vmatprep.subr.bf16.mxu0 %v12317_v32  ;;  %v12355_v32 = vld [vmem:[%s15701_s1 + $0xc30] sm:$0xff]  }
 0x175   :  { %11177 = vmatpush3.bf16.msra.mxu1 %v12316_v31  ;;  %v10854_v37 = vpop.f32.mrb[16].mxu0 }
 0x176   :  { %11178 = vmatprep.subr.bf16.mxu1 %v12319_v33  ;;  %v10855_v42 = vpop.f32.mrb[17].mxu0  ;;  %v12356_v33 = vld [vmem:[%s15701_s1 + $0xcf0] sm:$0xff]  }
 0x177   :  { %v10876_v38 = vpop.f32.mrb[16].mxu1  ;;  %v10856_v44 = vadd.f32 %v10855_v42, %v10854_v37  ;;  %v10857_v45 = vpop.f32.mrb[18].mxu0  ;;  %11157 = vmatpush3.bf16.msra.mxu0 %v12318_v34  ;;  %v12357_v37 = vld [vmem:[%s15701_s1 + $0xcb0] sm:$0xff]   ;;  %v12359_v42 = vld [vmem:[%s15701_s1 + $0xc38] sm:$0xff]  }
 0x178   :  { %v10877_v43 = vpop.f32.mrb[17].mxu1  ;;  %v10858_v48 = vpop.f32.mrb[19].mxu0  ;;  %11158 = vmatprep.subr.bf16.mxu0 %v12321_v36 }
 0x179   :  { %v10878_v46 = vadd.f32 %v10877_v43, %v10876_v38  ;;  %11179 = vmatpush3.bf16.msra.mxu1 %v12320_v35  ;;  %v7838_v50 = vadd.f32 %v10856_v44, %v13992_v3  ;;  %v10879_v53 = vpop.f32.mrb[18].mxu1  ;;  %v12331_v3 = vld [vmem:[%s15701_s1 + $0xc00] sm:$0xff]   ;;  %v12360_v43 = vld [vmem:[%s15701_s1 + $0xcf8] sm:$0xff]  }
 0x17a   :  { %11180 = vmatprep.subr.bf16.mxu1 %v12323_v40  ;;  %v10880_v57 = vpop.f32.mrb[19].mxu1  ;;  %v40_v44 = vld [vmem:[%s15700_s0 + $0x60] sm:$0xff]  ;;  %v12361_v48 = vld [vmem:[%s15701_s1 + $0xcb8] sm:$0xff]  }
 0x17b   :  { %v14096_v58 = vadd.f32 %v10878_v46, %v7838_v50  ;;  %11159 = vmatpush3.bf16.msra.mxu0 %v12322_v39  ;;  %v12358_v39 = vld [vmem:[%s15701_s1 + $0xc78] sm:$0xff]  }
 0x17c   :  { %11160 = vmatprep.subr.bf16.mxu0 %v12325_v49  ;;  %v286_v49 = vcombine.high %v40_v44, %v40_v44 }
 0x17d   :  { %11181 = vmatpush3.bf16.msra.mxu1 %v12324_v47  ;;  %v293_v47 = vrot.slane %v40_v44, %v12976_v41 }
 0x17e   :  { %11182 = vmatprep.subr.bf16.mxu1 %v12327_v51  ;;  %v12362_v51 = vld [vmem:[%s15701_s1 + $0xd40] sm:$0xff]   ;;  %v300_v53 = vrot.slane %v286_v49, %v12976_v41 }
 0x17f   :  { %11161 = vmatpush3.bf16.msra.mxu0 %v12326_v54  ;;  %v301_v52 = vcombine.high %v293_v47, %v293_v47  ;;  %v12364_v54 = vld [vmem:[%s15701_s1 + $0xd00] sm:$0xff]   ;;  %v686_v55 = vpack.c.bf16 %v293_v47, %v293_v47 }
 0x180   :  { %11190 = vmatprep.subr.bf16.mxu0 %v12329_v61  ;;  %v688_v60 = vpack.c.bf16 %v300_v53, %v300_v53  ;;  %v12367_v61 = vld [vmem:[%s15701_s1 + $0xd48] sm:$0xff]   ;;  %v12397_v49 = vld [vmem:[%s15701_s1 + $0xe00] sm:$0xff]  }
 0x181   :  { %11183 = vmatpush3.bf16.msra.mxu1 %v12328_v59  ;;  %v687_v57 = vpack.c.bf16 %v301_v52, %v301_v52  ;;  %v12366_v59 = vld [vmem:[%s15701_s1 + $0xd80] sm:$0xff]  }
 0x182   :  { %11212 = vmatprep.subr.bf16.mxu1 %v12332_v63  ;;  %8396 = vmatmul.mubr.bf16.vlgmr.msra.gmra.mrb[44].mxu0 %v682_v1  ;;  %v12368_v63 = vld [vmem:[%s15701_s1 + $0xd08] sm:$0xff]  }
 0x183   :  { %11191 = vmatpush3.bf16.msra.mxu0 %v12331_v3  ;;  %8475 = vmatprep.mubr.bf16.mxu0 %v687_v57  ;;  %v12370_v1 = vld [vmem:[%s15701_s1 + $0xd88] sm:$0xff]   ;;  %v12372_v3 = vld [vmem:[%s15701_s1 + $0xd10] sm:$0xff]  }
 0x184   :  { %8436 = vmatmul.mubr.bf16.vlgmr.msra.gmra.mrb[44].mxu1 %v684_v4  ;;  %11192 = vmatprep.subr.bf16.mxu0 %v12334_v7  ;;  %v12373_v4 = vld [vmem:[%s15701_s1 + $0xdd0] sm:$0xff]   ;;  %v12376_v7 = vld [vmem:[%s15701_s1 + $0xd18] sm:$0xff]   ;;  %v12403_v57 = vld [vmem:[%s15701_s1 + $0xe88] sm:$0xff]  }
 0x185   :  { %11213 = vmatpush3.bf16.msra.mxu1 %v12333_v5  ;;  %v12374_v5 = vld [vmem:[%s15701_s1 + $0xd90] sm:$0xff]  }
 0x186   :  { %11214 = vmatprep.subr.bf16.mxu1 %v12336_v8  ;;  %v12377_v8 = vld [vmem:[%s15701_s1 + $0xdd8] sm:$0xff]  }
 0x187   :  { %11193 = vmatpush3.bf16.msra.mxu0 %v12335_v9  ;;  %v12378_v9 = vld [vmem:[%s15701_s1 + $0xd98] sm:$0xff]  }
 0x188   :  { %11194 = vmatprep.subr.bf16.mxu0 %v12338_v11  ;;  %v12380_v11 = vld [vmem:[%s15701_s1 + $0xd20] sm:$0xff]  }
 0x189   :  { %11215 = vmatpush3.bf16.msra.mxu1 %v12337_v10  ;;  %v12379_v10 = vld [vmem:[%s15701_s1 + $0xd60] sm:$0xff]  }
 0x18a   :  { %11216 = vmatprep.subr.bf16.mxu1 %v12340_v12  ;;  %v12381_v12 = vld [vmem:[%s15701_s1 + $0xde0] sm:$0xff]  }
 0x18b   :  { %11195 = vmatpush3.bf16.msra.mxu0 %v12339_v13  ;;  %v12382_v13 = vld [vmem:[%s15701_s1 + $0xda0] sm:$0xff]  }
 0x18c   :  { %11196 = vmatprep.subr.bf16.mxu0 %v12342_v15  ;;  %v12384_v15 = vld [vmem:[%s15701_s1 + $0xd28] sm:$0xff]  }
 0x18d   :  { %11217 = vmatpush3.bf16.msra.mxu1 %v12341_v14  ;;  %v12383_v14 = vld [vmem:[%s15701_s1 + $0xd68] sm:$0xff]  }
 0x18e   :  { %11218 = vmatprep.subr.bf16.mxu1 %v12344_v16  ;;  %v12385_v16 = vld [vmem:[%s15701_s1 + $0xde8] sm:$0xff]  }
 0x18f   :  { %11197 = vmatpush3.bf16.msra.mxu0 %v12343_v17  ;;  %v12386_v17 = vld [vmem:[%s15701_s1 + $0xda8] sm:$0xff]  }
 0x190   :  { %11198 = vmatprep.subr.bf16.mxu0 %v12346_v19 }
 0x191   :  { %11219 = vmatpush3.bf16.msra.mxu1 %v12345_v18  ;;  %v12387_v18 = vld [vmem:[%s15701_s1 + $0xd70] sm:$0xff]  }
 0x192   :  { %11220 = vmatprep.subr.bf16.mxu1 %v12348_v20 }
 0x193   :  { %11199 = vmatpush3.bf16.msra.mxu0 %v12347_v21  ;;  %v12388_v21 = vld [vmem:[%s15701_s1 + $0xd30] sm:$0xff]  }
 0x194   :  { %11200 = vmatprep.subr.bf16.mxu0 %v12350_v23 }
 0x195   :  { %11221 = vmatpush3.bf16.msra.mxu1 %v12349_v22  ;;  %v10898_v28 = vpop.f32.mrb[20].mxu0  ;;  %v12389_v22 = vld [vmem:[%s15701_s1 + $0xdf0] sm:$0xff]  }
 0x196   :  { %11222 = vmatprep.subr.bf16.mxu1 %v12352_v24  ;;  %v10899_v30 = vpop.f32.mrb[21].mxu0 }
 0x197   :  { %v10920_v29 = vpop.f32.mrb[20].mxu1  ;;  %v10900_v34 = vadd.f32 %v10899_v30, %v10898_v28  ;;  %v10901_v35 = vpop.f32.mrb[22].mxu0  ;;  %11201 = vmatpush3.bf16.msra.mxu0 %v12351_v25  ;;  %v12390_v28 = vld [vmem:[%s15701_s1 + $0xdb0] sm:$0xff]   ;;  %v12391_v30 = vld [vmem:[%s15701_s1 + $0xd78] sm:$0xff]  }
 0x198   :  { %v10921_v31 = vpop.f32.mrb[21].mxu1  ;;  %v10902_v38 = vpop.f32.mrb[23].mxu0  ;;  %11202 = vmatprep.subr.bf16.mxu0 %v12354_v27 }
 0x199   :  { %v10922_v36 = vadd.f32 %v10921_v31, %v10920_v29  ;;  %11223 = vmatpush3.bf16.msra.mxu1 %v12353_v26  ;;  %v7918_v40 = vadd.f32 %v10900_v34, %v14096_v58  ;;  %v10923_v45 = vpop.f32.mrb[22].mxu1  ;;  %v302_v58 = vcombine.high %v300_v53, %v300_v53  ;;  %v12393_v34 = vld [vmem:[%s15701_s1 + $0xdf8] sm:$0xff]   ;;  %v12399_v53 = vld [vmem:[%s15701_s1 + $0xe80] sm:$0xff]  }
 0x19a   :  { %11224 = vmatprep.subr.bf16.mxu1 %v12356_v33  ;;  %v10924_v50 = vpop.f32.mrb[23].mxu1 }
 0x19b   :  { %v14199_v46 = vadd.f32 %v10922_v36, %v7918_v40  ;;  %11203 = vmatpush3.bf16.msra.mxu0 %v12355_v32  ;;  %v689_v62 = vpack.c.bf16 %v302_v58, %v302_v58  ;;  %v12392_v32 = vld [vmem:[%s15701_s1 + $0xd38] sm:$0xff]   ;;  %v12406_v58 = vld [vmem:[%s15701_s1 + $0xed0] sm:$0xff]  }
 0x19c   :  { %11204 = vmatprep.subr.bf16.mxu0 %v12358_v39  ;;  %v12394_v39 = vld [vmem:[%s15701_s1 + $0xdb8] sm:$0xff]  }
 0x19d   :  { %11225 = vmatpush3.bf16.msra.mxu1 %v12357_v37  ;;  %8515 = vmatprep.mubr.bf16.mxu1 %v689_v62  ;;  %v41_v37 = vld [vmem:[%s15700_s0 + $0x68] sm:$0xff]  ;;  %v12410_v62 = vld [vmem:[%s15701_s1 + $0xed8] sm:$0xff]  }
 0x19e   :  { %11226 = vmatprep.subr.bf16.mxu1 %v12360_v43  ;;  %v310_v38 = vrot.slane %v41_v37, %v12976_v41  ;;  %v303_v40 = vcombine.high %v41_v37, %v41_v37  ;;  %v12431_v37 = vld [vmem:[%s15701_s1 + $0xfc0] sm:$0xff]  }
 0x19f   :  { %11205 = vmatpush3.bf16.msra.mxu0 %v12359_v42  ;;  %v12395_v42 = vld [vmem:[%s15701_s1 + $0xe40] sm:$0xff]  }
 0x1a0   :  { %11234 = vmatprep.subr.bf16.mxu0 %v12362_v51  ;;  %v318_v43 = vcombine.high %v310_v38, %v310_v38  ;;  %v317_v44 = vrot.slane %v303_v40, %v12976_v41  ;;  %v690_v45 = vpack.c.bf16 %v310_v38, %v310_v38  ;;  %v12400_v51 = vld [vmem:[%s15701_s1 + $0xe48] sm:$0xff]   ;;  %v12432_v40 = vld [vmem:[%s15701_s1 + $0xf80] sm:$0xff]  }
 0x1a1   :  { %11227 = vmatpush3.bf16.msra.mxu1 %v12361_v48 }
 0x1a2   :  { %11256 = vmatprep.subr.bf16.mxu1 %v12365_v56  ;;  %8476 = vmatmul.mubr.bf16.vlgmr.msra.gmra.mrb[48].mxu0 %v686_v55  ;;  %v691_v47 = vpack.c.bf16 %v318_v43, %v318_v43  ;;  %v319_v48 = vcombine.high %v317_v44, %v317_v44  ;;  %v692_v50 = vpack.c.bf16 %v317_v44, %v317_v44  ;;  %v12401_v55 = vld [vmem:[%s15701_s1 + $0xe08] sm:$0xff]   ;;  %v12404_v56 = vld [vmem:[%s15701_s1 + $0xe50] sm:$0xff]  }
 0x1a3   :  { %11235 = vmatpush3.bf16.msra.mxu0 %v12364_v54  ;;  %v12402_v54 = vld [vmem:[%s15701_s1 + $0xec8] sm:$0xff]  }
 0x1a4   :  { %8516 = vmatmul.mubr.bf16.vlgmr.msra.gmra.mrb[48].mxu1 %v688_v60  ;;  %11236 = vmatprep.subr.bf16.mxu0 %v12367_v61  ;;  %v693_v52 = vpack.c.bf16 %v319_v48, %v319_v48  ;;  %v12408_v60 = vld [vmem:[%s15701_s1 + $0xe58] sm:$0xff]   ;;  %v12407_v61 = vld [vmem:[%s15701_s1 + $0xe90] sm:$0xff]   ;;  %v12433_v43 = vld [vmem:[%s15701_s1 + $0xf48] sm:$0xff]  }
 0x1a5   :  { %11257 = vmatpush3.bf16.msra.mxu1 %v12366_v59  ;;  %8555 = vmatprep.mubr.bf16.mxu0 %v691_v47  ;;  %v12405_v59 = vld [vmem:[%s15701_s1 + $0xe10] sm:$0xff]   ;;  %v12436_v47 = vld [vmem:[%s15701_s1 + $0xf88] sm:$0xff]  }
 0x1a6   :  { %11258 = vmatprep.subr.bf16.mxu1 %v12369_v0  ;;  %8595 = vmatprep.mubr.bf16.mxu1 %v693_v52  ;;  %v12412_v0 = vld [vmem:[%s15701_s1 + $0xe60] sm:$0xff]   ;;  %v12437_v48 = vld [vmem:[%s15701_s1 + $0xf50] sm:$0xff]   ;;  %v12441_v52 = vld [vmem:[%s15701_s1 + $0xf58] sm:$0xff]  }
 0x1a7   :  { %11237 = vmatpush3.bf16.msra.mxu0 %v12368_v63  ;;  %v12409_v63 = vld [vmem:[%s15701_s1 + $0xe18] sm:$0xff]  }
 0x1a8   :  { %11238 = vmatprep.subr.bf16.mxu0 %v12371_v2  ;;  %v12414_v2 = vld [vmem:[%s15701_s1 + $0xee0] sm:$0xff]  }
 0x1a9   :  { %11259 = vmatpush3.bf16.msra.mxu1 %v12370_v1  ;;  %v12411_v1 = vld [vmem:[%s15701_s1 + $0xe98] sm:$0xff]  }
 0x1aa   :  { %11260 = vmatprep.subr.bf16.mxu1 %v12373_v4  ;;  %v12416_v4 = vld [vmem:[%s15701_s1 + $0xe68] sm:$0xff]  }
 0x1ab   :  { %11239 = vmatpush3.bf16.msra.mxu0 %v12372_v3  ;;  %v12413_v3 = vld [vmem:[%s15701_s1 + $0xe20] sm:$0xff]  }
 0x1ac   :  { %11240 = vmatprep.subr.bf16.mxu0 %v12375_v6  ;;  %v12418_v6 = vld [vmem:[%s15701_s1 + $0xee8] sm:$0xff]  }
 0x1ad   :  { %11261 = vmatpush3.bf16.msra.mxu1 %v12374_v5  ;;  %v12415_v5 = vld [vmem:[%s15701_s1 + $0xea0] sm:$0xff]  }
 0x1ae   :  { %11262 = vmatprep.subr.bf16.mxu1 %v12377_v8 }
 0x1af   :  { %11241 = vmatpush3.bf16.msra.mxu0 %v12376_v7  ;;  %v12417_v7 = vld [vmem:[%s15701_s1 + $0xe28] sm:$0xff]  }
 0x1b0   :  { %11242 = vmatprep.subr.bf16.mxu0 %v12379_v10  ;;  %v12419_v10 = vld [vmem:[%s15701_s1 + $0xea8] sm:$0xff]  }
 0x1b1   :  { %11263 = vmatpush3.bf16.msra.mxu1 %v12378_v9 }
 0x1b2   :  { %11264 = vmatprep.subr.bf16.mxu1 %v12381_v12 }
 0x1b3   :  { %11243 = vmatpush3.bf16.msra.mxu0 %v12380_v11  ;;  %v12420_v11 = vld [vmem:[%s15701_s1 + $0xe70] sm:$0xff]  }
 0x1b4   :  { %11244 = vmatprep.subr.bf16.mxu0 %v12383_v14  ;;  %v12421_v14 = vld [vmem:[%s15701_s1 + $0xe30] sm:$0xff]  }
 0x1b5   :  { %v10942_v19 = vpop.f32.mrb[24].mxu0  ;;  %11265 = vmatpush3.bf16.msra.mxu1 %v12382_v13 }
 0x1b6   :  { %v10943_v23 = vpop.f32.mrb[25].mxu0  ;;  %11266 = vmatprep.subr.bf16.mxu1 %v12385_v16 }
 0x1b7   :  { %v10964_v20 = vpop.f32.mrb[24].mxu1  ;;  %v10944_v25 = vadd.f32 %v10943_v23, %v10942_v19  ;;  %v10945_v26 = vpop.f32.mrb[26].mxu0  ;;  %11245 = vmatpush3.bf16.msra.mxu0 %v12384_v15 }
 0x1b8   :  { %v10965_v24 = vpop.f32.mrb[25].mxu1  ;;  %v10946_v29 = vpop.f32.mrb[27].mxu0  ;;  %11246 = vmatprep.subr.bf16.mxu0 %v12387_v18  ;;  %v12422_v18 = vld [vmem:[%s15701_s1 + $0xef0] sm:$0xff]  }
 0x1b9   :  { %v10966_v27 = vadd.f32 %v10965_v24, %v10964_v20  ;;  %v7998_v31 = vadd.f32 %v10944_v25, %v14199_v46  ;;  %11267 = vmatpush3.bf16.msra.mxu1 %v12386_v17  ;;  %v10967_v33 = vpop.f32.mrb[26].mxu1  ;;  %v12398_v46 = vld [vmem:[%s15701_s1 + $0xec0] sm:$0xff]   ;;  %v12423_v20 = vld [vmem:[%s15701_s1 + $0xeb0] sm:$0xff]   ;;  %v12425_v24 = vld [vmem:[%s15701_s1 + $0xe38] sm:$0xff]  }
 0x1ba   :  { %11268 = vmatprep.subr.bf16.mxu1 %v12389_v22  ;;  %v10968_v35 = vpop.f32.mrb[27].mxu1  ;;  %v12424_v22 = vld [vmem:[%s15701_s1 + $0xe78] sm:$0xff]  }
 0x1bb   :  { %v14300_v36 = vadd.f32 %v10966_v27, %v7998_v31  ;;  %11247 = vmatpush3.bf16.msra.mxu0 %v12388_v21  ;;  %v12426_v27 = vld [vmem:[%s15701_s1 + $0xef8] sm:$0xff]   ;;  %v12430_v35 = vld [vmem:[%s15701_s1 + $0xf00] sm:$0xff]  }
 0x1bc   :  { %11248 = vmatprep.subr.bf16.mxu0 %v12391_v30  ;;  %v12427_v30 = vld [vmem:[%s15701_s1 + $0xeb8] sm:$0xff]  }
 0x1bd   :  { %11269 = vmatpush3.bf16.msra.mxu1 %v12390_v28  ;;  %v42_v28 = vld [vmem:[%s15700_s0 + $0x70] sm:$0xff] }
 0x1be   :  { %11270 = vmatprep.subr.bf16.mxu1 %v12393_v34  ;;  %v327_v29 = vrot.slane %v42_v28, %v12976_v41  ;;  %v320_v31 = vcombine.high %v42_v28, %v42_v28 }
 0x1bf   :  { %11249 = vmatpush3.bf16.msra.mxu0 %v12392_v32  ;;  %v12428_v32 = vld [vmem:[%s15701_s1 + $0xf40] sm:$0xff]  }
 0x1c0   :  { %11278 = vmatprep.subr.bf16.mxu0 %v12395_v42  ;;  %v335_v33 = vcombine.high %v327_v29, %v327_v29  ;;  %v334_v34 = vrot.slane %v320_v31, %v12976_v41 }
 0x1c1   :  { %11271 = vmatpush3.bf16.msra.mxu1 %v12394_v39 }
 0x1c2   :  { %11300 = vmatprep.subr.bf16.mxu1 %v12398_v46  ;;  %8556 = vmatmul.mubr.bf16.vlgmr.msra.gmra.mrb[52].mxu0 %v690_v45  ;;  %v695_v38 = vpack.c.bf16 %v335_v33, %v335_v33  ;;  %v336_v39 = vcombine.high %v334_v34, %v334_v34  ;;  %v696_v42 = vpack.c.bf16 %v334_v34, %v334_v34  ;;  %v12434_v45 = vld [vmem:[%s15701_s1 + $0xf08] sm:$0xff]   ;;  %v12465_v34 = vld [vmem:[%s15701_s1 + $0x1080] sm:$0xff]  }
 0x1c3   :  { %11279 = vmatpush3.bf16.msra.mxu0 %v12397_v49  ;;  %v12435_v46 = vld [vmem:[%s15701_s1 + $0xfc8] sm:$0xff]   ;;  %v12438_v49 = vld [vmem:[%s15701_s1 + $0xf10] sm:$0xff]  }
 0x1c4   :  { %8596 = vmatmul.mubr.bf16.vlgmr.msra.gmra.mrb[52].mxu1 %v692_v50  ;;  %11280 = vmatprep.subr.bf16.mxu0 %v12400_v51  ;;  %v697_v44 = vpack.c.bf16 %v336_v39, %v336_v39  ;;  %v12439_v50 = vld [vmem:[%s15701_s1 + $0xfd0] sm:$0xff]  }
 0x1c5   :  { %11301 = vmatpush3.bf16.msra.mxu1 %v12399_v53  ;;  %8635 = vmatprep.mubr.bf16.mxu0 %v695_v38  ;;  %v12440_v51 = vld [vmem:[%s15701_s1 + $0xf90] sm:$0xff]   ;;  %v12442_v53 = vld [vmem:[%s15701_s1 + $0xf18] sm:$0xff]   ;;  %v12469_v38 = vld [vmem:[%s15701_s1 + $0x1088] sm:$0xff]  }
 0x1c6   :  { %11302 = vmatprep.subr.bf16.mxu1 %v12402_v54  ;;  %8675 = vmatprep.mubr.bf16.mxu1 %v697_v44  ;;  %v12443_v54 = vld [vmem:[%s15701_s1 + $0xfd8] sm:$0xff]   ;;  %v12472_v39 = vld [vmem:[%s15701_s1 + $0x10d0] sm:$0xff]  }
 0x1c7   :  { %11281 = vmatpush3.bf16.msra.mxu0 %v12401_v55  ;;  %v12444_v55 = vld [vmem:[%s15701_s1 + $0xf98] sm:$0xff]  }
 0x1c8   :  { %11282 = vmatprep.subr.bf16.mxu0 %v12404_v56  ;;  %v12445_v56 = vld [vmem:[%s15701_s1 + $0xf60] sm:$0xff]   ;;  %v12476_v44 = vld [vmem:[%s15701_s1 + $0x10d8] sm:$0xff]  }
 0x1c9   :  { %11303 = vmatpush3.bf16.msra.mxu1 %v12403_v57  ;;  %v12446_v57 = vld [vmem:[%s15701_s1 + $0xf20] sm:$0xff]  }
 0x1ca   :  { %11304 = vmatprep.subr.bf16.mxu1 %v12406_v58  ;;  %v12447_v58 = vld [vmem:[%s15701_s1 + $0xfe0] sm:$0xff]  }
 0x1cb   :  { %11283 = vmatpush3.bf16.msra.mxu0 %v12405_v59  ;;  %v12448_v59 = vld [vmem:[%s15701_s1 + $0xfa0] sm:$0xff]  }
 0x1cc   :  { %11284 = vmatprep.subr.bf16.mxu0 %v12408_v60  ;;  %v12449_v60 = vld [vmem:[%s15701_s1 + $0xf68] sm:$0xff]  }
 0x1cd   :  { %11305 = vmatpush3.bf16.msra.mxu1 %v12407_v61  ;;  %v12450_v61 = vld [vmem:[%s15701_s1 + $0xf28] sm:$0xff]  }
 0x1ce   :  { %11306 = vmatprep.subr.bf16.mxu1 %v12410_v62  ;;  %v12451_v62 = vld [vmem:[%s15701_s1 + $0xfe8] sm:$0xff]  }
 0x1cf   :  { %11285 = vmatpush3.bf16.msra.mxu0 %v12409_v63  ;;  %v12452_v63 = vld [vmem:[%s15701_s1 + $0xfa8] sm:$0xff]  }
 0x1d0   :  { %11286 = vmatprep.subr.bf16.mxu0 %v12412_v0 }
 0x1d1   :  { %11307 = vmatpush3.bf16.msra.mxu1 %v12411_v1 }
 0x1d2   :  { %11308 = vmatprep.subr.bf16.mxu1 %v12414_v2 }
 0x1d3   :  { %11287 = vmatpush3.bf16.msra.mxu0 %v12413_v3 }
 0x1d4   :  { %11288 = vmatprep.subr.bf16.mxu0 %v12416_v4  ;;  %v12453_v4 = vld [vmem:[%s15701_s1 + $0xf70] sm:$0xff]  }
 0x1d5   :  { %v10986_v8 = vpop.f32.mrb[28].mxu0  ;;  %11309 = vmatpush3.bf16.msra.mxu1 %v12415_v5  ;;  %v12454_v5 = vld [vmem:[%s15701_s1 + $0xf30] sm:$0xff]  }
 0x1d6   :  { %v10987_v12 = vpop.f32.mrb[29].mxu0  ;;  %11310 = vmatprep.subr.bf16.mxu1 %v12418_v6 }
 0x1d7   :  { %v11008_v9 = vpop.f32.mrb[28].mxu1  ;;  %v10988_v15 = vadd.f32 %v10987_v12, %v10986_v8  ;;  %v10989_v16 = vpop.f32.mrb[30].mxu0  ;;  %11289 = vmatpush3.bf16.msra.mxu0 %v12417_v7 }
 0x1d8   :  { %v11009_v13 = vpop.f32.mrb[29].mxu1  ;;  %v10990_v19 = vpop.f32.mrb[31].mxu0  ;;  %11290 = vmatprep.subr.bf16.mxu0 %v12420_v11  ;;  %v12456_v11 = vld [vmem:[%s15701_s1 + $0xfb0] sm:$0xff]   ;;  %v12458_v16 = vld [vmem:[%s15701_s1 + $0xf38] sm:$0xff]  }
 0x1d9   :  { %v11010_v17 = vadd.f32 %v11009_v13, %v11008_v9  ;;  %v8078_v21 = vadd.f32 %v10988_v15, %v14300_v36  ;;  %v11011_v23 = vpop.f32.mrb[30].mxu1  ;;  %11311 = vmatpush3.bf16.msra.mxu1 %v12419_v10  ;;  %v694_v36 = vpack.c.bf16 %v327_v29, %v327_v29  ;;  %v12455_v9 = vld [vmem:[%s15701_s1 + $0xff0] sm:$0xff]   ;;  %v12457_v13 = vld [vmem:[%s15701_s1 + $0xf78] sm:$0xff]  }
 0x1da   :  { %v11012_v25 = vpop.f32.mrb[31].mxu1  ;;  %11312 = vmatprep.subr.bf16.mxu1 %v12422_v18  ;;  %v12459_v18 = vld [vmem:[%s15701_s1 + $0xff8] sm:$0xff]   ;;  %v12461_v23 = vld [vmem:[%s15701_s1 + $0x1040] sm:$0xff]  }
 0x1db   :  { %v14401_v26 = vadd.f32 %v11010_v17, %v8078_v21  ;;  %11291 = vmatpush3.bf16.msra.mxu0 %v12421_v14  ;;  %v43_v19 = vld [vmem:[%s15700_s0 + $0x78] sm:$0xff] }
 0x1dc   :  { %11292 = vmatprep.subr.bf16.mxu0 %v12424_v22  ;;  %v12460_v21 = vld [vmem:[%s15701_s1 + $0xfb8] sm:$0xff]   ;;  %v337_v22 = vcombine.high %v43_v19, %v43_v19 }
 0x1dd   :  { %11313 = vmatpush3.bf16.msra.mxu1 %v12423_v20  ;;  %v344_v20 = vrot.slane %v43_v19, %v12976_v41  ;;  %v12497_v19 = vld [vmem:[%s15701_s1 + $0x11c0] sm:$0xff]  }
 0x1de   :  { %11314 = vmatprep.subr.bf16.mxu1 %v12426_v27  ;;  %v351_v25 = vrot.slane %v337_v22, %v12976_v41  ;;  %v12464_v27 = vld [vmem:[%s15701_s1 + $0x10c0] sm:$0xff]  }
 0x1df   :  { %11293 = vmatpush3.bf16.msra.mxu0 %v12425_v24  ;;  %v352_v24 = vcombine.high %v344_v20, %v344_v20  ;;  %v12498_v22 = vld [vmem:[%s15701_s1 + $0x1180] sm:$0xff]  }
 0x1e0   :  { %11322 = vmatprep.subr.bf16.mxu0 %v12428_v32  ;;  %v353_v29 = vcombine.high %v351_v25, %v351_v25  ;;  %v700_v31 = vpack.c.bf16 %v351_v25, %v351_v25  ;;  %v12466_v32 = vld [vmem:[%s15701_s1 + $0x1048] sm:$0xff]  }
 0x1e1   :  { %11315 = vmatpush3.bf16.msra.mxu1 %v12427_v30  ;;  %v699_v28 = vpack.c.bf16 %v352_v24, %v352_v24  ;;  %v12463_v30 = vld [vmem:[%s15701_s1 + $0x1000] sm:$0xff]   ;;  %v12499_v24 = vld [vmem:[%s15701_s1 + $0x1148] sm:$0xff]  }
 0x1e2   :  { %8636 = vmatmul.mubr.bf16.vlgmr.msra.gmra.mrb[56].mxu0 %v694_v36  ;;  %11344 = vmatprep.subr.bf16.mxu1 %v12431_v37  ;;  %v701_v33 = vpack.c.bf16 %v353_v29, %v353_v29  ;;  %v12467_v36 = vld [vmem:[%s15701_s1 + $0x1008] sm:$0xff]   ;;  %v12470_v37 = vld [vmem:[%s15701_s1 + $0x1050] sm:$0xff]  }
 0x1e3   :  { %11323 = vmatpush3.bf16.msra.mxu0 %v12430_v35  ;;  %8715 = vmatprep.mubr.bf16.mxu0 %v699_v28  ;;  %v12468_v35 = vld [vmem:[%s15701_s1 + $0x10c8] sm:$0xff]   ;;  %v12503_v29 = vld [vmem:[%s15701_s1 + $0x1150] sm:$0xff]  }
 0x1e4   :  { %8676 = vmatmul.mubr.bf16.vlgmr.msra.gmra.mrb[56].mxu1 %v696_v42  ;;  %11324 = vmatprep.subr.bf16.mxu0 %v12433_v43  ;;  %v12474_v42 = vld [vmem:[%s15701_s1 + $0x1058] sm:$0xff]   ;;  %v12473_v43 = vld [vmem:[%s15701_s1 + $0x1090] sm:$0xff]   ;;  %v12502_v28 = vld [vmem:[%s15701_s1 + $0x1188] sm:$0xff]  }
 0x1e5   :  { %11345 = vmatpush3.bf16.msra.mxu1 %v12432_v40  ;;  %8755 = vmatprep.mubr.bf16.mxu1 %v701_v33  ;;  %v12471_v40 = vld [vmem:[%s15701_s1 + $0x1010] sm:$0xff]   ;;  %v12507_v33 = vld [vmem:[%s15701_s1 + $0x1158] sm:$0xff]  }
 0x1e6   :  { %11346 = vmatprep.subr.bf16.mxu1 %v12435_v46  ;;  %v12478_v46 = vld [vmem:[%s15701_s1 + $0x1060] sm:$0xff]  }
 0x1e7   :  { %11325 = vmatpush3.bf16.msra.mxu0 %v12434_v45  ;;  %v12475_v45 = vld [vmem:[%s15701_s1 + $0x1018] sm:$0xff]  }
 0x1e8   :  { %11326 = vmatprep.subr.bf16.mxu0 %v12437_v48  ;;  %v12480_v48 = vld [vmem:[%s15701_s1 + $0x10e0] sm:$0xff]  }
 0x1e9   :  { %11347 = vmatpush3.bf16.msra.mxu1 %v12436_v47  ;;  %v12477_v47 = vld [vmem:[%s15701_s1 + $0x1098] sm:$0xff]  }
 0x1ea   :  { %11348 = vmatprep.subr.bf16.mxu1 %v12439_v50  ;;  %v12482_v50 = vld [vmem:[%s15701_s1 + $0x1068] sm:$0xff]  }
 0x1eb   :  { %11327 = vmatpush3.bf16.msra.mxu0 %v12438_v49  ;;  %v12479_v49 = vld [vmem:[%s15701_s1 + $0x1020] sm:$0xff]  }
 0x1ec   :  { %11328 = vmatprep.subr.bf16.mxu0 %v12441_v52  ;;  %v12484_v52 = vld [vmem:[%s15701_s1 + $0x10e8] sm:$0xff]  }
 0x1ed   :  { %11349 = vmatpush3.bf16.msra.mxu1 %v12440_v51  ;;  %v12481_v51 = vld [vmem:[%s15701_s1 + $0x10a0] sm:$0xff]  }
 0x1ee   :  { %11350 = vmatprep.subr.bf16.mxu1 %v12443_v54  ;;  %v12483_v54 = vld [vmem:[%s15701_s1 + $0x1028] sm:$0xff]  }
 0x1ef   :  { %11329 = vmatpush3.bf16.msra.mxu0 %v12442_v53 }
 0x1f0   :  { %11330 = vmatprep.subr.bf16.mxu0 %v12445_v56 }
 0x1f1   :  { %11351 = vmatpush3.bf16.msra.mxu1 %v12444_v55 }
 0x1f2   :  { %11352 = vmatprep.subr.bf16.mxu1 %v12447_v58  ;;  %v12486_v58 = vld [vmem:[%s15701_s1 + $0x1070] sm:$0xff]  }
 0x1f3   :  { %11331 = vmatpush3.bf16.msra.mxu0 %v12446_v57  ;;  %v12485_v57 = vld [vmem:[%s15701_s1 + $0x10a8] sm:$0xff]  }
 0x1f4   :  { %11332 = vmatprep.subr.bf16.mxu0 %v12449_v60 }
 0x1f5   :  { %v11030_v0 = vpop.f32.mrb[32].mxu0  ;;  %11353 = vmatpush3.bf16.msra.mxu1 %v12448_v59 }
 0x1f6   :  { %v11031_v2 = vpop.f32.mrb[33].mxu0  ;;  %11354 = vmatprep.subr.bf16.mxu1 %v12451_v62  ;;  %v12487_v62 = vld [vmem:[%s15701_s1 + $0x1030] sm:$0xff]  }
 0x1f7   :  { %v11052_v1 = vpop.f32.mrb[32].mxu1  ;;  %v11032_v6 = vadd.f32 %v11031_v2, %v11030_v0  ;;  %v11033_v7 = vpop.f32.mrb[34].mxu0  ;;  %11333 = vmatpush3.bf16.msra.mxu0 %v12450_v61 }
 0x1f8   :  { %v11053_v3 = vpop.f32.mrb[33].mxu1  ;;  %v11034_v10 = vpop.f32.mrb[35].mxu0  ;;  %11334 = vmatprep.subr.bf16.mxu0 %v12453_v4 }
 0x1f9   :  { %v11054_v8 = vadd.f32 %v11053_v3, %v11052_v1  ;;  %v8158_v12 = vadd.f32 %v11032_v6, %v14401_v26  ;;  %11355 = vmatpush3.bf16.msra.mxu1 %v12452_v63  ;;  %v11055_v14 = vpop.f32.mrb[34].mxu1  ;;  %v698_v26 = vpack.c.bf16 %v344_v20, %v344_v20  ;;  %v12488_v1 = vld [vmem:[%s15701_s1 + $0x10f0] sm:$0xff]   ;;  %v44_v10 = vld [vmem:[%s15700_s0 + $0x80] sm:$0xff] }
 0x1fa   :  { %11356 = vmatprep.subr.bf16.mxu1 %v12455_v9  ;;  %v11056_v17 = vpop.f32.mrb[35].mxu1  ;;  %v12489_v3 = vld [vmem:[%s15701_s1 + $0x10b0] sm:$0xff]   ;;  %v12492_v9 = vld [vmem:[%s15701_s1 + $0x10f8] sm:$0xff]   ;;  %v12494_v14 = vld [vmem:[%s15701_s1 + $0x1140] sm:$0xff]  }
 0x1fb   :  { %v14502_v15 = vadd.f32 %v11054_v8, %v8158_v12  ;;  %11335 = vmatpush3.bf16.msra.mxu0 %v12454_v5  ;;  %v12490_v5 = vld [vmem:[%s15701_s1 + $0x1078] sm:$0xff]   ;;  %v12496_v17 = vld [vmem:[%s15701_s1 + $0x1100] sm:$0xff]  }
 0x1fc   :  { %11336 = vmatprep.subr.bf16.mxu0 %v12457_v13  ;;  %v12491_v8 = vld [vmem:[%s15701_s1 + $0x1038] sm:$0xff]   ;;  %v354_v13 = vcombine.high %v44_v10, %v44_v10 }
 0x1fd   :  { %11357 = vmatpush3.bf16.msra.mxu1 %v12456_v11  ;;  %v361_v11 = vrot.slane %v44_v10, %v12976_v41  ;;  %v12493_v12 = vld [vmem:[%s15701_s1 + $0x10b8] sm:$0xff]   ;;  %v12530_v10 = vld [vmem:[%s15701_s1 + $0x12c0] sm:$0xff]  }
 0x1fe   :  { %11358 = vmatprep.subr.bf16.mxu1 %v12459_v18 }
 0x1ff   :  { %11337 = vmatpush3.bf16.msra.mxu0 %v12458_v16  ;;  %v368_v16 = vrot.slane %v354_v13, %v12976_v41  ;;  %v702_v18 = vpack.c.bf16 %v361_v11, %v361_v11  ;;  %v12531_v13 = vld [vmem:[%s15701_s1 + $0x1280] sm:$0xff]  }
 0x200   :  { %11366 = vmatprep.subr.bf16.mxu0 %v12461_v23 }
 0x201   :  { %11359 = vmatpush3.bf16.msra.mxu1 %v12460_v21  ;;  %v370_v21 = vcombine.high %v368_v16, %v368_v16  ;;  %v704_v23 = vpack.c.bf16 %v368_v16, %v368_v16 }
 0x202   :  { %11388 = vmatprep.subr.bf16.mxu1 %v12464_v27  ;;  %8716 = vmatmul.mubr.bf16.vlgmr.msra.gmra.mrb[60].mxu0 %v698_v26  ;;  %v12500_v26 = vld [vmem:[%s15701_s1 + $0x1108] sm:$0xff]  }
 0x203   :  { %11367 = vmatpush3.bf16.msra.mxu0 %v12463_v30  ;;  %v705_v25 = vpack.c.bf16 %v370_v21, %v370_v21  ;;  %v12501_v27 = vld [vmem:[%s15701_s1 + $0x11c8] sm:$0xff]   ;;  %v12504_v30 = vld [vmem:[%s15701_s1 + $0x1110] sm:$0xff]  }
 0x204   :  { %8756 = vmatmul.mubr.bf16.vlgmr.msra.gmra.mrb[60].mxu1 %v700_v31  ;;  %11368 = vmatprep.subr.bf16.mxu0 %v12466_v32  ;;  %v12505_v31 = vld [vmem:[%s15701_s1 + $0x11d0] sm:$0xff]  }
 0x205   :  { %11389 = vmatpush3.bf16.msra.mxu1 %v12465_v34  ;;  %8835 = vmatprep.mubr.bf16.mxu1 %v705_v25  ;;  %v12506_v32 = vld [vmem:[%s15701_s1 + $0x1190] sm:$0xff]   ;;  %v12508_v34 = vld [vmem:[%s15701_s1 + $0x1118] sm:$0xff]  }
 0x206   :  { %11390 = vmatprep.subr.bf16.mxu1 %v12468_v35  ;;  %v12509_v35 = vld [vmem:[%s15701_s1 + $0x11d8] sm:$0xff]   ;;  %v12537_v21 = vld [vmem:[%s15701_s1 + $0x1210] sm:$0xff]  }
 0x207   :  { %11369 = vmatpush3.bf16.msra.mxu0 %v12467_v36  ;;  %v12510_v36 = vld [vmem:[%s15701_s1 + $0x1198] sm:$0xff]  }
 0x208   :  { %11370 = vmatprep.subr.bf16.mxu0 %v12470_v37  ;;  %v12511_v37 = vld [vmem:[%s15701_s1 + $0x1160] sm:$0xff]   ;;  %v12541_v25 = vld [vmem:[%s15701_s1 + $0x1218] sm:$0xff]  }
 0x209   :  { %11391 = vmatpush3.bf16.msra.mxu1 %v12469_v38  ;;  %v12512_v38 = vld [vmem:[%s15701_s1 + $0x1120] sm:$0xff]  }
 0x20a   :  { %11392 = vmatprep.subr.bf16.mxu1 %v12472_v39  ;;  %v12513_v39 = vld [vmem:[%s15701_s1 + $0x11e0] sm:$0xff]  }
 0x20b   :  { %11371 = vmatpush3.bf16.msra.mxu0 %v12471_v40  ;;  %v12514_v40 = vld [vmem:[%s15701_s1 + $0x11a0] sm:$0xff]  }
 0x20c   :  { %11372 = vmatprep.subr.bf16.mxu0 %v12474_v42  ;;  %v12515_v42 = vld [vmem:[%s15701_s1 + $0x1168] sm:$0xff]  }
 0x20d   :  { %11393 = vmatpush3.bf16.msra.mxu1 %v12473_v43  ;;  %v12516_v43 = vld [vmem:[%s15701_s1 + $0x1128] sm:$0xff]  }
 0x20e   :  { %11394 = vmatprep.subr.bf16.mxu1 %v12476_v44 }
 0x20f   :  { %11373 = vmatpush3.bf16.msra.mxu0 %v12475_v45  ;;  %v12517_v45 = vld [vmem:[%s15701_s1 + $0x11e8] sm:$0xff]  }
 0x210   :  { %11374 = vmatprep.subr.bf16.mxu0 %v12478_v46 }
 0x211   :  { %11395 = vmatpush3.bf16.msra.mxu1 %v12477_v47 }
 0x212   :  { %11396 = vmatprep.subr.bf16.mxu1 %v12480_v48  ;;  %v12518_v48 = vld [vmem:[%s15701_s1 + $0x11a8] sm:$0xff]  }
 0x213   :  { %11375 = vmatpush3.bf16.msra.mxu0 %v12479_v49  ;;  %v12519_v49 = vld [vmem:[%s15701_s1 + $0x1170] sm:$0xff]  }
 0x214   :  { %11376 = vmatprep.subr.bf16.mxu0 %v12482_v50 }
 0x215   :  { %v11074_v53 = vpop.f32.mrb[36].mxu0  ;;  %11397 = vmatpush3.bf16.msra.mxu1 %v12481_v51 }
 0x216   :  { %v11075_v55 = vpop.f32.mrb[37].mxu0  ;;  %11398 = vmatprep.subr.bf16.mxu1 %v12484_v52 }
 0x217   :  { %v11096_v56 = vpop.f32.mrb[36].mxu1  ;;  %v11076_v59 = vadd.f32 %v11075_v55, %v11074_v53  ;;  %v11077_v60 = vpop.f32.mrb[38].mxu0  ;;  %11377 = vmatpush3.bf16.msra.mxu0 %v12483_v54  ;;  %v12520_v55 = vld [vmem:[%s15701_s1 + $0x1130] sm:$0xff]  }
 0x218   :  { %v11097_v61 = vpop.f32.mrb[37].mxu1  ;;  %v11078_v63 = vpop.f32.mrb[39].mxu0  ;;  %11378 = vmatprep.subr.bf16.mxu0 %v12486_v58 }
 0x219   :  { %v11098_v0 = vadd.f32 %v11097_v61, %v11096_v56  ;;  %v8238_v2 = vadd.f32 %v11076_v59, %v14502_v15  ;;  %v11099_v4 = vpop.f32.mrb[38].mxu1  ;;  %11399 = vmatpush3.bf16.msra.mxu1 %v12485_v57  ;;  %v369_v15 = vcombine.high %v361_v11, %v361_v11  ;;  %v12521_v57 = vld [vmem:[%s15701_s1 + $0x11f0] sm:$0xff]   ;;  %v12524_v63 = vld [vmem:[%s15701_s1 + $0x1138] sm:$0xff]  }
 0x21a   :  { %v11100_v6 = vpop.f32.mrb[39].mxu1  ;;  %11400 = vmatprep.subr.bf16.mxu1 %v12488_v1  ;;  %v12522_v59 = vld [vmem:[%s15701_s1 + $0x11b0] sm:$0xff]   ;;  %v45_v1 = vld [vmem:[%s15700_s0 + $0x88] sm:$0xff] }
 0x21b   :  { %v14606_v7 = vadd.f32 %v11098_v0, %v8238_v2  ;;  %11379 = vmatpush3.bf16.msra.mxu0 %v12487_v62  ;;  %v703_v20 = vpack.c.bf16 %v369_v15, %v369_v15  ;;  %v12523_v62 = vld [vmem:[%s15701_s1 + $0x1178] sm:$0xff]   ;;  %v378_v2 = vrot.slane %v45_v1, %v12976_v41  ;;  %v371_v4 = vcombine.high %v45_v1, %v45_v1  ;;  %v12532_v15 = vld [vmem:[%s15701_s1 + $0x1248] sm:$0xff]   ;;  %v12563_v1 = vld [vmem:[%s15701_s1 + $0x13c0] sm:$0xff]  }
 0x21c   :  { %11380 = vmatprep.subr.bf16.mxu0 %v12490_v5  ;;  %v12525_v0 = vld [vmem:[%s15701_s1 + $0x11f8] sm:$0xff]   ;;  %v12527_v5 = vld [vmem:[%s15701_s1 + $0x1240] sm:$0xff]  }
 0x21d   :  { %11401 = vmatpush3.bf16.msra.mxu1 %v12489_v3  ;;  %8795 = vmatprep.mubr.bf16.mxu0 %v703_v20  ;;  %v12526_v3 = vld [vmem:[%s15701_s1 + $0x11b8] sm:$0xff]   ;;  %v386_v6 = vcombine.high %v378_v2, %v378_v2  ;;  %v12536_v20 = vld [vmem:[%s15701_s1 + $0x1250] sm:$0xff]  }
 0x21e   :  { %11402 = vmatprep.subr.bf16.mxu1 %v12492_v9  ;;  %v706_v9 = vpack.c.bf16 %v378_v2, %v378_v2 }
 0x21f   :  { %11381 = vmatpush3.bf16.msra.mxu0 %v12491_v8  ;;  %v12529_v8 = vld [vmem:[%s15701_s1 + $0x1200] sm:$0xff]   ;;  %v707_v11 = vpack.c.bf16 %v386_v6, %v386_v6  ;;  %v12565_v6 = vld [vmem:[%s15701_s1 + $0x1348] sm:$0xff]  }
 0x220   :  { %11410 = vmatprep.subr.bf16.mxu0 %v12494_v14 }
 0x221   :  { %11403 = vmatpush3.bf16.msra.mxu1 %v12493_v12 }
 0x222   :  { %11432 = vmatprep.subr.bf16.mxu1 %v12497_v19  ;;  %8796 = vmatmul.mubr.bf16.vlgmr.msra.gmra.mrb[64].mxu0 %v702_v18  ;;  %v12534_v18 = vld [vmem:[%s15701_s1 + $0x12c8] sm:$0xff]  }
 0x223   :  { %11411 = vmatpush3.bf16.msra.mxu0 %v12496_v17  ;;  %8875 = vmatprep.mubr.bf16.mxu0 %v707_v11  ;;  %v12533_v17 = vld [vmem:[%s15701_s1 + $0x1208] sm:$0xff]   ;;  %v12569_v11 = vld [vmem:[%s15701_s1 + $0x1350] sm:$0xff]  }
 0x224   :  { %8836 = vmatmul.mubr.bf16.vlgmr.msra.gmra.mrb[64].mxu1 %v704_v23  ;;  %11412 = vmatprep.subr.bf16.mxu0 %v12499_v24  ;;  %v12535_v19 = vld [vmem:[%s15701_s1 + $0x1288] sm:$0xff]   ;;  %v12539_v23 = vld [vmem:[%s15701_s1 + $0x1290] sm:$0xff]   ;;  %v12540_v24 = vld [vmem:[%s15701_s1 + $0x1258] sm:$0xff]  }
 0x225   :  { %11433 = vmatpush3.bf16.msra.mxu1 %v12498_v22  ;;  %v12538_v22 = vld [vmem:[%s15701_s1 + $0x12d0] sm:$0xff]  }
 0x226   :  { %11434 = vmatprep.subr.bf16.mxu1 %v12501_v27  ;;  %v12543_v27 = vld [vmem:[%s15701_s1 + $0x1298] sm:$0xff]  }
 0x227   :  { %11413 = vmatpush3.bf16.msra.mxu0 %v12500_v26  ;;  %v12542_v26 = vld [vmem:[%s15701_s1 + $0x12d8] sm:$0xff]  }
 0x228   :  { %11414 = vmatprep.subr.bf16.mxu0 %v12503_v29  ;;  %v12545_v29 = vld [vmem:[%s15701_s1 + $0x1220] sm:$0xff]  }
 0x229   :  { %11435 = vmatpush3.bf16.msra.mxu1 %v12502_v28  ;;  %v12544_v28 = vld [vmem:[%s15701_s1 + $0x1260] sm:$0xff]  }
 0x22a   :  { %11436 = vmatprep.subr.bf16.mxu1 %v12505_v31  ;;  %v12547_v31 = vld [vmem:[%s15701_s1 + $0x12a0] sm:$0xff]  }
 0x22b   :  { %11415 = vmatpush3.bf16.msra.mxu0 %v12504_v30  ;;  %v12546_v30 = vld [vmem:[%s15701_s1 + $0x12e0] sm:$0xff]  }
 0x22c   :  { %11416 = vmatprep.subr.bf16.mxu0 %v12507_v33  ;;  %v12549_v33 = vld [vmem:[%s15701_s1 + $0x1228] sm:$0xff]  }
 0x22d   :  { %11437 = vmatpush3.bf16.msra.mxu1 %v12506_v32  ;;  %v12548_v32 = vld [vmem:[%s15701_s1 + $0x1268] sm:$0xff]  }
 0x22e   :  { %11438 = vmatprep.subr.bf16.mxu1 %v12509_v35  ;;  %v12550_v35 = vld [vmem:[%s15701_s1 + $0x12e8] sm:$0xff]  }
 0x22f   :  { %11417 = vmatpush3.bf16.msra.mxu0 %v12508_v34 }
 0x230   :  { %11418 = vmatprep.subr.bf16.mxu0 %v12511_v37 }
 0x231   :  { %11439 = vmatpush3.bf16.msra.mxu1 %v12510_v36 }
 0x232   :  { %11440 = vmatprep.subr.bf16.mxu1 %v12513_v39 }
 0x233   :  { %11419 = vmatpush3.bf16.msra.mxu0 %v12512_v38 }
 0x234   :  { %11420 = vmatprep.subr.bf16.mxu0 %v12515_v42  ;;  %v12551_v42 = vld [vmem:[%s15701_s1 + $0x12a8] sm:$0xff]  }
 0x235   :  { %v11118_v44 = vpop.f32.mrb[40].mxu0  ;;  %11441 = vmatpush3.bf16.msra.mxu1 %v12514_v40 }
 0x236   :  { %v11119_v46 = vpop.f32.mrb[41].mxu0  ;;  %11442 = vmatprep.subr.bf16.mxu1 %v12517_v45 }
 0x237   :  { %v11140_v47 = vpop.f32.mrb[40].mxu1  ;;  %v11120_v50 = vadd.f32 %v11119_v46, %v11118_v44  ;;  %v11121_v51 = vpop.f32.mrb[42].mxu0  ;;  %11421 = vmatpush3.bf16.msra.mxu0 %v12516_v43  ;;  %v12552_v43 = vld [vmem:[%s15701_s1 + $0x1270] sm:$0xff]  }
 0x238   :  { %v11141_v52 = vpop.f32.mrb[41].mxu1  ;;  %v11122_v53 = vpop.f32.mrb[43].mxu0  ;;  %11422 = vmatprep.subr.bf16.mxu0 %v12519_v49  ;;  %v12553_v46 = vld [vmem:[%s15701_s1 + $0x1230] sm:$0xff]  }
 0x239   :  { %v11142_v54 = vadd.f32 %v11141_v52, %v11140_v47  ;;  %v8318_v56 = vadd.f32 %v11120_v50, %v14606_v7  ;;  %v11143_v58 = vpop.f32.mrb[42].mxu1  ;;  %11443 = vmatpush3.bf16.msra.mxu1 %v12518_v48  ;;  %v385_v7 = vrot.slane %v371_v4, %v12976_v41  ;;  %v12554_v48 = vld [vmem:[%s15701_s1 + $0x12f0] sm:$0xff]   ;;  %v12556_v53 = vld [vmem:[%s15701_s1 + $0x1278] sm:$0xff]   ;;  %v12564_v4 = vld [vmem:[%s15701_s1 + $0x1380] sm:$0xff]  }
 0x23a   :  { %v11144_v60 = vpop.f32.mrb[43].mxu1  ;;  %11444 = vmatprep.subr.bf16.mxu1 %v12521_v57  ;;  %v12555_v51 = vld [vmem:[%s15701_s1 + $0x12b0] sm:$0xff]   ;;  %v12559_v58 = vld [vmem:[%s15701_s1 + $0x12b8] sm:$0xff]  }
 0x23b   :  { %v14707_v61 = vadd.f32 %v11142_v54, %v8318_v56  ;;  %11423 = vmatpush3.bf16.msra.mxu0 %v12520_v55  ;;  %v387_v12 = vcombine.high %v385_v7, %v385_v7  ;;  %v708_v14 = vpack.c.bf16 %v385_v7, %v385_v7  ;;  %v12557_v54 = vld [vmem:[%s15701_s1 + $0x1238] sm:$0xff]   ;;  %v46_v56 = vld [vmem:[%s15700_s0 + $0x90] sm:$0xff]  ;;  %v12560_v60 = vld [vmem:[%s15701_s1 + $0x1340] sm:$0xff]  }
 0x23c   :  { %11424 = vmatprep.subr.bf16.mxu0 %v12523_v62  ;;  %v12558_v55 = vld [vmem:[%s15701_s1 + $0x12f8] sm:$0xff]   ;;  %v395_v57 = vrot.slane %v46_v56, %v12976_v41 }
 0x23d   :  { %11445 = vmatpush3.bf16.msra.mxu1 %v12522_v59  ;;  %v709_v16 = vpack.c.bf16 %v387_v12, %v387_v12  ;;  %v388_v59 = vcombine.high %v46_v56, %v46_v56  ;;  %v12570_v12 = vld [vmem:[%s15701_s1 + $0x1310] sm:$0xff]   ;;  %v12596_v56 = vld [vmem:[%s15701_s1 + $0x14c0] sm:$0xff]  }
 0x23e   :  { %11446 = vmatprep.subr.bf16.mxu1 %v12525_v0  ;;  %v710_v0 = vpack.c.bf16 %v395_v57, %v395_v57 }
 0x23f   :  { %11425 = vmatpush3.bf16.msra.mxu0 %v12524_v63  ;;  %8915 = vmatprep.mubr.bf16.mxu1 %v709_v16  ;;  %v402_v62 = vrot.slane %v388_v59, %v12976_v41  ;;  %v12562_v63 = vld [vmem:[%s15701_s1 + $0x1300] sm:$0xff]   ;;  %v12574_v16 = vld [vmem:[%s15701_s1 + $0x1318] sm:$0xff]  }
 0x240   :  { %11454 = vmatprep.subr.bf16.mxu0 %v12527_v5  ;;  %v12597_v59 = vld [vmem:[%s15701_s1 + $0x1480] sm:$0xff]  }
 0x241   :  { %11447 = vmatpush3.bf16.msra.mxu1 %v12526_v3  ;;  %v404_v3 = vcombine.high %v402_v62, %v402_v62  ;;  %v712_v5 = vpack.c.bf16 %v402_v62, %v402_v62 }
 0x242   :  { %8876 = vmatmul.mubr.bf16.vlgmr.msra.gmra.mrb[68].mxu0 %v706_v9  ;;  %11476 = vmatprep.subr.bf16.mxu1 %v12530_v10  ;;  %v12567_v9 = vld [vmem:[%s15701_s1 + $0x13c8] sm:$0xff]  }
 0x243   :  { %11455 = vmatpush3.bf16.msra.mxu0 %v12529_v8  ;;  %v713_v7 = vpack.c.bf16 %v404_v3, %v404_v3  ;;  %v12566_v8 = vld [vmem:[%s15701_s1 + $0x1308] sm:$0xff]   ;;  %v12603_v3 = vld [vmem:[%s15701_s1 + $0x1410] sm:$0xff]  }
 0x244   :  { %8916 = vmatmul.mubr.bf16.vlgmr.msra.gmra.mrb[68].mxu1 %v708_v14  ;;  %11456 = vmatprep.subr.bf16.mxu0 %v12532_v15  ;;  %v12568_v10 = vld [vmem:[%s15701_s1 + $0x1388] sm:$0xff]   ;;  %v12572_v14 = vld [vmem:[%s15701_s1 + $0x1390] sm:$0xff]   ;;  %v12573_v15 = vld [vmem:[%s15701_s1 + $0x1358] sm:$0xff]  }
 0x245   :  { %11477 = vmatpush3.bf16.msra.mxu1 %v12531_v13  ;;  %8995 = vmatprep.mubr.bf16.mxu1 %v713_v7  ;;  %v12571_v13 = vld [vmem:[%s15701_s1 + $0x13d0] sm:$0xff]   ;;  %v12607_v7 = vld [vmem:[%s15701_s1 + $0x1418] sm:$0xff]  }
 0x246   :  { %11478 = vmatprep.subr.bf16.mxu1 %v12534_v18  ;;  %v12576_v18 = vld [vmem:[%s15701_s1 + $0x1398] sm:$0xff]  }
 0x247   :  { %11457 = vmatpush3.bf16.msra.mxu0 %v12533_v17  ;;  %v12575_v17 = vld [vmem:[%s15701_s1 + $0x13d8] sm:$0xff]  }
 0x248   :  { %11458 = vmatprep.subr.bf16.mxu0 %v12536_v20  ;;  %v12578_v20 = vld [vmem:[%s15701_s1 + $0x1320] sm:$0xff]  }
 0x249   :  { %11479 = vmatpush3.bf16.msra.mxu1 %v12535_v19  ;;  %v12577_v19 = vld [vmem:[%s15701_s1 + $0x1360] sm:$0xff]  }
 0x24a   :  { %11480 = vmatprep.subr.bf16.mxu1 %v12538_v22  ;;  %v12580_v22 = vld [vmem:[%s15701_s1 + $0x13a0] sm:$0xff]  }
 0x24b   :  { %11459 = vmatpush3.bf16.msra.mxu0 %v12537_v21  ;;  %v12579_v21 = vld [vmem:[%s15701_s1 + $0x13e0] sm:$0xff]  }
 0x24c   :  { %11460 = vmatprep.subr.bf16.mxu0 %v12540_v24 }
 0x24d   :  { %11481 = vmatpush3.bf16.msra.mxu1 %v12539_v23  ;;  %v12581_v23 = vld [vmem:[%s15701_s1 + $0x1368] sm:$0xff]  }
 0x24e   :  { %11482 = vmatprep.subr.bf16.mxu1 %v12542_v26 }
 0x24f   :  { %11461 = vmatpush3.bf16.msra.mxu0 %v12541_v25  ;;  %v12582_v25 = vld [vmem:[%s15701_s1 + $0x1328] sm:$0xff]  }
 0x250   :  { %11462 = vmatprep.subr.bf16.mxu0 %v12544_v28 }
 0x251   :  { %11483 = vmatpush3.bf16.msra.mxu1 %v12543_v27  ;;  %v12583_v27 = vld [vmem:[%s15701_s1 + $0x13e8] sm:$0xff]  }
 0x252   :  { %11484 = vmatprep.subr.bf16.mxu1 %v12546_v30 }
 0x253   :  { %11463 = vmatpush3.bf16.msra.mxu0 %v12545_v29 }
 0x254   :  { %11464 = vmatprep.subr.bf16.mxu0 %v12548_v32  ;;  %v12585_v32 = vld [vmem:[%s15701_s1 + $0x1370] sm:$0xff]  }
 0x255   :  { %v11162_v34 = vpop.f32.mrb[44].mxu0  ;;  %11485 = vmatpush3.bf16.msra.mxu1 %v12547_v31  ;;  %v12584_v31 = vld [vmem:[%s15701_s1 + $0x13a8] sm:$0xff]  }
 0x256   :  { %v11163_v36 = vpop.f32.mrb[45].mxu0  ;;  %11486 = vmatprep.subr.bf16.mxu1 %v12550_v35 }
 0x257   :  { %v11184_v37 = vpop.f32.mrb[44].mxu1  ;;  %v11164_v38 = vadd.f32 %v11163_v36, %v11162_v34  ;;  %v11165_v39 = vpop.f32.mrb[46].mxu0  ;;  %11465 = vmatpush3.bf16.msra.mxu0 %v12549_v33 }
 0x258   :  { %v11185_v40 = vpop.f32.mrb[45].mxu1  ;;  %v11166_v44 = vpop.f32.mrb[47].mxu0  ;;  %11466 = vmatprep.subr.bf16.mxu0 %v12552_v43  ;;  %v12587_v39 = vld [vmem:[%s15701_s1 + $0x13f0] sm:$0xff]  }
 0x259   :  { %v11186_v45 = vadd.f32 %v11185_v40, %v11184_v37  ;;  %v8398_v47 = vadd.f32 %v11164_v38, %v14707_v61  ;;  %v11187_v49 = vpop.f32.mrb[46].mxu1  ;;  %11487 = vmatpush3.bf16.msra.mxu1 %v12551_v42  ;;  %v403_v61 = vcombine.high %v395_v57, %v395_v57  ;;  %v12586_v37 = vld [vmem:[%s15701_s1 + $0x1330] sm:$0xff]   ;;  %v12589_v44 = vld [vmem:[%s15701_s1 + $0x1378] sm:$0xff]  }
 0x25a   :  { %v11188_v52 = vpop.f32.mrb[47].mxu1  ;;  %11488 = vmatprep.subr.bf16.mxu1 %v12554_v48  ;;  %v12588_v43 = vld [vmem:[%s15701_s1 + $0x13b0] sm:$0xff]   ;;  %v12592_v49 = vld [vmem:[%s15701_s1 + $0x13b8] sm:$0xff]  }
 0x25b   :  { %v14808_v50 = vadd.f32 %v11186_v45, %v8398_v47  ;;  %11467 = vmatpush3.bf16.msra.mxu0 %v12553_v46  ;;  %v711_v2 = vpack.c.bf16 %v403_v61, %v403_v61  ;;  %v12590_v45 = vld [vmem:[%s15701_s1 + $0x1338] sm:$0xff]   ;;  %v12598_v61 = vld [vmem:[%s15701_s1 + $0x1448] sm:$0xff]  }
 0x25c   :  { %11468 = vmatprep.subr.bf16.mxu0 %v12556_v53  ;;  %v12591_v46 = vld [vmem:[%s15701_s1 + $0x13f8] sm:$0xff]  }
 0x25d   :  { %11489 = vmatpush3.bf16.msra.mxu1 %v12555_v51  ;;  %8955 = vmatprep.mubr.bf16.mxu0 %v711_v2  ;;  %v47_v47 = vld [vmem:[%s15700_s0 + $0x98] sm:$0xff]  ;;  %v12593_v51 = vld [vmem:[%s15701_s1 + $0x1440] sm:$0xff]   ;;  %v12602_v2 = vld [vmem:[%s15701_s1 + $0x1450] sm:$0xff]  }
 0x25e   :  { %11490 = vmatprep.subr.bf16.mxu1 %v12558_v55  ;;  %v412_v48 = vrot.slane %v47_v47, %v12976_v41 }
 0x25f   :  { %11469 = vmatpush3.bf16.msra.mxu0 %v12557_v54  ;;  %v12595_v54 = vld [vmem:[%s15701_s1 + $0x1400] sm:$0xff]  }
 0x260   :  { %11498 = vmatprep.subr.bf16.mxu0 %v12560_v60  ;;  %v420_v52 = vcombine.high %v412_v48, %v412_v48  ;;  %v714_v55 = vpack.c.bf16 %v412_v48, %v412_v48 }
 0x261   :  { %11491 = vmatpush3.bf16.msra.mxu1 %v12559_v58 }
 0x262   :  { %11520 = vmatprep.subr.bf16.mxu1 %v12563_v1  ;;  %8956 = vmatmul.mubr.bf16.vlgmr.msra.gmra.mrb[72].mxu0 %v710_v0  ;;  %v715_v57 = vpack.c.bf16 %v420_v52, %v420_v52  ;;  %v12600_v0 = vld [vmem:[%s15701_s1 + $0x14c8] sm:$0xff]  }
 0x263   :  { %11499 = vmatpush3.bf16.msra.mxu0 %v12562_v63  ;;  %v12599_v63 = vld [vmem:[%s15701_s1 + $0x1408] sm:$0xff]  }
 0x264   :  { %8996 = vmatmul.mubr.bf16.vlgmr.msra.gmra.mrb[72].mxu1 %v712_v5  ;;  %11500 = vmatprep.subr.bf16.mxu0 %v12565_v6  ;;  %v12601_v1 = vld [vmem:[%s15701_s1 + $0x1488] sm:$0xff]   ;;  %v12605_v5 = vld [vmem:[%s15701_s1 + $0x1490] sm:$0xff]   ;;  %v12606_v6 = vld [vmem:[%s15701_s1 + $0x1458] sm:$0xff]  }
 0x265   :  { %11521 = vmatpush3.bf16.msra.mxu1 %v12564_v4  ;;  %9035 = vmatprep.mubr.bf16.mxu0 %v715_v57  ;;  %v12604_v4 = vld [vmem:[%s15701_s1 + $0x14d0] sm:$0xff]   ;;  %v12631_v52 = vld [vmem:[%s15701_s1 + $0x1548] sm:$0xff]  }
 0x266   :  { %11522 = vmatprep.subr.bf16.mxu1 %v12567_v9  ;;  %v12609_v9 = vld [vmem:[%s15701_s1 + $0x1498] sm:$0xff]   ;;  %v12635_v57 = vld [vmem:[%s15701_s1 + $0x1550] sm:$0xff]  }
 0x267   :  { %11501 = vmatpush3.bf16.msra.mxu0 %v12566_v8  ;;  %v12608_v8 = vld [vmem:[%s15701_s1 + $0x14d8] sm:$0xff]  }
 0x268   :  { %11502 = vmatprep.subr.bf16.mxu0 %v12569_v11  ;;  %v12611_v11 = vld [vmem:[%s15701_s1 + $0x1420] sm:$0xff]  }
 0x269   :  { %11523 = vmatpush3.bf16.msra.mxu1 %v12568_v10  ;;  %v12610_v10 = vld [vmem:[%s15701_s1 + $0x1460] sm:$0xff]  }
 0x26a   :  { %11524 = vmatprep.subr.bf16.mxu1 %v12571_v13  ;;  %v12613_v13 = vld [vmem:[%s15701_s1 + $0x14a0] sm:$0xff]  }
 0x26b   :  { %11503 = vmatpush3.bf16.msra.mxu0 %v12570_v12  ;;  %v12612_v12 = vld [vmem:[%s15701_s1 + $0x14e0] sm:$0xff]  }
 0x26c   :  { %11504 = vmatprep.subr.bf16.mxu0 %v12573_v15 }
 0x26d   :  { %11525 = vmatpush3.bf16.msra.mxu1 %v12572_v14  ;;  %v12614_v14 = vld [vmem:[%s15701_s1 + $0x1468] sm:$0xff]  }
 0x26e   :  { %11526 = vmatprep.subr.bf16.mxu1 %v12575_v17 }
 0x26f   :  { %11505 = vmatpush3.bf16.msra.mxu0 %v12574_v16  ;;  %v12615_v16 = vld [vmem:[%s15701_s1 + $0x1428] sm:$0xff]  }
 0x270   :  { %11506 = vmatprep.subr.bf16.mxu0 %v12577_v19 }
 0x271   :  { %11527 = vmatpush3.bf16.msra.mxu1 %v12576_v18  ;;  %v12616_v18 = vld [vmem:[%s15701_s1 + $0x14e8] sm:$0xff]  }
 0x272   :  { %11528 = vmatprep.subr.bf16.mxu1 %v12579_v21 }
 0x273   :  { %11507 = vmatpush3.bf16.msra.mxu0 %v12578_v20 }
 0x274   :  { %11508 = vmatprep.subr.bf16.mxu0 %v12581_v23  ;;  %v12618_v23 = vld [vmem:[%s15701_s1 + $0x1470] sm:$0xff]  }
 0x275   :  { %v11206_v24 = vpop.f32.mrb[48].mxu0  ;;  %11529 = vmatpush3.bf16.msra.mxu1 %v12580_v22  ;;  %v12617_v22 = vld [vmem:[%s15701_s1 + $0x14a8] sm:$0xff]  }
 0x276   :  { %v11207_v26 = vpop.f32.mrb[49].mxu0  ;;  %11530 = vmatprep.subr.bf16.mxu1 %v12583_v27 }
 0x277   :  { %v11208_v28 = vadd.f32 %v11207_v26, %v11206_v24  ;;  %v11209_v29 = vpop.f32.mrb[50].mxu0  ;;  %v11228_v30 = vpop.f32.mrb[48].mxu1  ;;  %11509 = vmatpush3.bf16.msra.mxu0 %v12582_v25 }
 0x278   :  { %v11210_v33 = vpop.f32.mrb[51].mxu0  ;;  %v11229_v34 = vpop.f32.mrb[49].mxu1  ;;  %11510 = vmatprep.subr.bf16.mxu0 %v12585_v32 }
 0x279   :  { %v8478_v35 = vadd.f32 %v11208_v28, %v14808_v50  ;;  %v11230_v36 = vadd.f32 %v11229_v34, %v11228_v30  ;;  %v11231_v38 = vpop.f32.mrb[50].mxu1  ;;  %11531 = vmatpush3.bf16.msra.mxu1 %v12584_v31  ;;  %v405_v50 = vcombine.high %v47_v47, %v47_v47  ;;  %v12619_v28 = vld [vmem:[%s15701_s1 + $0x1430] sm:$0xff]   ;;  %v12622_v34 = vld [vmem:[%s15701_s1 + $0x1478] sm:$0xff]   ;;  %v12629_v47 = vld [vmem:[%s15701_s1 + $0x15c0] sm:$0xff]  }
 0x27a   :  { %v11232_v40 = vpop.f32.mrb[51].mxu1  ;;  %11532 = vmatprep.subr.bf16.mxu1 %v12587_v39  ;;  %v12620_v30 = vld [vmem:[%s15701_s1 + $0x14f0] sm:$0xff]   ;;  %v12625_v39 = vld [vmem:[%s15701_s1 + $0x14b8] sm:$0xff]  }
 0x27b   :  { %v14912_v42 = vadd.f32 %v11230_v36, %v8478_v35  ;;  %11511 = vmatpush3.bf16.msra.mxu0 %v12586_v37  ;;  %v419_v53 = vrot.slane %v405_v50, %v12976_v41  ;;  %v12621_v33 = vld [vmem:[%s15701_s1 + $0x14b0] sm:$0xff]   ;;  %v12623_v35 = vld [vmem:[%s15701_s1 + $0x1438] sm:$0xff]   ;;  %v48_v37 = vld [vmem:[%s15700_s0 + $0xa0] sm:$0xff] }
 0x27c   :  { %11512 = vmatprep.subr.bf16.mxu0 %v12589_v44  ;;  %v12624_v36 = vld [vmem:[%s15701_s1 + $0x14f8] sm:$0xff]   ;;  %v429_v38 = vrot.slane %v48_v37, %v12976_v41  ;;  %v422_v40 = vcombine.high %v48_v37, %v48_v37  ;;  %v12630_v50 = vld [vmem:[%s15701_s1 + $0x1580] sm:$0xff]  }
 0x27d   :  { %11533 = vmatpush3.bf16.msra.mxu1 %v12588_v43  ;;  %v421_v58 = vcombine.high %v419_v53, %v419_v53  ;;  %v716_v60 = vpack.c.bf16 %v419_v53, %v419_v53  ;;  %v12662_v37 = vld [vmem:[%s15701_s1 + $0x16c0] sm:$0xff]  }
 0x27e   :  { %11534 = vmatprep.subr.bf16.mxu1 %v12591_v46  ;;  %v437_v43 = vcombine.high %v429_v38, %v429_v38  ;;  %v436_v44 = vrot.slane %v422_v40, %v12976_v41  ;;  %v718_v46 = vpack.c.bf16 %v429_v38, %v429_v38  ;;  %v12663_v40 = vld [vmem:[%s15701_s1 + $0x1680] sm:$0xff]  }
 0x27f   :  { %11513 = vmatpush3.bf16.msra.mxu0 %v12590_v45  ;;  %v717_v62 = vpack.c.bf16 %v421_v58, %v421_v58  ;;  %v12628_v45 = vld [vmem:[%s15701_s1 + $0x1500] sm:$0xff]   ;;  %v12636_v58 = vld [vmem:[%s15701_s1 + $0x1510] sm:$0xff]  }
 0x280   :  { %11542 = vmatprep.subr.bf16.mxu0 %v12593_v51  ;;  %v719_v48 = vpack.c.bf16 %v437_v43, %v437_v43  ;;  %v720_v51 = vpack.c.bf16 %v436_v44, %v436_v44  ;;  %v12664_v43 = vld [vmem:[%s15701_s1 + $0x1648] sm:$0xff]  }
 0x281   :  { %11535 = vmatpush3.bf16.msra.mxu1 %v12592_v49  ;;  %9075 = vmatprep.mubr.bf16.mxu1 %v717_v62  ;;  %v438_v49 = vcombine.high %v436_v44, %v436_v44  ;;  %v12640_v62 = vld [vmem:[%s15701_s1 + $0x1518] sm:$0xff]  }
 0x282   :  { %11564 = vmatprep.subr.bf16.mxu1 %v12596_v56  ;;  %9036 = vmatmul.mubr.bf16.vlgmr.msra.gmra.mrb[76].mxu0 %v714_v55  ;;  %v12633_v55 = vld [vmem:[%s15701_s1 + $0x15c8] sm:$0xff]  }
 0x283   :  { %11543 = vmatpush3.bf16.msra.mxu0 %v12595_v54  ;;  %9115 = vmatprep.mubr.bf16.mxu0 %v719_v48  ;;  %v721_v53 = vpack.c.bf16 %v438_v49, %v438_v49  ;;  %v12632_v54 = vld [vmem:[%s15701_s1 + $0x1508] sm:$0xff]   ;;  %v12668_v48 = vld [vmem:[%s15701_s1 + $0x1650] sm:$0xff]  }
 0x284   :  { %9076 = vmatmul.mubr.bf16.vlgmr.msra.gmra.mrb[76].mxu1 %v716_v60  ;;  %11544 = vmatprep.subr.bf16.mxu0 %v12598_v61  ;;  %v12634_v56 = vld [vmem:[%s15701_s1 + $0x1588] sm:$0xff]   ;;  %v12638_v60 = vld [vmem:[%s15701_s1 + $0x1590] sm:$0xff]   ;;  %v12639_v61 = vld [vmem:[%s15701_s1 + $0x1558] sm:$0xff]  }
 0x285   :  { %11565 = vmatpush3.bf16.msra.mxu1 %v12597_v59  ;;  %9155 = vmatprep.mubr.bf16.mxu1 %v721_v53  ;;  %v12637_v59 = vld [vmem:[%s15701_s1 + $0x15d0] sm:$0xff]   ;;  %v12673_v53 = vld [vmem:[%s15701_s1 + $0x1618] sm:$0xff]  }
 0x286   :  { %11566 = vmatprep.subr.bf16.mxu1 %v12600_v0  ;;  %v12642_v0 = vld [vmem:[%s15701_s1 + $0x1598] sm:$0xff]   ;;  %v12669_v49 = vld [vmem:[%s15701_s1 + $0x1610] sm:$0xff]  }
 0x287   :  { %11545 = vmatpush3.bf16.msra.mxu0 %v12599_v63  ;;  %v12641_v63 = vld [vmem:[%s15701_s1 + $0x15d8] sm:$0xff]  }
 0x288   :  { %11546 = vmatprep.subr.bf16.mxu0 %v12602_v2  ;;  %v12644_v2 = vld [vmem:[%s15701_s1 + $0x1520] sm:$0xff]  }
 0x289   :  { %11567 = vmatpush3.bf16.msra.mxu1 %v12601_v1  ;;  %v12643_v1 = vld [vmem:[%s15701_s1 + $0x1560] sm:$0xff]  }
 0x28a   :  { %11568 = vmatprep.subr.bf16.mxu1 %v12604_v4  ;;  %v12646_v4 = vld [vmem:[%s15701_s1 + $0x15a0] sm:$0xff]  }
 0x28b   :  { %11547 = vmatpush3.bf16.msra.mxu0 %v12603_v3  ;;  %v12645_v3 = vld [vmem:[%s15701_s1 + $0x15e0] sm:$0xff]  }
 0x28c   :  { %11548 = vmatprep.subr.bf16.mxu0 %v12606_v6 }
 0x28d   :  { %11569 = vmatpush3.bf16.msra.mxu1 %v12605_v5  ;;  %v12647_v5 = vld [vmem:[%s15701_s1 + $0x1568] sm:$0xff]  }
 0x28e   :  { %11570 = vmatprep.subr.bf16.mxu1 %v12608_v8 }
 0x28f   :  { %11549 = vmatpush3.bf16.msra.mxu0 %v12607_v7  ;;  %v12648_v7 = vld [vmem:[%s15701_s1 + $0x1528] sm:$0xff]  }
 0x290   :  { %11550 = vmatprep.subr.bf16.mxu0 %v12610_v10 }
 0x291   :  { %11571 = vmatpush3.bf16.msra.mxu1 %v12609_v9  ;;  %v12649_v9 = vld [vmem:[%s15701_s1 + $0x15e8] sm:$0xff]  }
 0x292   :  { %11572 = vmatprep.subr.bf16.mxu1 %v12612_v12 }
 0x293   :  { %11551 = vmatpush3.bf16.msra.mxu0 %v12611_v11 }
 0x294   :  { %11552 = vmatprep.subr.bf16.mxu0 %v12614_v14 }
 0x295   :  { %v11250_v15 = vpop.f32.mrb[52].mxu0  ;;  %11573 = vmatpush3.bf16.msra.mxu1 %v12613_v13 }
 0x296   :  { %v11251_v17 = vpop.f32.mrb[53].mxu0  ;;  %11574 = vmatprep.subr.bf16.mxu1 %v12616_v18 }
 0x297   :  { %v11252_v19 = vadd.f32 %v11251_v17, %v11250_v15  ;;  %v11253_v20 = vpop.f32.mrb[54].mxu0  ;;  %v11272_v21 = vpop.f32.mrb[52].mxu1  ;;  %11553 = vmatpush3.bf16.msra.mxu0 %v12615_v16  ;;  %v12650_v15 = vld [vmem:[%s15701_s1 + $0x15a8] sm:$0xff]   ;;  %v12651_v16 = vld [vmem:[%s15701_s1 + $0x1570] sm:$0xff]  }
 0x298   :  { %v11254_v24 = vpop.f32.mrb[55].mxu0  ;;  %v11273_v25 = vpop.f32.mrb[53].mxu1  ;;  %11554 = vmatprep.subr.bf16.mxu0 %v12618_v23 }
 0x299   :  { %v8558_v26 = vadd.f32 %v11252_v19, %v14912_v42  ;;  %v11274_v27 = vadd.f32 %v11273_v25, %v11272_v21  ;;  %v11275_v29 = vpop.f32.mrb[54].mxu1  ;;  %11575 = vmatpush3.bf16.msra.mxu1 %v12617_v22  ;;  %v12626_v42 = vld [vmem:[%s15701_s1 + $0x1540] sm:$0xff]   ;;  %v12652_v19 = vld [vmem:[%s15701_s1 + $0x1530] sm:$0xff]   ;;  %v12655_v25 = vld [vmem:[%s15701_s1 + $0x1578] sm:$0xff]  }
 0x29a   :  { %v11276_v31 = vpop.f32.mrb[55].mxu1  ;;  %11576 = vmatprep.subr.bf16.mxu1 %v12620_v30  ;;  %v12653_v22 = vld [vmem:[%s15701_s1 + $0x15f0] sm:$0xff]   ;;  %v12658_v30 = vld [vmem:[%s15701_s1 + $0x15b8] sm:$0xff]  }
 0x29b   :  { %v15016_v32 = vadd.f32 %v11274_v27, %v8558_v26  ;;  %11555 = vmatpush3.bf16.msra.mxu0 %v12619_v28  ;;  %v12654_v24 = vld [vmem:[%s15701_s1 + $0x15b0] sm:$0xff]   ;;  %v12656_v26 = vld [vmem:[%s15701_s1 + $0x1538] sm:$0xff]   ;;  %v49_v28 = vld [vmem:[%s15700_s0 + $0xa8] sm:$0xff] }
 0x29c   :  { %11556 = vmatprep.subr.bf16.mxu0 %v12622_v34  ;;  %v12657_v27 = vld [vmem:[%s15701_s1 + $0x15f8] sm:$0xff]   ;;  %v446_v29 = vrot.slane %v49_v28, %v12976_v41  ;;  %v439_v31 = vcombine.high %v49_v28, %v49_v28  ;;  %v12695_v28 = vld [vmem:[%s15701_s1 + $0x17c0] sm:$0xff]  }
 0x29d   :  { %11577 = vmatpush3.bf16.msra.mxu1 %v12621_v33 }
 0x29e   :  { %11578 = vmatprep.subr.bf16.mxu1 %v12624_v36  ;;  %v454_v33 = vcombine.high %v446_v29, %v446_v29  ;;  %v453_v34 = vrot.slane %v439_v31, %v12976_v41  ;;  %v722_v36 = vpack.c.bf16 %v446_v29, %v446_v29  ;;  %v12696_v31 = vld [vmem:[%s15701_s1 + $0x1780] sm:$0xff]  }
 0x29f   :  { %11557 = vmatpush3.bf16.msra.mxu0 %v12623_v35  ;;  %v12661_v35 = vld [vmem:[%s15701_s1 + $0x1600] sm:$0xff]  }
 0x2a0   :  { %11586 = vmatprep.subr.bf16.mxu0 %v12626_v42  ;;  %v723_v38 = vpack.c.bf16 %v454_v33, %v454_v33  ;;  %v724_v42 = vpack.c.bf16 %v453_v34, %v453_v34  ;;  %v12697_v33 = vld [vmem:[%s15701_s1 + $0x1748] sm:$0xff]  }
 0x2a1   :  { %11579 = vmatpush3.bf16.msra.mxu1 %v12625_v39  ;;  %v455_v39 = vcombine.high %v453_v34, %v453_v34 }
 0x2a2   :  { %9116 = vmatmul.mubr.bf16.vlgmr.msra.gmra.mrb[80].mxu0 %v718_v46  ;;  %11608 = vmatprep.subr.bf16.mxu1 %v12629_v47  ;;  %v12666_v46 = vld [vmem:[%s15701_s1 + $0x16c8] sm:$0xff]  }
 0x2a3   :  { %11587 = vmatpush3.bf16.msra.mxu0 %v12628_v45  ;;  %9195 = vmatprep.mubr.bf16.mxu0 %v723_v38  ;;  %v725_v44 = vpack.c.bf16 %v455_v39, %v455_v39  ;;  %v12665_v45 = vld [vmem:[%s15701_s1 + $0x1608] sm:$0xff]   ;;  %v12701_v38 = vld [vmem:[%s15701_s1 + $0x1750] sm:$0xff]  }
 0x2a4   :  { %9156 = vmatmul.mubr.bf16.vlgmr.msra.gmra.mrb[80].mxu1 %v720_v51  ;;  %11588 = vmatprep.subr.bf16.mxu0 %v12631_v52  ;;  %v12667_v47 = vld [vmem:[%s15701_s1 + $0x1688] sm:$0xff]   ;;  %v12671_v51 = vld [vmem:[%s15701_s1 + $0x1690] sm:$0xff]   ;;  %v12672_v52 = vld [vmem:[%s15701_s1 + $0x1658] sm:$0xff]  }
 0x2a5   :  { %11609 = vmatpush3.bf16.msra.mxu1 %v12630_v50  ;;  %9235 = vmatprep.mubr.bf16.mxu1 %v725_v44  ;;  %v12670_v50 = vld [vmem:[%s15701_s1 + $0x16d0] sm:$0xff]   ;;  %v12706_v44 = vld [vmem:[%s15701_s1 + $0x1718] sm:$0xff]  }
 0x2a6   :  { %11610 = vmatprep.subr.bf16.mxu1 %v12633_v55  ;;  %v12675_v55 = vld [vmem:[%s15701_s1 + $0x1698] sm:$0xff]   ;;  %v12702_v39 = vld [vmem:[%s15701_s1 + $0x1710] sm:$0xff]  }
 0x2a7   :  { %11589 = vmatpush3.bf16.msra.mxu0 %v12632_v54  ;;  %v12674_v54 = vld [vmem:[%s15701_s1 + $0x16d8] sm:$0xff]  }
 0x2a8   :  { %11590 = vmatprep.subr.bf16.mxu0 %v12635_v57  ;;  %v12677_v57 = vld [vmem:[%s15701_s1 + $0x1620] sm:$0xff]  }
 0x2a9   :  { %11611 = vmatpush3.bf16.msra.mxu1 %v12634_v56  ;;  %v12676_v56 = vld [vmem:[%s15701_s1 + $0x1660] sm:$0xff]  }
 0x2aa   :  { %11612 = vmatprep.subr.bf16.mxu1 %v12637_v59  ;;  %v12679_v59 = vld [vmem:[%s15701_s1 + $0x16a0] sm:$0xff]  }
 0x2ab   :  { %11591 = vmatpush3.bf16.msra.mxu0 %v12636_v58  ;;  %v12678_v58 = vld [vmem:[%s15701_s1 + $0x16e0] sm:$0xff]  }
 0x2ac   :  { %11592 = vmatprep.subr.bf16.mxu0 %v12639_v61 }
 0x2ad   :  { %11613 = vmatpush3.bf16.msra.mxu1 %v12638_v60  ;;  %v12680_v60 = vld [vmem:[%s15701_s1 + $0x1668] sm:$0xff]  }
 0x2ae   :  { %11614 = vmatprep.subr.bf16.mxu1 %v12641_v63 }
 0x2af   :  { %11593 = vmatpush3.bf16.msra.mxu0 %v12640_v62  ;;  %v12681_v62 = vld [vmem:[%s15701_s1 + $0x1628] sm:$0xff]  }
 0x2b0   :  { %11594 = vmatprep.subr.bf16.mxu0 %v12643_v1 }
 0x2b1   :  { %11615 = vmatpush3.bf16.msra.mxu1 %v12642_v0  ;;  %v12682_v0 = vld [vmem:[%s15701_s1 + $0x16e8] sm:$0xff]  }
 0x2b2   :  { %11616 = vmatprep.subr.bf16.mxu1 %v12645_v3 }
 0x2b3   :  { %11595 = vmatpush3.bf16.msra.mxu0 %v12644_v2 }
 0x2b4   :  { %11596 = vmatprep.subr.bf16.mxu0 %v12647_v5  ;;  %v12684_v5 = vld [vmem:[%s15701_s1 + $0x1670] sm:$0xff]  }
 0x2b5   :  { %v11294_v6 = vpop.f32.mrb[56].mxu0  ;;  %11617 = vmatpush3.bf16.msra.mxu1 %v12646_v4  ;;  %v12683_v4 = vld [vmem:[%s15701_s1 + $0x16a8] sm:$0xff]  }
 0x2b6   :  { %v11295_v8 = vpop.f32.mrb[57].mxu0  ;;  %11618 = vmatprep.subr.bf16.mxu1 %v12649_v9 }
 0x2b7   :  { %v11296_v10 = vadd.f32 %v11295_v8, %v11294_v6  ;;  %v11297_v11 = vpop.f32.mrb[58].mxu0  ;;  %v11316_v12 = vpop.f32.mrb[56].mxu1  ;;  %11597 = vmatpush3.bf16.msra.mxu0 %v12648_v7 }
 0x2b8   :  { %v11298_v13 = vpop.f32.mrb[59].mxu0  ;;  %v11317_v14 = vpop.f32.mrb[57].mxu1  ;;  %11598 = vmatprep.subr.bf16.mxu0 %v12651_v16  ;;  %v12688_v16 = vld [vmem:[%s15701_s1 + $0x1678] sm:$0xff]  }
 0x2b9   :  { %v8638_v17 = vadd.f32 %v11296_v10, %v15016_v32  ;;  %v11318_v18 = vadd.f32 %v11317_v14, %v11316_v12  ;;  %v11319_v20 = vpop.f32.mrb[58].mxu1  ;;  %11619 = vmatpush3.bf16.msra.mxu1 %v12650_v15  ;;  %v12659_v32 = vld [vmem:[%s15701_s1 + $0x1640] sm:$0xff]   ;;  %v12685_v10 = vld [vmem:[%s15701_s1 + $0x1630] sm:$0xff]  }
 0x2ba   :  { %v11320_v23 = vpop.f32.mrb[59].mxu1  ;;  %11620 = vmatprep.subr.bf16.mxu1 %v12653_v22  ;;  %v12686_v12 = vld [vmem:[%s15701_s1 + $0x16f0] sm:$0xff]  }
 0x2bb   :  { %v15117_v21 = vadd.f32 %v11318_v18, %v8638_v17  ;;  %11599 = vmatpush3.bf16.msra.mxu0 %v12652_v19  ;;  %v12687_v15 = vld [vmem:[%s15701_s1 + $0x16b0] sm:$0xff]   ;;  %v12689_v17 = vld [vmem:[%s15701_s1 + $0x1638] sm:$0xff]   ;;  %v12692_v23 = vld [vmem:[%s15701_s1 + $0x1740] sm:$0xff]  }
 0x2bc   :  { %11600 = vmatprep.subr.bf16.mxu0 %v12655_v25  ;;  %v12690_v18 = vld [vmem:[%s15701_s1 + $0x16f8] sm:$0xff]   ;;  %v50_v19 = vld [vmem:[%s15700_s0 + $0xb0] sm:$0xff] }
 0x2bd   :  { %11621 = vmatpush3.bf16.msra.mxu1 %v12654_v24  ;;  %v463_v20 = vrot.slane %v50_v19, %v12976_v41  ;;  %v456_v22 = vcombine.high %v50_v19, %v50_v19  ;;  %v12728_v19 = vld [vmem:[%s15701_s1 + $0x18c0] sm:$0xff]  }
 0x2be   :  { %11622 = vmatprep.subr.bf16.mxu1 %v12657_v27 }
 0x2bf   :  { %11601 = vmatpush3.bf16.msra.mxu0 %v12656_v26  ;;  %v471_v24 = vcombine.high %v463_v20, %v463_v20  ;;  %v470_v25 = vrot.slane %v456_v22, %v12976_v41  ;;  %v12694_v26 = vld [vmem:[%s15701_s1 + $0x1700] sm:$0xff]   ;;  %v726_v27 = vpack.c.bf16 %v463_v20, %v463_v20 }
 0x2c0   :  { %11630 = vmatprep.subr.bf16.mxu0 %v12659_v32  ;;  %v12729_v22 = vld [vmem:[%s15701_s1 + $0x1880] sm:$0xff]  }
 0x2c1   :  { %11623 = vmatpush3.bf16.msra.mxu1 %v12658_v30  ;;  %v727_v29 = vpack.c.bf16 %v471_v24, %v471_v24  ;;  %v472_v30 = vcombine.high %v470_v25, %v470_v25  ;;  %v728_v32 = vpack.c.bf16 %v470_v25, %v470_v25  ;;  %v12730_v24 = vld [vmem:[%s15701_s1 + $0x1848] sm:$0xff]  }
 0x2c2   :  { %11652 = vmatprep.subr.bf16.mxu1 %v12662_v37  ;;  %9196 = vmatmul.mubr.bf16.vlgmr.msra.gmra.mrb[84].mxu0 %v722_v36  ;;  %v12699_v36 = vld [vmem:[%s15701_s1 + $0x17c8] sm:$0xff]  }
 0x2c3   :  { %11631 = vmatpush3.bf16.msra.mxu0 %v12661_v35  ;;  %9275 = vmatprep.mubr.bf16.mxu0 %v727_v29  ;;  %v729_v34 = vpack.c.bf16 %v472_v30, %v472_v30  ;;  %v12698_v35 = vld [vmem:[%s15701_s1 + $0x1708] sm:$0xff]   ;;  %v12734_v29 = vld [vmem:[%s15701_s1 + $0x1850] sm:$0xff]  }
 0x2c4   :  { %9236 = vmatmul.mubr.bf16.vlgmr.msra.gmra.mrb[84].mxu1 %v724_v42  ;;  %11632 = vmatprep.subr.bf16.mxu0 %v12664_v43  ;;  %v12700_v37 = vld [vmem:[%s15701_s1 + $0x1788] sm:$0xff]   ;;  %v12704_v42 = vld [vmem:[%s15701_s1 + $0x1790] sm:$0xff]   ;;  %v12705_v43 = vld [vmem:[%s15701_s1 + $0x1758] sm:$0xff]  }
 0x2c5   :  { %11653 = vmatpush3.bf16.msra.mxu1 %v12663_v40  ;;  %9315 = vmatprep.mubr.bf16.mxu1 %v729_v34  ;;  %v12703_v40 = vld [vmem:[%s15701_s1 + $0x17d0] sm:$0xff]   ;;  %v12739_v34 = vld [vmem:[%s15701_s1 + $0x1818] sm:$0xff]  }
 0x2c6   :  { %11654 = vmatprep.subr.bf16.mxu1 %v12666_v46  ;;  %v12708_v46 = vld [vmem:[%s15701_s1 + $0x1798] sm:$0xff]   ;;  %v12735_v30 = vld [vmem:[%s15701_s1 + $0x1810] sm:$0xff]  }
 0x2c7   :  { %11633 = vmatpush3.bf16.msra.mxu0 %v12665_v45  ;;  %v12707_v45 = vld [vmem:[%s15701_s1 + $0x17d8] sm:$0xff]  }
 0x2c8   :  { %11634 = vmatprep.subr.bf16.mxu0 %v12668_v48  ;;  %v12710_v48 = vld [vmem:[%s15701_s1 + $0x1720] sm:$0xff]  }
 0x2c9   :  { %11655 = vmatpush3.bf16.msra.mxu1 %v12667_v47  ;;  %v12709_v47 = vld [vmem:[%s15701_s1 + $0x1760] sm:$0xff]  }
 0x2ca   :  { %11656 = vmatprep.subr.bf16.mxu1 %v12670_v50  ;;  %v12712_v50 = vld [vmem:[%s15701_s1 + $0x17a0] sm:$0xff]  }
 0x2cb   :  { %11635 = vmatpush3.bf16.msra.mxu0 %v12669_v49  ;;  %v12711_v49 = vld [vmem:[%s15701_s1 + $0x17e0] sm:$0xff]  }
 0x2cc   :  { %11636 = vmatprep.subr.bf16.mxu0 %v12672_v52 }
 0x2cd   :  { %11657 = vmatpush3.bf16.msra.mxu1 %v12671_v51  ;;  %v12713_v51 = vld [vmem:[%s15701_s1 + $0x1768] sm:$0xff]  }
 0x2ce   :  { %11658 = vmatprep.subr.bf16.mxu1 %v12674_v54 }
 0x2cf   :  { %11637 = vmatpush3.bf16.msra.mxu0 %v12673_v53  ;;  %v12714_v53 = vld [vmem:[%s15701_s1 + $0x1728] sm:$0xff]  }
 0x2d0   :  { %11638 = vmatprep.subr.bf16.mxu0 %v12676_v56 }
 0x2d1   :  { %11659 = vmatpush3.bf16.msra.mxu1 %v12675_v55  ;;  %v12715_v55 = vld [vmem:[%s15701_s1 + $0x17e8] sm:$0xff]  }
 0x2d2   :  { %11660 = vmatprep.subr.bf16.mxu1 %v12678_v58 }
 0x2d3   :  { %11639 = vmatpush3.bf16.msra.mxu0 %v12677_v57 }
 0x2d4   :  { %11640 = vmatprep.subr.bf16.mxu0 %v12680_v60  ;;  %v12717_v60 = vld [vmem:[%s15701_s1 + $0x1770] sm:$0xff]  }
 0x2d5   :  { %v11338_v61 = vpop.f32.mrb[60].mxu0  ;;  %11661 = vmatpush3.bf16.msra.mxu1 %v12679_v59  ;;  %v12716_v59 = vld [vmem:[%s15701_s1 + $0x17a8] sm:$0xff]  }
 0x2d6   :  { %v11339_v63 = vpop.f32.mrb[61].mxu0  ;;  %11662 = vmatprep.subr.bf16.mxu1 %v12682_v0 }
 0x2d7   :  { %v11340_v1 = vadd.f32 %v11339_v63, %v11338_v61  ;;  %v11341_v2 = vpop.f32.mrb[62].mxu0  ;;  %v11360_v3 = vpop.f32.mrb[60].mxu1  ;;  %11641 = vmatpush3.bf16.msra.mxu0 %v12681_v62 }
 0x2d8   :  { %v11342_v6 = vpop.f32.mrb[63].mxu0  ;;  %v11361_v7 = vpop.f32.mrb[61].mxu1  ;;  %11642 = vmatprep.subr.bf16.mxu0 %v12684_v5 }
 0x2d9   :  { %v8718_v8 = vadd.f32 %v11340_v1, %v15117_v21  ;;  %v11362_v9 = vadd.f32 %v11361_v7, %v11360_v3  ;;  %v11363_v11 = vpop.f32.mrb[62].mxu1  ;;  %11663 = vmatpush3.bf16.msra.mxu1 %v12683_v4  ;;  %v12691_v21 = vld [vmem:[%s15701_s1 + $0x16b8] sm:$0xff]   ;;  %v12718_v1 = vld [vmem:[%s15701_s1 + $0x1730] sm:$0xff]  }
 0x2da   :  { %v11364_v13 = vpop.f32.mrb[63].mxu1  ;;  %11664 = vmatprep.subr.bf16.mxu1 %v12686_v12  ;;  %v12719_v3 = vld [vmem:[%s15701_s1 + $0x17f0] sm:$0xff]   ;;  %v12721_v7 = vld [vmem:[%s15701_s1 + $0x1778] sm:$0xff]  }
 0x2db   :  { %v15224_v14 = vadd.f32 %v11362_v9, %v8718_v8  ;;  %11643 = vmatpush3.bf16.msra.mxu0 %v12685_v10  ;;  %v12720_v6 = vld [vmem:[%s15701_s1 + $0x17b0] sm:$0xff]   ;;  %v12722_v8 = vld [vmem:[%s15701_s1 + $0x1738] sm:$0xff]  }
 0x2dc   :  { %11644 = vmatprep.subr.bf16.mxu0 %v12688_v16  ;;  %v12723_v9 = vld [vmem:[%s15701_s1 + $0x17f8] sm:$0xff]  }
 0x2dd   :  { %11665 = vmatpush3.bf16.msra.mxu1 %v12687_v15  ;;  %v51_v10 = vld [vmem:[%s15700_s0 + $0xb8] sm:$0xff] }
 0x2de   :  { %11666 = vmatprep.subr.bf16.mxu1 %v12690_v18  ;;  %v480_v11 = vrot.slane %v51_v10, %v12976_v41  ;;  %v12724_v12 = vld [vmem:[%s15701_s1 + $0x17b8] sm:$0xff]   ;;  %v473_v13 = vcombine.high %v51_v10, %v51_v10  ;;  %v12761_v10 = vld [vmem:[%s15701_s1 + $0x19c0] sm:$0xff]  }
 0x2df   :  { %11645 = vmatpush3.bf16.msra.mxu0 %v12689_v17  ;;  %v12727_v17 = vld [vmem:[%s15701_s1 + $0x1800] sm:$0xff]  }
 0x2e0   :  { %11674 = vmatprep.subr.bf16.mxu0 %v12692_v23  ;;  %v488_v15 = vcombine.high %v480_v11, %v480_v11  ;;  %v487_v16 = vrot.slane %v473_v13, %v12976_v41  ;;  %v730_v18 = vpack.c.bf16 %v480_v11, %v480_v11  ;;  %v12762_v13 = vld [vmem:[%s15701_s1 + $0x1980] sm:$0xff]  }
 0x2e1   :  { %11667 = vmatpush3.bf16.msra.mxu1 %v12691_v21 }
 0x2e2   :  { %11696 = vmatprep.subr.bf16.mxu1 %v12695_v28  ;;  %9276 = vmatmul.mubr.bf16.vlgmr.msra.gmra.mrb[88].mxu0 %v726_v27  ;;  %v731_v20 = vpack.c.bf16 %v488_v15, %v488_v15  ;;  %v489_v21 = vcombine.high %v487_v16, %v487_v16  ;;  %v732_v23 = vpack.c.bf16 %v487_v16, %v487_v16  ;;  %v12732_v27 = vld [vmem:[%s15701_s1 + $0x18c8] sm:$0xff]  }
 0x2e3   :  { %11675 = vmatpush3.bf16.msra.mxu0 %v12694_v26  ;;  %v12731_v26 = vld [vmem:[%s15701_s1 + $0x1808] sm:$0xff]  }
 0x2e4   :  { %9316 = vmatmul.mubr.bf16.vlgmr.msra.gmra.mrb[88].mxu1 %v728_v32  ;;  %11676 = vmatprep.subr.bf16.mxu0 %v12697_v33  ;;  %v733_v25 = vpack.c.bf16 %v489_v21, %v489_v21  ;;  %v12733_v28 = vld [vmem:[%s15701_s1 + $0x1888] sm:$0xff]   ;;  %v12737_v32 = vld [vmem:[%s15701_s1 + $0x1890] sm:$0xff]   ;;  %v12738_v33 = vld [vmem:[%s15701_s1 + $0x1858] sm:$0xff]  }
 0x2e5   :  { %11697 = vmatpush3.bf16.msra.mxu1 %v12696_v31  ;;  %9355 = vmatprep.mubr.bf16.mxu0 %v731_v20  ;;  %v12736_v31 = vld [vmem:[%s15701_s1 + $0x18d0] sm:$0xff]   ;;  %v12763_v15 = vld [vmem:[%s15701_s1 + $0x1948] sm:$0xff]  }
 0x2e6   :  { %11698 = vmatprep.subr.bf16.mxu1 %v12699_v36  ;;  %9395 = vmatprep.mubr.bf16.mxu1 %v733_v25  ;;  %v12741_v36 = vld [vmem:[%s15701_s1 + $0x1898] sm:$0xff]   ;;  %v12767_v20 = vld [vmem:[%s15701_s1 + $0x1950] sm:$0xff]  }
 0x2e7   :  { %11677 = vmatpush3.bf16.msra.mxu0 %v12698_v35  ;;  %v12740_v35 = vld [vmem:[%s15701_s1 + $0x18d8] sm:$0xff]   ;;  %v12768_v21 = vld [vmem:[%s15701_s1 + $0x1910] sm:$0xff]  }
 0x2e8   :  { %11678 = vmatprep.subr.bf16.mxu0 %v12701_v38  ;;  %v12743_v38 = vld [vmem:[%s15701_s1 + $0x1820] sm:$0xff]   ;;  %v12772_v25 = vld [vmem:[%s15701_s1 + $0x1918] sm:$0xff]  }
 0x2e9   :  { %11699 = vmatpush3.bf16.msra.mxu1 %v12700_v37  ;;  %v12742_v37 = vld [vmem:[%s15701_s1 + $0x1860] sm:$0xff]  }
 0x2ea   :  { %11700 = vmatprep.subr.bf16.mxu1 %v12703_v40  ;;  %v12745_v40 = vld [vmem:[%s15701_s1 + $0x18a0] sm:$0xff]  }
 0x2eb   :  { %11679 = vmatpush3.bf16.msra.mxu0 %v12702_v39  ;;  %v12744_v39 = vld [vmem:[%s15701_s1 + $0x18e0] sm:$0xff]  }
 0x2ec   :  { %11680 = vmatprep.subr.bf16.mxu0 %v12705_v43 }
 0x2ed   :  { %11701 = vmatpush3.bf16.msra.mxu1 %v12704_v42  ;;  %v12746_v42 = vld [vmem:[%s15701_s1 + $0x1868] sm:$0xff]  }
 0x2ee   :  { %11702 = vmatprep.subr.bf16.mxu1 %v12707_v45 }
 0x2ef   :  { %11681 = vmatpush3.bf16.msra.mxu0 %v12706_v44  ;;  %v12747_v44 = vld [vmem:[%s15701_s1 + $0x1828] sm:$0xff]  }
 0x2f0   :  { %11682 = vmatprep.subr.bf16.mxu0 %v12709_v47 }
 0x2f1   :  { %11703 = vmatpush3.bf16.msra.mxu1 %v12708_v46  ;;  %v12748_v46 = vld [vmem:[%s15701_s1 + $0x18e8] sm:$0xff]  }
 0x2f2   :  { %11704 = vmatprep.subr.bf16.mxu1 %v12711_v49 }
 0x2f3   :  { %11683 = vmatpush3.bf16.msra.mxu0 %v12710_v48 }
 0x2f4   :  { %11684 = vmatprep.subr.bf16.mxu0 %v12713_v51 }
 0x2f5   :  { %v11382_v52 = vpop.f32.mrb[64].mxu0  ;;  %11705 = vmatpush3.bf16.msra.mxu1 %v12712_v50 }
 0x2f6   :  { %v11383_v54 = vpop.f32.mrb[65].mxu0  ;;  %11706 = vmatprep.subr.bf16.mxu1 %v12715_v55 }
 0x2f7   :  { %v11384_v56 = vadd.f32 %v11383_v54, %v11382_v52  ;;  %v11385_v57 = vpop.f32.mrb[66].mxu0  ;;  %v11404_v58 = vpop.f32.mrb[64].mxu1  ;;  %11685 = vmatpush3.bf16.msra.mxu0 %v12714_v53  ;;  %v12749_v52 = vld [vmem:[%s15701_s1 + $0x18a8] sm:$0xff]   ;;  %v12750_v53 = vld [vmem:[%s15701_s1 + $0x1870] sm:$0xff]  }
 0x2f8   :  { %v11386_v61 = vpop.f32.mrb[67].mxu0  ;;  %v11405_v62 = vpop.f32.mrb[65].mxu1  ;;  %11686 = vmatprep.subr.bf16.mxu0 %v12717_v60 }
 0x2f9   :  { %v8798_v63 = vadd.f32 %v11384_v56, %v15224_v14  ;;  %v11406_v0 = vadd.f32 %v11405_v62, %v11404_v58  ;;  %v11407_v2 = vpop.f32.mrb[66].mxu1  ;;  %11707 = vmatpush3.bf16.msra.mxu1 %v12716_v59  ;;  %v12725_v14 = vld [vmem:[%s15701_s1 + $0x1840] sm:$0xff]   ;;  %v12751_v56 = vld [vmem:[%s15701_s1 + $0x1830] sm:$0xff]   ;;  %v12754_v62 = vld [vmem:[%s15701_s1 + $0x1878] sm:$0xff]  }
 0x2fa   :  { %v11408_v4 = vpop.f32.mrb[67].mxu1  ;;  %11708 = vmatprep.subr.bf16.mxu1 %v12719_v3  ;;  %v12752_v59 = vld [vmem:[%s15701_s1 + $0x18f0] sm:$0xff]   ;;  %v12757_v3 = vld [vmem:[%s15701_s1 + $0x18b8] sm:$0xff]  }
 0x2fb   :  { %v15328_v5 = vadd.f32 %v11406_v0, %v8798_v63  ;;  %11687 = vmatpush3.bf16.msra.mxu0 %v12718_v1  ;;  %v12753_v61 = vld [vmem:[%s15701_s1 + $0x18b0] sm:$0xff]   ;;  %v12755_v63 = vld [vmem:[%s15701_s1 + $0x1838] sm:$0xff]   ;;  %v52_v1 = vld [vmem:[%s15700_s0 + $0xc0] sm:$0xff] }
 0x2fc   :  { %11688 = vmatprep.subr.bf16.mxu0 %v12721_v7  ;;  %v12756_v0 = vld [vmem:[%s15701_s1 + $0x18f8] sm:$0xff]   ;;  %v497_v2 = vrot.slane %v52_v1, %v12976_v41  ;;  %v490_v4 = vcombine.high %v52_v1, %v52_v1 }
 0x2fd   :  { %11709 = vmatpush3.bf16.msra.mxu1 %v12720_v6 }
 0x2fe   :  { %11710 = vmatprep.subr.bf16.mxu1 %v12723_v9  ;;  %v505_v6 = vcombine.high %v497_v2, %v497_v2  ;;  %v504_v7 = vrot.slane %v490_v4, %v12976_v41  ;;  %v734_v9 = vpack.c.bf16 %v497_v2, %v497_v2  ;;  %v12792_v2 = vld [vmem:[%s15701_s1 + $0x1a00] sm:$0xff]  }
 0x2ff   :  { %11689 = vmatpush3.bf16.msra.mxu0 %v12722_v8  ;;  %v12760_v8 = vld [vmem:[%s15701_s1 + $0x1900] sm:$0xff]  }
 0x300   :  { %11718 = vmatprep.subr.bf16.mxu0 %v12725_v14  ;;  %v735_v11 = vpack.c.bf16 %v505_v6, %v505_v6  ;;  %v736_v14 = vpack.c.bf16 %v504_v7, %v504_v7 }
 0x301   :  { %11711 = vmatpush3.bf16.msra.mxu1 %v12724_v12  ;;  %v506_v12 = vcombine.high %v504_v7, %v504_v7 }
 0x302   :  { %9356 = vmatmul.mubr.bf16.vlgmr.msra.gmra.mrb[92].mxu0 %v730_v18  ;;  %11740 = vmatprep.subr.bf16.mxu1 %v12728_v19  ;;  %v12765_v18 = vld [vmem:[%s15701_s1 + $0x19c8] sm:$0xff]  }
 0x303   :  { %11719 = vmatpush3.bf16.msra.mxu0 %v12727_v17  ;;  %9435 = vmatprep.mubr.bf16.mxu0 %v735_v11  ;;  %v737_v16 = vpack.c.bf16 %v506_v12, %v506_v12  ;;  %v12764_v17 = vld [vmem:[%s15701_s1 + $0x1908] sm:$0xff]  }
 0x304   :  { %9396 = vmatmul.mubr.bf16.vlgmr.msra.gmra.mrb[92].mxu1 %v732_v23  ;;  %11720 = vmatprep.subr.bf16.mxu0 %v12730_v24  ;;  %v12766_v19 = vld [vmem:[%s15701_s1 + $0x1988] sm:$0xff]   ;;  %v12770_v23 = vld [vmem:[%s15701_s1 + $0x1990] sm:$0xff]   ;;  %v12771_v24 = vld [vmem:[%s15701_s1 + $0x1958] sm:$0xff]  }
 0x305   :  { %11741 = vmatpush3.bf16.msra.mxu1 %v12729_v22  ;;  %9475 = vmatprep.mubr.bf16.mxu1 %v737_v16  ;;  %v12769_v22 = vld [vmem:[%s15701_s1 + $0x19d0] sm:$0xff]  }
 0x306   :  { %11742 = vmatprep.subr.bf16.mxu1 %v12732_v27  ;;  %v12774_v27 = vld [vmem:[%s15701_s1 + $0x1998] sm:$0xff]  }
 0x307   :  { %11721 = vmatpush3.bf16.msra.mxu0 %v12731_v26  ;;  %v12773_v26 = vld [vmem:[%s15701_s1 + $0x19d8] sm:$0xff]  }
 0x308   :  { %11722 = vmatprep.subr.bf16.mxu0 %v12734_v29  ;;  %v12776_v29 = vld [vmem:[%s15701_s1 + $0x1920] sm:$0xff]  }
 0x309   :  { %11743 = vmatpush3.bf16.msra.mxu1 %v12733_v28  ;;  %v12775_v28 = vld [vmem:[%s15701_s1 + $0x1960] sm:$0xff]  }
 0x30a   :  { %11744 = vmatprep.subr.bf16.mxu1 %v12736_v31  ;;  %v12778_v31 = vld [vmem:[%s15701_s1 + $0x19a0] sm:$0xff]  }
 0x30b   :  { %11723 = vmatpush3.bf16.msra.mxu0 %v12735_v30  ;;  %v12777_v30 = vld [vmem:[%s15701_s1 + $0x19e0] sm:$0xff]  }
 0x30c   :  { %11724 = vmatprep.subr.bf16.mxu0 %v12738_v33 }
 0x30d   :  { %11745 = vmatpush3.bf16.msra.mxu1 %v12737_v32  ;;  %v12779_v32 = vld [vmem:[%s15701_s1 + $0x1968] sm:$0xff]  }
 0x30e   :  { %11746 = vmatprep.subr.bf16.mxu1 %v12740_v35 }
 0x30f   :  { %11725 = vmatpush3.bf16.msra.mxu0 %v12739_v34  ;;  %v12780_v34 = vld [vmem:[%s15701_s1 + $0x1928] sm:$0xff]  }
 0x310   :  { %11726 = vmatprep.subr.bf16.mxu0 %v12742_v37 }
 0x311   :  { %11747 = vmatpush3.bf16.msra.mxu1 %v12741_v36  ;;  %v12781_v36 = vld [vmem:[%s15701_s1 + $0x19e8] sm:$0xff]  }
 0x312   :  { %11748 = vmatprep.subr.bf16.mxu1 %v12744_v39 }
 0x313   :  { %11727 = vmatpush3.bf16.msra.mxu0 %v12743_v38 }
 0x314   :  { %11728 = vmatprep.subr.bf16.mxu0 %v12746_v42  ;;  %v12783_v42 = vld [vmem:[%s15701_s1 + $0x1970] sm:$0xff]  }
 0x315   :  { %v11426_v43 = vpop.f32.mrb[68].mxu0  ;;  %11749 = vmatpush3.bf16.msra.mxu1 %v12745_v40  ;;  %v12782_v40 = vld [vmem:[%s15701_s1 + $0x19a8] sm:$0xff]  }
 0x316   :  { %v11427_v45 = vpop.f32.mrb[69].mxu0  ;;  %11750 = vmatprep.subr.bf16.mxu1 %v12748_v46 }
 0x317   :  { %v11428_v47 = vadd.f32 %v11427_v45, %v11426_v43  ;;  %v11429_v48 = vpop.f32.mrb[70].mxu0  ;;  %v11448_v49 = vpop.f32.mrb[68].mxu1  ;;  %11729 = vmatpush3.bf16.msra.mxu0 %v12747_v44 }
 0x318   :  { %v11430_v50 = vpop.f32.mrb[71].mxu0  ;;  %v11449_v51 = vpop.f32.mrb[69].mxu1  ;;  %11730 = vmatprep.subr.bf16.mxu0 %v12750_v53  ;;  %v12787_v53 = vld [vmem:[%s15701_s1 + $0x1978] sm:$0xff]  }
 0x319   :  { %v8878_v54 = vadd.f32 %v11428_v47, %v15328_v5  ;;  %v11450_v55 = vadd.f32 %v11449_v51, %v11448_v49  ;;  %v11451_v57 = vpop.f32.mrb[70].mxu1  ;;  %11751 = vmatpush3.bf16.msra.mxu1 %v12749_v52  ;;  %v12758_v5 = vld [vmem:[%s15701_s1 + $0x1940] sm:$0xff]   ;;  %v12784_v47 = vld [vmem:[%s15701_s1 + $0x1930] sm:$0xff]  }
 0x31a   :  { %v11452_v60 = vpop.f32.mrb[71].mxu1  ;;  %11752 = vmatprep.subr.bf16.mxu1 %v12752_v59  ;;  %v12785_v49 = vld [vmem:[%s15701_s1 + $0x19f0] sm:$0xff]   ;;  %v12790_v59 = vld [vmem:[%s15701_s1 + $0x19b8] sm:$0xff]  }
 0x31b   :  { %v15429_v58 = vadd.f32 %v11450_v55, %v8878_v54  ;;  %11731 = vmatpush3.bf16.msra.mxu0 %v12751_v56  ;;  %v12786_v52 = vld [vmem:[%s15701_s1 + $0x19b0] sm:$0xff]   ;;  %v12788_v54 = vld [vmem:[%s15701_s1 + $0x1938] sm:$0xff]   ;;  %v53_v56 = vld [vmem:[%s15700_s0 + $0xc8] sm:$0xff] }
 0x31c   :  { %11732 = vmatprep.subr.bf16.mxu0 %v12754_v62  ;;  %v12789_v55 = vld [vmem:[%s15701_s1 + $0x19f8] sm:$0xff]   ;;  %v514_v57 = vrot.slane %v53_v56, %v12976_v41 }
 0x31d   :  { %11753 = vmatpush3.bf16.msra.mxu1 %v12753_v61 }
 0x31e   :  { %11754 = vmatprep.subr.bf16.mxu1 %v12756_v0  ;;  %v522_v60 = vcombine.high %v514_v57, %v514_v57  ;;  %v738_v62 = vpack.c.bf16 %v514_v57, %v514_v57  ;;  %v12826_v0 = vmov 0  }
 0x31f   :  { %11733 = vmatpush3.bf16.msra.mxu0 %v12755_v63 }
 0x320   :  { %11762 = vmatprep.subr.bf16.mxu0 %v12758_v5  ;;  %v739_v63 = vpack.c.bf16 %v522_v60, %v522_v60  ;;  %v9813_v5 = vld.sshfl [vmem:[%s15700_s0 + $0xd0] sm:$0x33 pattern:$0x76325410] }
 0x321   :  { %11755 = vmatpush3.bf16.msra.mxu1 %v12757_v3  ;;  %v531_v6 = vcombine.high %v9813_v5, %v9813_v5 }
 0x322   :  { %11784 = vmatprep.subr.bf16.mxu1 %v12761_v10  ;;  %9436 = vmatmul.mubr.bf16.vlgmr.msra.gmra.mrb[96].mxu0 %v734_v9 }
 0x323   :  { %11763 = vmatpush3.bf16.msra.mxu0 %v12760_v8  ;;  %9515 = vmatprep.mubr.bf16.mxu0 %v739_v63 }
 0x324   :  { %9476 = vmatmul.mubr.bf16.vlgmr.msra.gmra.mrb[96].mxu1 %v736_v14  ;;  %11764 = vmatprep.subr.bf16.mxu0 %v12763_v15 }
 0x325   :  { %11785 = vmatpush3.bf16.msra.mxu1 %v12762_v13 }
 0x326   :  { %11786 = vmatprep.subr.bf16.mxu1 %v12765_v18 }
 0x327   :  { %11765 = vmatpush3.bf16.msra.mxu0 %v12764_v17 }
 0x328   :  { %11766 = vmatprep.subr.bf16.mxu0 %v12767_v20 }
 0x329   :  { %11787 = vmatpush3.bf16.msra.mxu1 %v12766_v19 }
 0x32a   :  { %11788 = vmatprep.subr.bf16.mxu1 %v12769_v22 }
 0x32b   :  { %11767 = vmatpush3.bf16.msra.mxu0 %v12768_v21 }
 0x32c   :  { %11768 = vmatprep.subr.bf16.mxu0 %v12771_v24 }
 0x32d   :  { %11789 = vmatpush3.bf16.msra.mxu1 %v12770_v23 }
 0x32e   :  { %11790 = vmatprep.subr.bf16.mxu1 %v12773_v26 }
 0x32f   :  { %11769 = vmatpush3.bf16.msra.mxu0 %v12772_v25 }
 0x330   :  { %11770 = vmatprep.subr.bf16.mxu0 %v12775_v28 }
 0x331   :  { %11791 = vmatpush3.bf16.msra.mxu1 %v12774_v27 }
 0x332   :  { %11792 = vmatprep.subr.bf16.mxu1 %v12777_v30 }
 0x333   :  { %11771 = vmatpush3.bf16.msra.mxu0 %v12776_v29 }
 0x334   :  { %11772 = vmatprep.subr.bf16.mxu0 %v12779_v32 }
 0x335   :  { %v11470_v33 = vpop.f32.mrb[72].mxu0  ;;  %11793 = vmatpush3.bf16.msra.mxu1 %v12778_v31 }
 0x336   :  { %v11471_v35 = vpop.f32.mrb[73].mxu0  ;;  %11794 = vmatprep.subr.bf16.mxu1 %v12781_v36 }
 0x337   :  { %v11472_v37 = vadd.f32 %v11471_v35, %v11470_v33  ;;  %v11473_v38 = vpop.f32.mrb[74].mxu0  ;;  %v11492_v39 = vpop.f32.mrb[72].mxu1  ;;  %11773 = vmatpush3.bf16.msra.mxu0 %v12780_v34 }
 0x338   :  { %v11474_v43 = vpop.f32.mrb[75].mxu0  ;;  %v11493_v44 = vpop.f32.mrb[73].mxu1  ;;  %11774 = vmatprep.subr.bf16.mxu0 %v12783_v42 }
 0x339   :  { %v8958_v45 = vadd.f32 %v11472_v37, %v15429_v58  ;;  %v11494_v46 = vadd.f32 %v11493_v44, %v11492_v39  ;;  %v11495_v48 = vpop.f32.mrb[74].mxu1  ;;  %11795 = vmatpush3.bf16.msra.mxu1 %v12782_v40  ;;  %v507_v58 = vcombine.high %v53_v56, %v53_v56 }
 0x33a   :  { %v11496_v50 = vpop.f32.mrb[75].mxu1  ;;  %11796 = vmatprep.subr.bf16.mxu1 %v12785_v49 }
 0x33b   :  { %v8998_v51 = vadd.f32 %v11494_v46, %v8958_v45  ;;  %11775 = vmatpush3.bf16.msra.mxu0 %v12784_v47  ;;  %v521_v61 = vrot.slane %v507_v58, %v12976_v41  ;;  %v12793_v41 = vld [vmem:[%s15701_s1 + $0x1a08] sm:$0xff]  }
 0x33c   :  { %11776 = vmatprep.subr.bf16.mxu0 %v12787_v53 }
 0x33d   :  { %11797 = vmatpush3.bf16.msra.mxu1 %v12786_v52  ;;  %v523_v1 = vcombine.high %v521_v61, %v521_v61  ;;  %v740_v3 = vpack.c.bf16 %v521_v61, %v521_v61 }
 0x33e   :  { %11798 = vmatprep.subr.bf16.mxu1 %v12789_v55 }
 0x33f   :  { %11777 = vmatpush3.bf16.msra.mxu0 %v12788_v54  ;;  %v741_v4 = vpack.c.bf16 %v523_v1, %v523_v1 }
 0x340   :  { %9563 = vmatprep.subr.bf16.mxu0 %v12826_v0 }
 0x341   :  { %11799 = vmatpush3.bf16.msra.mxu1 %v12790_v59  ;;  %9555 = vmatprep.mubr.bf16.mxu1 %v741_v4 }
 0x342   :  { %9516 = vmatmul.mubr.bf16.vlgmr.msra.gmra.mrb[100].mxu0 %v738_v62 }
 0x343   :  { %9564 = vmatpush1.bf16.msra.mxu0 %v12792_v2 }
 0x344   :  { %9556 = vmatmul.mubr.bf16.vlgmr.msra.gmra.mrb[100].mxu1 %v740_v3  ;;  %9565 = vmatprep.subr.bf16.mxu0 %v12826_v0 }
 0x345   :  { %12 = vsyncpa [#allocation3], 0  ;;  %vm7479_vm0 = vcmask 130048   ;;  %v12794_v7 = vld [vmem:[%s15701_s1 + $0x1a10] sm:$0xff]   ;;  %v743_v8 = vpack.c.bf16 %v531_v6, %v531_v6  ;;  %v12795_v9 = vld [vmem:[%s15701_s1 + $0x1a18] sm:$0xff]   ;;  %v742_v27 = vpack.c.bf16 %v9813_v5, %v9813_v5  ;;  %v12827_v56 = vmov 0.0|0.0  }
 0x346   :  { %v12796_v10 = vld [vmem:[%s15701_s1 + $0x1a20] sm:$0xff]   ;;  %v12797_v16 = vld [vmem:[%s15701_s1 + $0x1a28] sm:$0xff]   ;;  %v12798_v24 = vld [vmem:[%s15701_s1 + $0x1a30] sm:$0xff]   ;;  %11892 = vmatprep.subr.bf16.mxu1 %v12827_v56  ;;  %vm12829_vm1 = vmmov 0   ;;  %vm9626_vm2 = vcmask 982016   ;;  %vm9723_vm3 = vcmask 1043456  }
 0x347   :  { %9566 = vmatpush1.bf16.msra.mxu0 %v12793_v41  ;;  %10656 = vmatprep.mubr.msk.bf16.mxu0 %vm7479_vm0, %v743_v8  ;;  %v12799_v25 = vld [vmem:[%s15701_s1 + $0x1a38] sm:$0xff]   ;;  %v12800_v26 = vld [vmem:[%s15701_s1 + $0x1a40] sm:$0xff]   ;;  %v9605_v54 = vld [vmem:[%s15703_s3 + $0x8] sm:$0xff]  ;;  %vm9719_vm4 = vcmask 687104   ;;  %s12830_s10 = smov [#allocation2]   ;;  %vm9797_vm5 = vcmask 9216  }
 0x348   :  { %9567 = vmatprep.subr.bf16.mxu0 %v12826_v0  ;;  %v9604_v53 = vld [vmem:[%s15703_s3] sm:$0xff]  ;;  %v9606_v55 = vld [vmem:[%s15703_s3 + $0x10] sm:$0xff]  ;;  %v9607_v58 = vld [vmem:[%s15703_s3 + $0x18] sm:$0xff] }
 0x349   :  { %v11893_v57 = vpack.c.bf16 %v9605_v54, %v9604_v53  ;;  %v11896_v59 = vpack.c.bf16 %v9607_v58, %v9606_v55  ;;  %v9608_v60 = vld [vmem:[%s15703_s3 + $0x20] sm:$0xff]  ;;  %v9609_v61 = vld [vmem:[%s15703_s3 + $0x28] sm:$0xff]  ;;  %v9610_v63 = vld [vmem:[%s15703_s3 + $0x30] sm:$0xff] }
 0x34a   :  { %v11899_v62 = vpack.c.bf16 %v9609_v61, %v9608_v60  ;;  %v9612_v2 = vld [vmem:[%s15703_s3 + $0x40] sm:$0xff]  ;;  %v9613_v3 = vld [vmem:[%s15703_s3 + $0x48] sm:$0xff]  ;;  %v9614_v41 = vld [vmem:[%s15703_s3 + $0x50] sm:$0xff] }
 0x34b   :  { %9568 = vmatpush1.bf16.msra.mxu0 %v12794_v7  ;;  %11894 = vmatpush3.bf16.msra.mxu1 %v11893_v57  ;;  %v11905_v4 = vpack.c.bf16 %v9613_v3, %v9612_v2  ;;  %v9615_v5 = vld [vmem:[%s15703_s3 + $0x58] sm:$0xff] }
 0x34c   :  { %9569 = vmatprep.subr.bf16.mxu0 %v12826_v0  ;;  %11895 = vmatprep.subr.bf16.mxu1 %v12827_v56  ;;  %v11908_v6 = vpack.c.bf16 %v9615_v5, %v9614_v41 }
 0x34f   :  { %9570 = vmatpush1.bf16.msra.mxu0 %v12795_v9  ;;  %11897 = vmatpush3.bf16.msra.mxu1 %v11896_v59 }
 0x350   :  { %9571 = vmatprep.subr.bf16.mxu0 %v12826_v0  ;;  %11898 = vmatprep.subr.bf16.mxu1 %v12827_v56 }
 0x353   :  { %9572 = vmatpush1.bf16.msra.mxu0 %v12796_v10  ;;  %11900 = vmatpush3.bf16.msra.mxu1 %v11899_v62  ;;  %v9701_v62 = vld [vmem:[%s15705_s5] sm:$0xff] }
 0x354   :  { %9573 = vmatprep.subr.bf16.mxu0 %v12826_v0  ;;  %11901 = vmatprep.subr.bf16.mxu1 %v12827_v56 }
 0x355   :  { %v11514_v11 = vpop.f32.mrb[76].mxu0 }
 0x356   :  { %v11515_v12 = vpop.f32.mrb[77].mxu0 }
 0x357   :  { %v11516_v13 = vadd.f32 %v11515_v12, %v11514_v11  ;;  %v11517_v14 = vpop.f32.mrb[78].mxu0  ;;  %v11536_v15 = vpop.f32.mrb[76].mxu1  ;;  %9574 = vmatpush1.bf16.msra.mxu0 %v12797_v16 }
 0x358   :  { %v11518_v17 = vpop.f32.mrb[79].mxu0  ;;  %v11537_v18 = vpop.f32.mrb[77].mxu1  ;;  %9575 = vmatprep.subr.bf16.mxu0 %v12826_v0  ;;  %v9616_v14 = vld [vmem:[%s15703_s3 + $0x60] sm:$0xff] }
 0x359   :  { %v9038_v19 = vadd.f32 %v11516_v13, %v8998_v51  ;;  %v11538_v20 = vadd.f32 %v11537_v18, %v11536_v15  ;;  %v11539_v21 = vpop.f32.mrb[78].mxu1  ;;  %v9617_v15 = vld [vmem:[%s15703_s3 + $0x68] sm:$0xff] }
 0x35a   :  { %v11540_v22 = vpop.f32.mrb[79].mxu1 }
 0x35b   :  { %v9078_v23 = vadd.f32 %v11538_v20, %v9038_v19  ;;  %9576 = vmatpush1.bf16.msra.mxu0 %v12798_v24  ;;  %v11911_v19 = vpack.c.bf16 %v9617_v15, %v9616_v14  ;;  %v12828_v22 = vmov 0.0   ;;  %v9709_v15 = vld [vmem:[%s15705_s5 + $0x40] sm:$0xff] }
 0x35c   :  { %9577 = vmatprep.subr.bf16.mxu0 %v12826_v0  ;;  %11864 = vmatprep.mubr.msk.f32.mxu1 %vm12829_vm1, %v12828_v22 }
 0x35f   :  { %9578 = vmatpush1.bf16.msra.mxu0 %v12799_v25 }
 0x360   :  { %9579 = vmatprep.subr.bf16.mxu0 %v12826_v0  ;;  %v9611_v0 = vld [vmem:[%s15703_s3 + $0x38] sm:$0xff] }
 0x361   :  { %v11902_v1 = vpack.c.bf16 %v9611_v0, %v9610_v63  ;;  %v9702_v63 = vld [vmem:[%s15705_s5 + $0x8] sm:$0xff] }
 0x363   :  { %9580 = vmatpush1.bf16.msra.mxu0 %v12800_v26  ;;  %11903 = vmatpush3.bf16.msra.mxu1 %v11902_v1 }
 0x364   :  { %11904 = vmatprep.subr.bf16.mxu1 %v12827_v56 }
 0x366   :  { %9596 = vmatmul.mubr.bf16.vlgmr.msra.gmra.mrb[104].mxu0 %v742_v27 }
 0x367   :  { %11906 = vmatpush3.bf16.msra.mxu1 %v11905_v4  ;;  %v11914_v4 = vpack.c.bf16 %v9702_v63, %v9701_v62 }
 0x368   :  { %11907 = vmatprep.subr.bf16.mxu1 %v12827_v56 }
 0x36b   :  { %11909 = vmatpush3.bf16.msra.mxu1 %v11908_v6  ;;  %v9703_v6 = vld [vmem:[%s15705_s5 + $0x10] sm:$0xff] }
 0x36c   :  { %11910 = vmatprep.subr.bf16.mxu1 %v12827_v56 }
 0x36f   :  { %11912 = vmatpush3.bf16.msra.mxu1 %v11911_v19 }
 0x370   :  { %11862 = vmatprep.subr.mxu1 %v12828_v22 }
 0x375   :  { %v11558_v28 = vpop.f32.mrb[80].mxu0 }
 0x376   :  { %v11559_v29 = vpop.f32.mrb[81].mxu0 }
 0x377   :  { %v11560_v30 = vadd.f32 %v11559_v29, %v11558_v28  ;;  %v11561_v31 = vpop.f32.mrb[82].mxu0  ;;  %v11580_v32 = vpop.f32.mrb[80].mxu1 }
 0x378   :  { %v11562_v33 = vpop.f32.mrb[83].mxu0  ;;  %v11581_v34 = vpop.f32.mrb[81].mxu1 }
 0x379   :  { %v9118_v35 = vadd.f32 %v11560_v30, %v9078_v23  ;;  %v11582_v36 = vadd.f32 %v11581_v34, %v11580_v32  ;;  %v11583_v37 = vpop.f32.mrb[82].mxu1  ;;  %v9618_v23 = vld [vmem:[%s15703_s3 + $0x70] sm:$0xff]  ;;  %s9805_s3 = sshll.u32 %s12830_s10, 4  ;;  %s9806_s3 = int_to_ptr.vmem [resolvable:$true] %s9805_s3 }
 0x37a   :  { %v11584_v38 = vpop.f32.mrb[83].mxu1  ;;  %11863 = vmatpush3.msra.mxu1 %v9618_v23  ;;  %p12806_p1 = scmp.lt.s32.totalorder %s9806_s3, %s9806_s3 }
 0x37b   :  { %v9158_v39 = vadd.f32 %v11582_v36, %v9118_v35  ;;  %11913 = vmatprep.subr.bf16.mxu1 %v12827_v56 }
 0x395   :  { %v11602_v40 = vpop.f32.mrb[84].mxu0 }
 0x396   :  { %v11603_v42 = vpop.f32.mrb[85].mxu0 }
 0x397   :  { %v11604_v43 = vadd.f32 %v11603_v42, %v11602_v40  ;;  %v11605_v44 = vpop.f32.mrb[86].mxu0  ;;  %v11624_v45 = vpop.f32.mrb[84].mxu1 }
 0x398   :  { %v11606_v46 = vpop.f32.mrb[87].mxu0  ;;  %v11625_v47 = vpop.f32.mrb[85].mxu1 }
 0x399   :  { %v9198_v48 = vadd.f32 %v11604_v43, %v9158_v39  ;;  %v11626_v49 = vadd.f32 %v11625_v47, %v11624_v45  ;;  %v11627_v50 = vpop.f32.mrb[86].mxu1 }
 0x39a   :  { %v11628_v51 = vpop.f32.mrb[87].mxu1 }
 0x39b   :  { %v9238_v52 = vadd.f32 %v11626_v49, %v9198_v48 }
 0x3b5   :  { %v11646_v7 = vpop.f32.mrb[88].mxu0 }
 0x3b6   :  { %v11647_v8 = vpop.f32.mrb[89].mxu0 }
 0x3b7   :  { %v11648_v9 = vadd.f32 %v11647_v8, %v11646_v7  ;;  %v11649_v10 = vpop.f32.mrb[90].mxu0  ;;  %v11668_v11 = vpop.f32.mrb[88].mxu1  ;;  %v9704_v7 = vld [vmem:[%s15705_s5 + $0x18] sm:$0xff] }
 0x3b8   :  { %v11650_v12 = vpop.f32.mrb[91].mxu0  ;;  %v11669_v13 = vpop.f32.mrb[89].mxu1  ;;  %v11917_v8 = vpack.c.bf16 %v9704_v7, %v9703_v6  ;;  %v9706_v10 = vld [vmem:[%s15705_s5 + $0x28] sm:$0xff] }
 0x3b9   :  { %v9278_v16 = vadd.f32 %v11648_v9, %v9238_v52  ;;  %v11670_v17 = vadd.f32 %v11669_v13, %v11668_v11  ;;  %v11671_v18 = vpop.f32.mrb[90].mxu1  ;;  %v9705_v9 = vld [vmem:[%s15705_s5 + $0x20] sm:$0xff]  ;;  %v9707_v12 = vld [vmem:[%s15705_s5 + $0x30] sm:$0xff]  ;;  %v9708_v13 = vld [vmem:[%s15705_s5 + $0x38] sm:$0xff] }
 0x3ba   :  { %v11672_v20 = vpop.f32.mrb[91].mxu1  ;;  %v11920_v11 = vpack.c.bf16 %v9706_v10, %v9705_v9  ;;  %v11923_v14 = vpack.c.bf16 %v9708_v13, %v9707_v12  ;;  %v9711_v18 = vld [vmem:[%s15705_s5 + $0x50] sm:$0xf] }
 0x3bb   :  { %v9318_v21 = vadd.f32 %v11670_v17, %v9278_v16  ;;  %v9710_v16 = vld [vmem:[%s15705_s5 + $0x48] sm:$0xff]  ;;  %s12801_s5 = scalar_lea.vmem %s9806_s3, 32 }
 0x3bc   :  { %v11926_v17 = vpack.c.bf16 %v9710_v16, %v9709_v15  ;;  %p12802_p0 = scmp.ne.s32.totalorder %s9806_s3, %s12801_s5  ;;  %p12807_p2 = scmp.lt.s32.totalorder %s12801_s5, %s12801_s5 }
 0x3be   :  { %p12808_p3 = por %p12807_p2, %p12806_p1 }
 0x3c0   :  { %p12809_p4 = pnand %p12808_p3, %p12802_p0 }
 0x3d5   :  { %v11690_v24 = vpop.f32.mrb[92].mxu0 }
 0x3d6   :  { %v11691_v25 = vpop.f32.mrb[93].mxu0 }
 0x3d7   :  { %v11692_v26 = vadd.f32 %v11691_v25, %v11690_v24  ;;  %v11693_v27 = vpop.f32.mrb[94].mxu0  ;;  %v11712_v28 = vpop.f32.mrb[92].mxu1 }
 0x3d8   :  { %v11694_v29 = vpop.f32.mrb[95].mxu0  ;;  %v11713_v30 = vpop.f32.mrb[93].mxu1 }
 0x3d9   :  { %v9358_v31 = vadd.f32 %v11692_v26, %v9318_v21  ;;  %v11714_v32 = vadd.f32 %v11713_v30, %v11712_v28  ;;  %v11715_v33 = vpop.f32.mrb[94].mxu1 }
 0x3da   :  { %v11716_v34 = vpop.f32.mrb[95].mxu1 }
 0x3db   :  { %v9398_v35 = vadd.f32 %v11714_v32, %v9358_v31 }
 0x3f5   :  { %v11734_v36 = vpop.f32.mrb[96].mxu0 }
 0x3f6   :  { %v11735_v37 = vpop.f32.mrb[97].mxu0 }
 0x3f7   :  { %v11736_v38 = vadd.f32 %v11735_v37, %v11734_v36  ;;  %v11737_v39 = vpop.f32.mrb[98].mxu0  ;;  %v11756_v40 = vpop.f32.mrb[96].mxu1 }
 0x3f8   :  { %v11738_v42 = vpop.f32.mrb[99].mxu0  ;;  %v11757_v43 = vpop.f32.mrb[97].mxu1 }
 0x3f9   :  { %v9438_v44 = vadd.f32 %v11736_v38, %v9398_v35  ;;  %v11758_v45 = vadd.f32 %v11757_v43, %v11756_v40  ;;  %v11759_v46 = vpop.f32.mrb[98].mxu1 }
 0x3fa   :  { %v11760_v47 = vpop.f32.mrb[99].mxu1 }
 0x3fb   :  { %v9478_v48 = vadd.f32 %v11758_v45, %v9438_v44 }
 0x415   :  { %v11778_v49 = vpop.f32.mrb[100].mxu0 }
 0x416   :  { %v11779_v50 = vpop.f32.mrb[101].mxu0 }
 0x417   :  { %v11780_v51 = vadd.f32 %v11779_v50, %v11778_v49  ;;  %v11781_v52 = vpop.f32.mrb[102].mxu0  ;;  %v11800_v53 = vpop.f32.mrb[100].mxu1 }
 0x418   :  { %v11782_v54 = vpop.f32.mrb[103].mxu0  ;;  %v11801_v55 = vpop.f32.mrb[101].mxu1 }
 0x419   :  { %v9518_v57 = vadd.f32 %v11780_v51, %v9478_v48  ;;  %v11802_v58 = vadd.f32 %v11801_v55, %v11800_v53  ;;  %v11803_v59 = vpop.f32.mrb[102].mxu1 }
 0x41a   :  { %v11804_v60 = vpop.f32.mrb[103].mxu1 }
 0x41b   :  { %v9558_v61 = vadd.f32 %v11802_v58, %v9518_v57 }
 0x439   :  { %v9597_v0 = vpop.f32.mrb[104].mxu0 }
 0x43a   :  { %v9598_v1 = vadd.f32 %v9597_v0, %v9558_v61  ;;  %v9599_v2 = vpop.f32.mrb[105].mxu0 }
 0x43b   :  { %v9600_v3 = vpop.f32.mrb[106].mxu0 }
 0x43c   :  { %v9603_v41 = vmax.f32 %v9598_v1, 0.0  ;;  %v9601_v5 = vpop.f32.mrb[107].mxu0 }
 0x43e   :  { %11865 = vmatmul.mubr.msk.f32.vlgmr.msra.gmra.mrb[104].mxu1 %vm9626_vm2, %v9603_v41 }
 0x43f   :  { %11915 = vmatpush3.bf16.msra.mxu1 %v11914_v4  ;;  %11889 = vmatprep.mubr.msk.f32.mxu1 %vm12829_vm1, %v12828_v22 }
 0x440   :  { %11916 = vmatprep.subr.bf16.mxu1 %v12827_v56 }
 0x443   :  { %11918 = vmatpush3.bf16.msra.mxu1 %v11917_v8 }
 0x444   :  { %11919 = vmatprep.subr.bf16.mxu1 %v12827_v56 }
 0x447   :  { %11921 = vmatpush3.bf16.msra.mxu1 %v11920_v11 }
 0x448   :  { %11922 = vmatprep.subr.bf16.mxu1 %v12827_v56 }
 0x44b   :  { %11924 = vmatpush3.bf16.msra.mxu1 %v11923_v14 }
 0x44c   :  { %11925 = vmatprep.subr.bf16.mxu1 %v12827_v56  ;;  %v10657_v56 = vld [vmem:[%s15704_s4] ss:$0 sm:$0xff] }
 0x44f   :  { %11927 = vmatpush3.bf16.msra.mxu1 %v11926_v17 }
 0x450   :  { %11887 = vmatprep.subr.mxu1 %v12828_v22  ;;  %v10659_v22 = vld [vmem:[%s15706_s6] ss:$0 sm:$0xff] }
 0x453   :  { %11888 = vmatpush3.msk.msra.mxu1 %vm9723_vm3, %v9711_v18 }
 0x511   :  { %v9696_v19 = vpop.f32.mrb[104].mxu1 }
 0x512   :  { %v9697_v20 = vadd.f32 %v10657_v56, %v9696_v19  ;;  %v11866_v21 = vpop.f32.mrb[105].mxu1 }
 0x514   :  { %v9700_v23 = vmax.f32 %v9697_v20, 0.0 }
 0x516   :  { %11890 = vmatmul.mubr.msk.f32.vlgmr.msra.gmra.mrb[106].mxu1 %vm9719_vm4, %v9700_v23 }
 0x5e9   :  { %v9793_v24 = vpop.f32.mrb[106].mxu1 }
 0x5ea   :  { %v9794_v25 = vadd.f32 %v10659_v22, %v9793_v24  ;;  %v11891_v26 = vpop.f32.mrb[107].mxu1 }
 0x5ec   :  { %9798 = vst.msk [vmem:[#allocation2] sm:$0x3] %vm9797_vm5, %v9794_v25 }
 0x5ed   :  { %12812 = shalt.err (!%p12809_p4)
}
 0x5ee   :  { %s12813_s12 = scalar_lea.hbm %s15707_s7, 32 }
 0x5ef   :  { %p12814_p5 = scmp.ne.s32.totalorder %s15707_s7, %s12813_s12  ;;  %p12817_p6 = scmp.lt.u32.totalorder %s12813_s12, %s15707_s7 }
 0x5f1   :  { %p12819_p7 = pnand %p12817_p6, %p12814_p5 }
 0x5f3   :  { %12822 = shalt.err (!%p12819_p7)
}
 0x5f4   :  { %9808 = dma.vmem_to_hbm [thread:$0]  %s9806_s3, 32, %s15707_s7, [#allocation3]  }
 0x5f5   :  { %12823 = dma.done.wait [#allocation3], 32  }
 0x5f6   :  { %12824 = vsyncadd [#allocation3], 4294967264 }
 0x5f7   :  { %9812 = vsyncpa [#allocation3], 1 }

</bundles_post_ra>
